<compile_context>
chip_gen: v7x
topology: tpu7x:2x2x1
jax: 0.10.0
libtpu: 0.0.40
codegen_flags: <defaults>
</compile_context>

<pallas_src>
import functools

import jax
import jax.numpy as jnp
from jax.experimental import pallas as pl
from jax.experimental.pallas import tpu as pltpu


def _round_up(v, m):
    return ((v + m - 1) // m) * m


# ---------------------------------------------------------------------------
# Fused Pallas kernel: conv1 -> conv2 -> conv3, each Conv1d+bias+ReLU+MaxPool(2)
# ---------------------------------------------------------------------------
def _fused_cnn_hapt_kernel(x_ref, w1_ref, b1_ref, w2_ref, b2_ref,
                           w3_ref, b3_ref, o_ref, *, lout1):
    # x_ref : (b, L1r, KC1)  bf16  stage-1 im2col windows (rows/cols zero-padded)
    # w1_ref: (KC1, 32)      bf16  im2col-flattened conv1 weights (zero-padded rows)
    # wN_ref: (K, Cin, Cout) bf16  per-tap weight matrices for conv2/conv3
    # bN_ref: (1, Cout)      f32
    # o_ref : (b, Lp3, 256)  f32   pooled conv3 output, channels-last (lane-dense)
    # All intermediates stay in VMEM/vregs; the batch tile is fully vectorized.
    f32 = jnp.float32
    bf16 = jnp.bfloat16

    def maxpool2(y, lout):
        # y: (b, Lpad, C) f32; valid conv rows are [0, lout).  Floor-mode pool.
        b, _, c = y.shape
        lp = lout // 2
        pairs = y[:, :2 * lp, :].reshape(b, lp, 2, c)
        return jnp.max(pairs, axis=2)                                  # (b, lp, c)

    def conv_relu_pool(p, w_ref, b_ref, pad):
        # p: (b, lin, cin) f32.  Conv1d(K, stride=1, padding=pad) + ReLU + pool.
        b, lin, cin = p.shape
        k, _, cout = w_ref.shape
        lout = lin + 2 * pad - k + 1
        lpad = _round_up(lin + 2 * pad, 16)          # sublane/bf16-pack friendly
        xp = jnp.concatenate(
            [jnp.zeros((b, pad, cin), bf16),
             p.astype(bf16),
             jnp.zeros((b, lpad - lin - pad, cin), bf16)], axis=1)     # (b, lpad, cin)
        # Flat 2-D slab: per-item zero padding keeps conv windows from leaking
        # across batch items; k-1 extra zero rows keep every shifted slice
        # in-bounds so all K matmul operands share one static shape.
        flat = jnp.concatenate(
            [xp.reshape(b * lpad, cin), jnp.zeros((k - 1, cin), bf16)], axis=0)
        acc = jnp.zeros((b * lpad, cout), f32)
        for kk in range(k):                                            # static, K=3
            acc = acc + jnp.dot(flat[kk:kk + b * lpad, :], w_ref[kk],
                                preferred_element_type=f32)
        y = jnp.maximum(acc + b_ref[...], 0.0)                         # bias + ReLU
        return maxpool2(y.reshape(b, lpad, cout), lout)

    # ---- Stage 1: im2col already done in XLA -> single 2-D matmul ----------
    b, l1r, kc1 = x_ref.shape
    c1 = w1_ref.shape[1]
    y1 = jnp.dot(x_ref[...].reshape(b * l1r, kc1), w1_ref[...],
                 preferred_element_type=f32)
    y1 = jnp.maximum(y1 + b1_ref[...], 0.0)
    p1 = maxpool2(y1.reshape(b, l1r, c1), lout1)                       # (b, 31, 32)

    # ---- Stages 2 & 3: K=3 shifted matmuls of depth Cin ---------------------
    p2 = conv_relu_pool(p1, w2_ref, b2_ref, pad=2)                     # (b, 16, 128)
    p3 = conv_relu_pool(p2, w3_ref, b3_ref, pad=2)                     # (b,  9, 256)

    o_ref[...] = p3.astype(o_ref.dtype)                                # one 3-D store


# ---------------------------------------------------------------------------
# Wrapper: layout glue + pallas_call.
# ---------------------------------------------------------------------------
def cnn_network_hapt_forward(x, params, *, block_b=32):
    """x: (N, 3, L) float32.  Returns (N, 256, Lp3) matching the PyTorch module."""
    n, c0, l0 = x.shape
    k1, pad = 6, 2

    # Static stage geometry.
    lout1 = l0 + 2 * pad - k1 + 1
    lp1 = lout1 // 2
    lout2 = lp1 + 2 * pad - 3 + 1
    lp2 = lout2 // 2
    lout3 = lp2 + 2 * pad - 3 + 1
    lp3 = lout3 // 2
    c1, c2, c3 = (params[f"w{i}"].shape[0] for i in (1, 2, 3))

    # ---- weights: k-major / ci-minor layouts, bf16 (MXU-native) -------------
    kc1 = _round_up(k1 * c0, 8)                       # 18 -> 24 (zero weight rows)
    w1m = jnp.transpose(params["w1"], (2, 1, 0)).reshape(k1 * c0, c1)
    w1m = jnp.pad(w1m, ((0, kc1 - k1 * c0), (0, 0))).astype(jnp.bfloat16)
    w2m = jnp.transpose(params["w2"], (2, 1, 0)).astype(jnp.bfloat16)  # (3, 32, 128)
    w3m = jnp.transpose(params["w3"], (2, 1, 0)).astype(jnp.bfloat16)  # (3,128, 256)
    b1m, b2m, b3m = (params[f"b{i}"].reshape(1, -1).astype(jnp.float32)
                     for i in (1, 2, 3))

    # ---- batch tile: several items/step, but keep >= 2 grid steps (v7x) -----
    block_b = max(1, min(block_b, 64))                # ~6-8 MiB VMEM/step at 64
    b_tile = max(1, min(block_b, n))
    if n >= 2:
        b_tile = min(b_tile, -(-n // 2))              # grid >= 2 whenever N >= 2
    n_pad = -(-n // b_tile) * b_tile

    # ---- stage-1 im2col in XLA: lane-dense, contiguous HBM tile -------------
    l1r = _round_up(lout1, 16)
    x_nlc = jnp.transpose(x.astype(jnp.float32), (0, 2, 1))            # (N, L, 3)
    xp = jnp.pad(x_nlc, ((0, n_pad - n), (pad, pad), (0, 0)))
    cols = jnp.concatenate([xp[:, k:k + lout1, :] for k in range(k1)], axis=2)
    cols = jnp.pad(cols, ((0, 0), (0, l1r - lout1), (0, kc1 - k1 * c0)))
    cols = cols.astype(jnp.bfloat16)                                   # (n_pad, 64, 24)

    flops = 2 * n_pad * (lout1 * k1 * c0 * c1
                         + lout2 * 3 * c1 * c2
                         + lout3 * 3 * c2 * c3)
    bytes_accessed = (cols.size * 2
                      + (w1m.size + w2m.size + w3m.size) * 2
                      + (b1m.size + b2m.size + b3m.size) * 4
                      + n_pad * lp3 * c3 * 4)

    kernel = functools.partial(_fused_cnn_hapt_kernel, lout1=lout1)

    out_nlc = pl.pallas_call(
        kernel,
        out_shape=jax.ShapeDtypeStruct((n_pad, lp3, c3), jnp.float32),
        grid=(n_pad // b_tile,),
        in_specs=[
            pl.BlockSpec((b_tile, l1r, kc1), lambda i: (i, 0, 0)),
            # Weights/biases: constant index_map -> VMEM-resident across grid.
            pl.BlockSpec(w1m.shape, lambda i: (0, 0)),
            pl.BlockSpec(b1m.shape, lambda i: (0, 0)),
            pl.BlockSpec(w2m.shape, lambda i: (0, 0, 0)),
            pl.BlockSpec(b2m.shape, lambda i: (0, 0)),
            pl.BlockSpec(w3m.shape, lambda i: (0, 0, 0)),
            pl.BlockSpec(b3m.shape, lambda i: (0, 0)),
        ],
        out_specs=pl.BlockSpec((b_tile, lp3, c3), lambda i: (i, 0, 0)),
        compiler_params=pltpu.CompilerParams(
            dimension_semantics=("parallel",)),
        cost_estimate=pl.CostEstimate(
            flops=flops, transcendentals=0, bytes_accessed=bytes_accessed),
    )(cols, w1m, b1m, w2m, b2m, w3m, b3m)

    out_nlc = out_nlc[:n]
    # TODO(synk): Dropout(p=0.1) is stochastic only in train mode; eval-mode
    # identity semantics are used here (pltpu.prng_* would be needed otherwise).
    # NCL transpose kept in XLA so the kernel's HBM output stays lane-dense.
    return jnp.transpose(out_nlc, (0, 2, 1))                           # (N, 256, Lp3)


# ---------------------------------------------------------------------------
# Pure-JAX reference (for correctness check only).
# ---------------------------------------------------------------------------
def _block_ref(x, w, b, padding):
    y = jax.lax.conv_general_dilated(
        x, w, window_strides=(1,), padding=[(padding, padding)],
        dimension_numbers=("NCH", "OIH", "NCH"))
    y = jax.nn.relu(y + b[None, :, None])
    n, c, l = y.shape
    lp = l // 2
    return y[:, :, :2 * lp].reshape(n, c, lp, 2).max(-1)


def _forward_ref(x, params):
    out = _block_ref(x, params["w1"], params["b1"], 2)
    out = _block_ref(out, params["w2"], params["b2"], 2)
    out = _block_ref(out, params["w3"], params["b3"], 2)
    return out


# ---------------------------------------------------------------------------
# Deterministic parameter init + smoke test.
# ---------------------------------------------------------------------------
def _init_params(key):
    ks = jax.random.split(key, 6)
    scale = 0.1
    return {
        "w1": scale * jax.random.normal(ks[0], (32, 3, 6), jnp.float32),
        "b1": scale * jax.random.normal(ks[1], (32,), jnp.float32),
        "w2": scale * jax.random.normal(ks[2], (128, 32, 3), jnp.float32),
        "b2": scale * jax.random.normal(ks[3], (128,), jnp.float32),
        "w3": scale * jax.random.normal(ks[4], (256, 128, 3), jnp.float32),
        "b3": scale * jax.random.normal(ks[5], (256,), jnp.float32),
    }


if __name__ == "__main__":
    root = jax.random.PRNGKey(0)
    k_param, k_x = jax.random.split(root)
    params = _init_params(k_param)

    # (batch=5, in_channels=3, length=64): odd batch -> exercises batch padding,
    # a vectorized tile (b_tile=3) and a 2-step grid (both v7x TCs get work).
    x = jax.random.normal(k_x, (5, 3, 64), jnp.float32)

    fwd = jax.jit(cnn_network_hapt_forward)
    out = jax.block_until_ready(fwd(x, params))

    ref = jax.block_until_ready(_forward_ref(x, params))
    assert out.shape == ref.shape, (out.shape, ref.shape)              # (5, 256, 9)
    max_err = float(jnp.max(jnp.abs(out - ref)))
    # bf16 matmul operands (f32 accumulation) vs. the pure-f32 reference.
    assert jnp.allclose(out, ref, rtol=5e-2, atol=5e-2), max_err

    print("KERNEL_OK")
</pallas_src>

<mosaic_0001>
module attributes {stable_mosaic.version = 11 : i64} {
  func.func @_fused_cnn_hapt_kernel(%arg0: i32, %arg1: memref<3x64x24xbf16, #tpu.memory_space<vmem>>, %arg2: memref<24x32xbf16, #tpu.memory_space<vmem>>, %arg3: memref<1x32xf32, #tpu.memory_space<vmem>>, %arg4: memref<3x32x128xbf16, #tpu.memory_space<vmem>>, %arg5: memref<1x128xf32, #tpu.memory_space<vmem>>, %arg6: memref<3x128x256xbf16, #tpu.memory_space<vmem>>, %arg7: memref<1x256xf32, #tpu.memory_space<vmem>>, %arg8: memref<3x9x256xf32, #tpu.memory_space<vmem>>) attributes {dimension_semantics = [#tpu.dimension_semantics<parallel>], iteration_bounds = array<i64: 2>, scalar_prefetch = 0 : i64, scratch_operands = 0 : i64, tpu.core_type = #tpu.core_type<tc>, window_params = [{transform_indices = @transform_0, window_bounds = array<i64: 3, 64, 24>}, {pipeline_mode = #tpu.pipeline_mode<synchronous>, transform_indices = @transform_1, window_bounds = array<i64: 24, 32>}, {pipeline_mode = #tpu.pipeline_mode<synchronous>, transform_indices = @transform_2, window_bounds = array<i64: 1, 32>}, {pipeline_mode = #tpu.pipeline_mode<synchronous>, transform_indices = @transform_3, window_bounds = array<i64: 3, 32, 128>}, {pipeline_mode = #tpu.pipeline_mode<synchronous>, transform_indices = @transform_4, window_bounds = array<i64: 1, 128>}, {pipeline_mode = #tpu.pipeline_mode<synchronous>, transform_indices = @transform_5, window_bounds = array<i64: 3, 128, 256>}, {pipeline_mode = #tpu.pipeline_mode<synchronous>, transform_indices = @transform_6, window_bounds = array<i64: 1, 256>}, {transform_indices = @transform_7, window_bounds = array<i64: 3, 9, 256>}]} {
    %c0 = arith.constant 0 : index
    %c0_0 = arith.constant 0 : index
    %c0_1 = arith.constant 0 : index
    %0 = vector.load %arg1[%c0, %c0_0, %c0_1] : memref<3x64x24xbf16, #tpu.memory_space<vmem>>, vector<3x64x24xbf16>
    %1 = vector.shape_cast %0 : vector<3x64x24xbf16> to vector<192x24xbf16>
    %c0_2 = arith.constant 0 : index
    %c0_3 = arith.constant 0 : index
    %2 = vector.load %arg2[%c0_2, %c0_3] : memref<24x32xbf16, #tpu.memory_space<vmem>>, vector<24x32xbf16>
    %cst = arith.constant dense<0.000000e+00> : vector<192x32xf32>
    %3 = tpu.matmul %1, %2, %cst {dimension_numbers = #tpu.dot_dimension_numbers<[1], [0], [0], [1], [0, 0, 1, 1], [], []>} : vector<192x24xbf16>, vector<24x32xbf16>, vector<192x32xf32> -> vector<192x32xf32>
    %c0_4 = arith.constant 0 : index
    %c0_5 = arith.constant 0 : index
    %4 = vector.load %arg3[%c0_4, %c0_5] : memref<1x32xf32, #tpu.memory_space<vmem>>, vector<1x32xf32>
    %5 = vector.broadcast %4 : vector<1x32xf32> to vector<192x32xf32>
    %6 = arith.addf %3, %5 : vector<192x32xf32>
    %cst_6 = arith.constant 0.000000e+00 : f32
    %7 = vector.broadcast %cst_6 : f32 to vector<192x32xf32>
    %8 = arith.maximumf %6, %7 : vector<192x32xf32>
    %9 = vector.shape_cast %8 : vector<192x32xf32> to vector<3x64x32xf32>
    %10 = vector.extract_strided_slice %9 {offsets = [0, 0, 0], sizes = [3, 62, 32], strides = [1, 1, 1]} : vector<3x64x32xf32> to vector<3x62x32xf32>
    %11 = vector.shape_cast %10 : vector<3x62x32xf32> to vector<3x31x2x32xf32>
    %cst_7 = arith.constant dense<0xFF800000> : vector<3x31x32xf32>
    %12 = vector.multi_reduction <maximumf>, %11, %cst_7 [2] : vector<3x31x2x32xf32> to vector<3x31x32xf32>
    %cst_8 = arith.constant 0.000000e+00 : bf16
    %13 = vector.broadcast %cst_8 : bf16 to vector<3x2x32xbf16>
    %14 = arith.truncf %12 : vector<3x31x32xf32> to vector<3x31x32xbf16>
    %cst_9 = arith.constant 0.000000e+00 : bf16
    %15 = vector.broadcast %cst_9 : bf16 to vector<3x15x32xbf16>
    %16 = tpu.concatenate %13, %14, %15 in 1 : vector<3x2x32xbf16>, vector<3x31x32xbf16>, vector<3x15x32xbf16> -> vector<3x48x32xbf16>
    %17 = vector.shape_cast %16 : vector<3x48x32xbf16> to vector<144x32xbf16>
    %cst_10 = arith.constant 0.000000e+00 : bf16
    %18 = vector.broadcast %cst_10 : bf16 to vector<2x32xbf16>
    %19 = tpu.concatenate %17, %18 in 0 : vector<144x32xbf16>, vector<2x32xbf16> -> vector<146x32xbf16>
    %cst_11 = arith.constant 0.000000e+00 : f32
    %20 = vector.broadcast %cst_11 : f32 to vector<144x128xf32>
    %21 = vector.extract_strided_slice %19 {offsets = [0, 0], sizes = [144, 32], strides = [1, 1]} : vector<146x32xbf16> to vector<144x32xbf16>
    %c0_12 = arith.constant 0 : index
    %c0_13 = arith.constant 0 : index
    %c0_14 = arith.constant 0 : index
    %22 = vector.load %arg4[%c0_12, %c0_13, %c0_14] : memref<3x32x128xbf16, #tpu.memory_space<vmem>>, vector<1x32x128xbf16>
    %23 = vector.shape_cast %22 : vector<1x32x128xbf16> to vector<32x128xbf16>
    %cst_15 = arith.constant dense<0.000000e+00> : vector<144x128xf32>
    %24 = tpu.matmul %21, %23, %cst_15 {dimension_numbers = #tpu.dot_dimension_numbers<[1], [0], [0], [1], [0, 0, 1, 1], [], []>} : vector<144x32xbf16>, vector<32x128xbf16>, vector<144x128xf32> -> vector<144x128xf32>
    %25 = arith.addf %20, %24 : vector<144x128xf32>
    %26 = vector.extract_strided_slice %19 {offsets = [1, 0], sizes = [144, 32], strides = [1, 1]} : vector<146x32xbf16> to vector<144x32xbf16>
    %c1 = arith.constant 1 : index
    %c0_16 = arith.constant 0 : index
    %c0_17 = arith.constant 0 : index
    %27 = vector.load %arg4[%c1, %c0_16, %c0_17] : memref<3x32x128xbf16, #tpu.memory_space<vmem>>, vector<1x32x128xbf16>
    %28 = vector.shape_cast %27 : vector<1x32x128xbf16> to vector<32x128xbf16>
    %cst_18 = arith.constant dense<0.000000e+00> : vector<144x128xf32>
    %29 = tpu.matmul %26, %28, %cst_18 {dimension_numbers = #tpu.dot_dimension_numbers<[1], [0], [0], [1], [0, 0, 1, 1], [], []>} : vector<144x32xbf16>, vector<32x128xbf16>, vector<144x128xf32> -> vector<144x128xf32>
    %30 = arith.addf %25, %29 : vector<144x128xf32>
    %31 = vector.extract_strided_slice %19 {offsets = [2, 0], sizes = [144, 32], strides = [1, 1]} : vector<146x32xbf16> to vector<144x32xbf16>
    %c2 = arith.constant 2 : index
    %c0_19 = arith.constant 0 : index
    %c0_20 = arith.constant 0 : index
    %32 = vector.load %arg4[%c2, %c0_19, %c0_20] : memref<3x32x128xbf16, #tpu.memory_space<vmem>>, vector<1x32x128xbf16>
    %33 = vector.shape_cast %32 : vector<1x32x128xbf16> to vector<32x128xbf16>
    %cst_21 = arith.constant dense<0.000000e+00> : vector<144x128xf32>
    %34 = tpu.matmul %31, %33, %cst_21 {dimension_numbers = #tpu.dot_dimension_numbers<[1], [0], [0], [1], [0, 0, 1, 1], [], []>} : vector<144x32xbf16>, vector<32x128xbf16>, vector<144x128xf32> -> vector<144x128xf32>
    %35 = arith.addf %30, %34 : vector<144x128xf32>
    %c0_22 = arith.constant 0 : index
    %c0_23 = arith.constant 0 : index
    %36 = vector.load %arg5[%c0_22, %c0_23] : memref<1x128xf32, #tpu.memory_space<vmem>>, vector<1x128xf32>
    %37 = vector.broadcast %36 : vector<1x128xf32> to vector<144x128xf32>
    %38 = arith.addf %35, %37 : vector<144x128xf32>
    %cst_24 = arith.constant 0.000000e+00 : f32
    %39 = vector.broadcast %cst_24 : f32 to vector<144x128xf32>
    %40 = arith.maximumf %38, %39 : vector<144x128xf32>
    %41 = vector.shape_cast %40 : vector<144x128xf32> to vector<3x48x128xf32>
    %42 = vector.extract_strided_slice %41 {offsets = [0, 0, 0], sizes = [3, 32, 128], strides = [1, 1, 1]} : vector<3x48x128xf32> to vector<3x32x128xf32>
    %43 = vector.shape_cast %42 : vector<3x32x128xf32> to vector<3x16x2x128xf32>
    %cst_25 = arith.constant dense<0xFF800000> : vector<3x16x128xf32>
    %44 = vector.multi_reduction <maximumf>, %43, %cst_25 [2] : vector<3x16x2x128xf32> to vector<3x16x128xf32>
    %cst_26 = arith.constant 0.000000e+00 : bf16
    %45 = vector.broadcast %cst_26 : bf16 to vector<3x2x128xbf16>
    %46 = arith.truncf %44 : vector<3x16x128xf32> to vector<3x16x128xbf16>
    %cst_27 = arith.constant 0.000000e+00 : bf16
    %47 = vector.broadcast %cst_27 : bf16 to vector<3x14x128xbf16>
    %48 = tpu.concatenate %45, %46, %47 in 1 : vector<3x2x128xbf16>, vector<3x16x128xbf16>, vector<3x14x128xbf16> -> vector<3x32x128xbf16>
    %49 = vector.shape_cast %48 : vector<3x32x128xbf16> to vector<96x128xbf16>
    %cst_28 = arith.constant 0.000000e+00 : bf16
    %50 = vector.broadcast %cst_28 : bf16 to vector<2x128xbf16>
    %51 = tpu.concatenate %49, %50 in 0 : vector<96x128xbf16>, vector<2x128xbf16> -> vector<98x128xbf16>
    %cst_29 = arith.constant 0.000000e+00 : f32
    %52 = vector.broadcast %cst_29 : f32 to vector<96x256xf32>
    %53 = vector.extract_strided_slice %51 {offsets = [0, 0], sizes = [96, 128], strides = [1, 1]} : vector<98x128xbf16> to vector<96x128xbf16>
    %c0_30 = arith.constant 0 : index
    %c0_31 = arith.constant 0 : index
    %c0_32 = arith.constant 0 : index
    %54 = vector.load %arg6[%c0_30, %c0_31, %c0_32] : memref<3x128x256xbf16, #tpu.memory_space<vmem>>, vector<1x128x256xbf16>
    %55 = vector.shape_cast %54 : vector<1x128x256xbf16> to vector<128x256xbf16>
    %cst_33 = arith.constant dense<0.000000e+00> : vector<96x256xf32>
    %56 = tpu.matmul %53, %55, %cst_33 {dimension_numbers = #tpu.dot_dimension_numbers<[1], [0], [0], [1], [0, 0, 1, 1], [], []>} : vector<96x128xbf16>, vector<128x256xbf16>, vector<96x256xf32> -> vector<96x256xf32>
    %57 = arith.addf %52, %56 : vector<96x256xf32>
    %58 = vector.extract_strided_slice %51 {offsets = [1, 0], sizes = [96, 128], strides = [1, 1]} : vector<98x128xbf16> to vector<96x128xbf16>
    %c1_34 = arith.constant 1 : index
    %c0_35 = arith.constant 0 : index
    %c0_36 = arith.constant 0 : index
    %59 = vector.load %arg6[%c1_34, %c0_35, %c0_36] : memref<3x128x256xbf16, #tpu.memory_space<vmem>>, vector<1x128x256xbf16>
    %60 = vector.shape_cast %59 : vector<1x128x256xbf16> to vector<128x256xbf16>
    %cst_37 = arith.constant dense<0.000000e+00> : vector<96x256xf32>
    %61 = tpu.matmul %58, %60, %cst_37 {dimension_numbers = #tpu.dot_dimension_numbers<[1], [0], [0], [1], [0, 0, 1, 1], [], []>} : vector<96x128xbf16>, vector<128x256xbf16>, vector<96x256xf32> -> vector<96x256xf32>
    %62 = arith.addf %57, %61 : vector<96x256xf32>
    %63 = vector.extract_strided_slice %51 {offsets = [2, 0], sizes = [96, 128], strides = [1, 1]} : vector<98x128xbf16> to vector<96x128xbf16>
    %c2_38 = arith.constant 2 : index
    %c0_39 = arith.constant 0 : index
    %c0_40 = arith.constant 0 : index
    %64 = vector.load %arg6[%c2_38, %c0_39, %c0_40] : memref<3x128x256xbf16, #tpu.memory_space<vmem>>, vector<1x128x256xbf16>
    %65 = vector.shape_cast %64 : vector<1x128x256xbf16> to vector<128x256xbf16>
    %cst_41 = arith.constant dense<0.000000e+00> : vector<96x256xf32>
    %66 = tpu.matmul %63, %65, %cst_41 {dimension_numbers = #tpu.dot_dimension_numbers<[1], [0], [0], [1], [0, 0, 1, 1], [], []>} : vector<96x128xbf16>, vector<128x256xbf16>, vector<96x256xf32> -> vector<96x256xf32>
    %67 = arith.addf %62, %66 : vector<96x256xf32>
    %c0_42 = arith.constant 0 : index
    %c0_43 = arith.constant 0 : index
    %68 = vector.load %arg7[%c0_42, %c0_43] : memref<1x256xf32, #tpu.memory_space<vmem>>, vector<1x256xf32>
    %69 = vector.broadcast %68 : vector<1x256xf32> to vector<96x256xf32>
    %70 = arith.addf %67, %69 : vector<96x256xf32>
    %cst_44 = arith.constant 0.000000e+00 : f32
    %71 = vector.broadcast %cst_44 : f32 to vector<96x256xf32>
    %72 = arith.maximumf %70, %71 : vector<96x256xf32>
    %73 = vector.shape_cast %72 : vector<96x256xf32> to vector<3x32x256xf32>
    %74 = vector.extract_strided_slice %73 {offsets = [0, 0, 0], sizes = [3, 18, 256], strides = [1, 1, 1]} : vector<3x32x256xf32> to vector<3x18x256xf32>
    %75 = vector.shape_cast %74 : vector<3x18x256xf32> to vector<3x9x2x256xf32>
    %cst_45 = arith.constant dense<0xFF800000> : vector<3x9x256xf32>
    %76 = vector.multi_reduction <maximumf>, %75, %cst_45 [2] : vector<3x9x2x256xf32> to vector<3x9x256xf32>
    %c0_46 = arith.constant 0 : index
    %c0_47 = arith.constant 0 : index
    %c0_48 = arith.constant 0 : index
    %77 = vector.load %arg8[%c0_46, %c0_47, %c0_48] : memref<3x9x256xf32, #tpu.memory_space<vmem>>, vector<3x9x256xf32>
    tpu.vector_store %arg8[%c0_46, %c0_47, %c0_48], %76 {strides = array<i32>} : memref<3x9x256xf32, #tpu.memory_space<vmem>>, vector<3x9x256xf32>,
    return
  }
  func.func @transform_0(%arg0: i32) -> (i32, i32, i32) {
    %c0_i32 = arith.constant 0 : i32
    %c0_i32_0 = arith.constant 0 : i32
    %c0_i32_1 = arith.constant 0 : i32
    return %arg0, %c0_i32, %c0_i32_0 : i32, i32, i32
  }
  func.func @transform_1(%arg0: i32) -> (i32, i32) {
    %c0_i32 = arith.constant 0 : i32
    %c0_i32_0 = arith.constant 0 : i32
    %c0_i32_1 = arith.constant 0 : i32
    return %c0_i32, %c0_i32_0 : i32, i32
  }
  func.func @transform_2(%arg0: i32) -> (i32, i32) {
    %c0_i32 = arith.constant 0 : i32
    %c0_i32_0 = arith.constant 0 : i32
    %c0_i32_1 = arith.constant 0 : i32
    return %c0_i32, %c0_i32_0 : i32, i32
  }
  func.func @transform_3(%arg0: i32) -> (i32, i32, i32) {
    %c0_i32 = arith.constant 0 : i32
    %c0_i32_0 = arith.constant 0 : i32
    %c0_i32_1 = arith.constant 0 : i32
    %c0_i32_2 = arith.constant 0 : i32
    return %c0_i32, %c0_i32_0, %c0_i32_1 : i32, i32, i32
  }
  func.func @transform_4(%arg0: i32) -> (i32, i32) {
    %c0_i32 = arith.constant 0 : i32
    %c0_i32_0 = arith.constant 0 : i32
    %c0_i32_1 = arith.constant 0 : i32
    return %c0_i32, %c0_i32_0 : i32, i32
  }
  func.func @transform_5(%arg0: i32) -> (i32, i32, i32) {
    %c0_i32 = arith.constant 0 : i32
    %c0_i32_0 = arith.constant 0 : i32
    %c0_i32_1 = arith.constant 0 : i32
    %c0_i32_2 = arith.constant 0 : i32
    return %c0_i32, %c0_i32_0, %c0_i32_1 : i32, i32, i32
  }
  func.func @transform_6(%arg0: i32) -> (i32, i32) {
    %c0_i32 = arith.constant 0 : i32
    %c0_i32_0 = arith.constant 0 : i32
    %c0_i32_1 = arith.constant 0 : i32
    return %c0_i32, %c0_i32_0 : i32, i32
  }
  func.func @transform_7(%arg0: i32) -> (i32, i32, i32) {
    %c0_i32 = arith.constant 0 : i32
    %c0_i32_0 = arith.constant 0 : i32
    %c0_i32_1 = arith.constant 0 : i32
    return %arg0, %c0_i32, %c0_i32_0 : i32, i32, i32
  }
}

</mosaic_0001>

<bundles_post_ra>
// kernel: cnn_network_hapt_forward.1
= control target key start
LH: loop header
LB: loop body
LE: loop exit
PB: predicated region body
PF: predicated region fallthrough
CT: control target
= control target key end

     0   :  { %s5745_s24 = smov 0   ;;  %s7505_s0 = inlined_call_operand.vmem [shape: bf16[6,64,24], index: 0, kind: input, shape index: {}]   ;;  %s7506_s1 = inlined_call_operand.vmem [shape: bf16[24,32], index: 1, kind: input, shape index: {}]   ;;  %s7507_s2 = inlined_call_operand.vmem [shape: f32[1,32], index: 2, kind: input, shape index: {}]   ;;  %s7508_s3 = inlined_call_operand.vmem [shape: bf16[3,32,128], index: 3, kind: input, shape index: {}]   ;;  %s7509_s4 = inlined_call_operand.vmem [shape: f32[1,128], index: 4, kind: input, shape index: {}]   ;;  %s7510_s5 = inlined_call_operand.vmem [shape: bf16[3,128,256], index: 5, kind: input, shape index: {}]   ;;  %s7511_s6 = inlined_call_operand.vmem [shape: f32[1,256], index: 6, kind: input, shape index: {}]   ;;  %s7512_s7 = inlined_call_operand.vmem [shape: f32[6,9,256], index: 7, kind: output, shape index: {}]  }
   0x1 LB: > { %s5185_s25 = sadd.s32 4294967295, %s5699_s24   ;;  %p5189_p0 = scmp.ge.s32.totalorder %s5699_s24, 1  ;;  %s5699_s24 = sphi %s5745_s24, %s17_s24  }
   0x2   : > { %p239_p1 = scmp.lt.s32.totalorder %s5699_s24, 3 }
   0x4   : > { %p240_p2 = pnand %p5189_p0, %p239_p1 }
   0x6   : > { %243 = sbr.rel (%p240_p2) target bundleno = 1410 (0x582), region = 48 }
   0xd   : > { %v5598_v0 = vld [vmem:[%s7506_s1] sm:$0xff]   ;;  %vm428_vm0 = vcmask 1043456   ;;  %v5599_v1 = vld [vmem:[%s7506_s1 + $0x8] ss:$0 sps:$4 sm:$0xff]   ;;  %s273_s30 = smul.u32 3, %s5185_s25  ;;  %vm391_vm1 = vcmask 195584   ;;  %v613_v19 = vlaneseq }
   0xe   : > { %5409 = vmatprep.subr.bf16.mxu1 %v5598_v0  ;;  %v430_v2 = vsel %vm428_vm0, %v5599_v1, 0  ;;  %v5612_v15 = vld [vmem:[%s7508_s3 + $0x10] sm:$0xff]   ;;  %v7513_v16 = vmov 0.0   ;;  %v5702_v17 = vmov 1983009808   ;;  %vm1107_vm2 = vcmask 254976  }
   0xf   : > { %5410 = vmatpush3.bf16.msra.mxu1 %v5598_v0  ;;  %p274_p3 = scmp.lt.s32.totalorder %s273_s30, 5  ;;  %5477 = vmatprep.subr.bf16.mxu0 %v7513_v16  ;;  %v611_v18 = vunpack.c.l.s4 %v5702_v17  ;;  %v5785_v21 = vshrl.u32 %v613_v19, 7  ;;  %v5790_v22 = vld [vmem:[%s7507_s2] ss:$0 sm:$0xff]  ;;  %vm2048_vm3 = vcmask 1041409   ;;  %vm2050_vm4 = vcmask 1042434  }
  0x10   : > { %5585 = vmatprep.subr.msk.bf16.mxu1 %vm428_vm0, %v5599_v1  ;;  %vm5703_vm5 = vmmov 0   ;;  %vm2038_vm6 = vcmask 1043459   ;;  %vm2040_vm7 = vcmask 1044484   ;;  %vm2042_vm8 = vcmask 1045509  }
  0x11   : > { %s7629_s30 = smov (!%p274_p3, %s273_s30), 5  ;;  %v612_v20 = vunpack.c.0.s8 %v611_v18  ;;  %7527 = vst [vmem:[#allocation2_spill] sm:$0xff] %v5785_v21  ;;  %vm2044_vm9 = vcmask 1046534   ;;  %vm2046_vm10 = vcmask 1047559   ;;  %vm2243_vm11 = vcmask 261120  }
  0x12   : > { %s5357_s8 = sshll.u32 %s7629_s30, 5  ;;  %vm2135_vm12 = vcmask 1040384   ;;  %vm2144_vm13 = vsmask.f32 256  ;;  %vm2158_vm14 = vsmask.f32 7424 }
  0x13   : > { %5412 = vmatpush3.bf16.msra.mxu1 %v430_v2  ;;  %s278_s11 = scalar_lea.vmem %s7505_s0, %s5357_s8  ;;  %v5794_v25 = vsub.s32 %v612_v20, %v5785_v21  ;;  %vm6412_vm15 = vmand %vm2135_vm12, %vm2144_vm13  ;;  %vm2511_vm0 = vcmask 1046528   ;;  %s7319_s14 = scalar_lea.vmem %s7512_s7, %s5357_s8 }
  0x14   : > { %v5600_v3 = vld [vmem:[%s278_s11] sm:$0xff]   ;;  %v5601_v4 = vld [vmem:[%s278_s11 + $0x8] sm:$0xff]   ;;  %v5602_v5 = vld [vmem:[%s278_s11 + $0x10] sm:$0xff]   ;;  %5437 = vmatprep.subr.bf16.mxu1 %v7513_v16 }
  0x15   : > { %5413 = vmatprep.mubr.msk.bf16.mxu1 %vm391_vm1, %v5600_v3  ;;  %v5603_v6 = vld [vmem:[%s278_s11 + $0x18] sm:$0xff]   ;;  %v5604_v7 = vld [vmem:[%s278_s11 + $0x20] sm:$0xff]   ;;  %v5605_v8 = vld [vmem:[%s278_s11 + $0x28] sm:$0xff]  }
  0x16   : > { %5414 = vmatmul.mubr.msk.bf16.vlgmr.msra.gmra.mrb[0].mxu1 %vm391_vm1, %v5601_v4  ;;  %v5606_v9 = vld [vmem:[%s278_s11 + $0x30] sm:$0xff]   ;;  %v5607_v10 = vld [vmem:[%s278_s11 + $0x38] sm:$0xff]   ;;  %v5608_v11 = vld [vmem:[%s278_s11 + $0x40] sm:$0xff]  }
  0x17   : > { %5417 = vmatprep.mubr.msk.bf16.mxu1 %vm391_vm1, %v5602_v5  ;;  %v5609_v12 = vld [vmem:[%s278_s11 + $0x48] sm:$0xff]   ;;  %v5610_v13 = vld [vmem:[%s278_s11 + $0x50] sm:$0xff]   ;;  %v5611_v14 = vld [vmem:[%s278_s11 + $0x58] sm:$0xff]   ;;  %5438 = vmatpush3.bf16.msra.mxu1 %v5612_v15 }
  0x18   : > { %5439 = vmatprep.subr.bf16.mxu1 %v7513_v16 }
  0x1e   : > { %5418 = vmatmul.mubr.msk.bf16.gmra.mrb[4].mxu1 %vm391_vm1, %v5603_v6 }
  0x1f   : > { %5421 = vmatprep.mubr.msk.bf16.mxu1 %vm391_vm1, %v5604_v7 }
  0x26   : > { %5422 = vmatmul.mubr.msk.bf16.gmra.mrb[8].mxu1 %vm391_vm1, %v5605_v8 }
  0x27   : > { %5425 = vmatprep.mubr.msk.bf16.mxu1 %vm391_vm1, %v5606_v9 }
  0x2e   : > { %5426 = vmatmul.mubr.msk.bf16.gmra.mrb[12].mxu1 %vm391_vm1, %v5607_v10 }
  0x2f   : > { %5429 = vmatprep.mubr.msk.bf16.mxu1 %vm391_vm1, %v5608_v11 }
  0x36   : > { %5430 = vmatmul.mubr.msk.bf16.gmra.mrb[16].mxu1 %vm391_vm1, %v5609_v12 }
  0x37   : > { %5433 = vmatprep.mubr.msk.bf16.mxu1 %vm391_vm1, %v5610_v13 }
  0x3e   : > { %5434 = vmatmul.mubr.msk.bf16.gmra.mrb[20].mxu1 %vm391_vm1, %v5611_v14  ;;  %vm2976_vm1 = vcmask 1041408  }
  0xe9   : > { %v5415_v23 = vpop.f32.mrb[0].mxu1 }
  0xea   : > { %v475_v24 = vadd.f32 %v5415_v23, %v5790_v22  ;;  %v466_v26 = vpop.f32.mrb[1].mxu1 }
  0xeb   : > { %v467_v27 = vadd.f32 %v5790_v22, %v466_v26  ;;  %v5416_v28 = vpop.f32.mrb[2].mxu1 }
  0xec   : > { %v563_v29 = vmax.f32 %v475_v24, 0.0  ;;  %v478_v30 = vadd.f32 %v5416_v28, %v5790_v22  ;;  %v469_v31 = vpop.f32.mrb[3].mxu1 }
  0xed   : > { %v561_v32 = vmax.f32 %v467_v27, 0.0  ;;  %v5801_v37 = vadd.f32 %v5790_v22, %v469_v31 }
  0xee   : > { %v643_v33 = vcombine.high %v563_v29, %v563_v29  ;;  %v650_v34 = vrot.slane %v563_v29, %v5794_v25  ;;  %v5805_v41 = vmax.f32 %v478_v30, 0.0 }
  0xef   : > { %v609_v35 = vcombine.high %v561_v32, %v561_v32  ;;  %v616_v36 = vrot.slane %v561_v32, %v5794_v25 }
  0xf0   : > { %v657_v38 = vrot.slane %v643_v33, %v5794_v25  ;;  %v658_v39 = vcombine.high %v650_v34, %v650_v34  ;;  %v1164_v40 = vsel %vm1107_vm2, %v650_v34, -inf }
  0xf1   : > { %v1165_v42 = vrot.slane %v1164_v40, 4  ;;  %v623_v43 = vrot.slane %v609_v35, %v5794_v25  ;;  %v624_v44 = vcombine.high %v616_v36, %v616_v36  ;;  %v1108_v45 = vsel %vm1107_vm2, %v616_v36, -inf  ;;  %v5809_v46 = vpop.f32.mrb[4].mxu1 }
  0xf2   : > { %v659_v47 = vcombine.high %v657_v38, %v657_v38  ;;  %v1171_v48 = vsel %vm1107_vm2, %v658_v39, -inf  ;;  %v1178_v49 = vsel %vm1107_vm2, %v657_v38, -inf  ;;  %v1109_v50 = vrot.slane %v1108_v45, 4  ;;  %v5813_v51 = vpop.f32.mrb[5].mxu1 }
  0xf3   : > { %v1166_v52 = vmax.f32 %v1164_v40, %v1165_v42  ;;  %v1172_v53 = vrot.slane %v1171_v48, 4  ;;  %v1179_v54 = vrot.slane %v1178_v49, 4  ;;  %v625_v55 = vcombine.high %v623_v43, %v623_v43  ;;  %v5815_v56 = vpop.f32.mrb[6].mxu1 }
  0xf4   : > { %v1185_v57 = vsel %vm1107_vm2, %v659_v47, -inf  ;;  %v1110_v58 = vmax.f32 %v1108_v45, %v1109_v50  ;;  %v1115_v59 = vsel %vm1107_vm2, %v624_v44, -inf  ;;  %v1122_v60 = vsel %vm1107_vm2, %v623_v43, -inf  ;;  %v5820_v61 = vpop.f32.mrb[7].mxu1 }
  0xf5   : > { %v1167_v62 = vrot.slane %v1166_v52, 2  ;;  %v1173_v63 = vmax.f32 %v1171_v48, %v1172_v53  ;;  %v1180_v0 = vmax.f32 %v1178_v49, %v1179_v54  ;;  %v1186_v1 = vrot.slane %v1185_v57, 4 }
  0xf6   : > { %v1111_v2 = vrot.slane %v1110_v58, 2  ;;  %v1116_v3 = vrot.slane %v1115_v59, 4  ;;  %v1123_v4 = vrot.slane %v1122_v60, 4  ;;  %v1129_v5 = vsel %vm1107_vm2, %v625_v55, -inf }
  0xf7   : > { %v1168_v6 = vmax.f32 %v1166_v52, %v1167_v62  ;;  %v1174_v7 = vrot.slane %v1173_v63, 2  ;;  %v1181_v8 = vrot.slane %v1180_v0, 2  ;;  %v1187_v9 = vmax.f32 %v1185_v57, %v1186_v1 }
  0xf8   : > { %v1112_v10 = vmax.f32 %v1110_v58, %v1111_v2  ;;  %v1117_v11 = vmax.f32 %v1115_v59, %v1116_v3  ;;  %v1124_v12 = vmax.f32 %v1122_v60, %v1123_v4  ;;  %v1130_v13 = vrot.slane %v1129_v5, 4 }
  0xf9   : > { %v1169_v14 = vrot.slane %v1168_v6, 1  ;;  %v1175_v15 = vmax.f32 %v1173_v63, %v1174_v7  ;;  %v1182_v17 = vmax.f32 %v1180_v0, %v1181_v8  ;;  %v1188_v18 = vrot.slane %v1187_v9, 2  ;;  %v5823_v19 = vpop.f32.mrb[8].mxu1 }
  0xfa   : > { %v1113_v20 = vrot.slane %v1112_v10, 1  ;;  %v1118_v23 = vrot.slane %v1117_v11, 2  ;;  %v1125_v24 = vrot.slane %v1124_v12, 2  ;;  %v1131_v26 = vmax.f32 %v1129_v5, %v1130_v13  ;;  %v5825_v27 = vpop.f32.mrb[9].mxu1 }
  0xfb   : > { %v1170_v28 = vmax.f32 %v1168_v6, %v1169_v14  ;;  %v1176_v29 = vrot.slane %v1175_v15, 1  ;;  %v1183_v30 = vrot.slane %v1182_v17, 1  ;;  %v1189_v31 = vmax.f32 %v1187_v9, %v1188_v18  ;;  %v5827_v32 = vpop.f32.mrb[10].mxu1 }
  0xfc   : > { %v1114_v33 = vmax.f32 %v1112_v10, %v1113_v20  ;;  %v1119_v34 = vmax.f32 %v1117_v11, %v1118_v23  ;;  %v1126_v35 = vmax.f32 %v1124_v12, %v1125_v24  ;;  %v1132_v36 = vrot.slane %v1131_v26, 2  ;;  %v5829_v38 = vpop.f32.mrb[11].mxu1 }
  0xfd   : > { %v1177_v39 = vmax.f32 %v1175_v15, %v1176_v29  ;;  %v1184_v40 = vmax.f32 %v1182_v17, %v1183_v30  ;;  %v1190_v42 = vrot.slane %v1189_v31, 1  ;;  %v1767_v43 = vpack.c.bf16 %v1170_v28, %v1170_v28 }
  0xfe   : > { %v1120_v44 = vrot.slane %v1119_v34, 1  ;;  %v1127_v45 = vrot.slane %v1126_v35, 1  ;;  %v1133_v47 = vmax.f32 %v1131_v26, %v1132_v36  ;;  %v660_v48 = vcombine.high %v5805_v41, %v5805_v41 }
  0xff   : > { %v1759_v49 = vpack.c.bf16 %v1114_v33, %v1114_v33  ;;  %v562_v50 = vmax.f32 %v5801_v37, 0.0  ;;  %v5834_v52 = vmax.f32 %v1189_v31, %v1190_v42  ;;  %v1768_v53 = vpack.c.bf16 %v1177_v39, %v1177_v39 }
 0x100   : > { %v1769_v54 = vpack.c.bf16 %v1184_v40, %v1184_v40  ;;  %v5836_v55 = vunpack.c.l.b16 %v1767_v43  ;;  %v667_v57 = vrot.slane %v5805_v41, %v5794_v25  ;;  %v5842_v59 = vmax.f32 %v1119_v34, %v1120_v44 }
 0x101   : > { %v5840_v58 = vpop.f32.mrb[12].mxu1  ;;  %v5844_v60 = vmax.f32 %v1126_v35, %v1127_v45  ;;  %v1134_v62 = vrot.slane %v1133_v47, 1  ;;  %v674_v63 = vrot.slane %v660_v48, %v5794_v25  ;;  %v5849_v37 = vunpack.c.l.b16 %v1759_v49 }
 0x102   : > { %v5847_v0 = vpop.f32.mrb[13].mxu1  ;;  %v675_v1 = vcombine.high %v667_v57, %v667_v57  ;;  %v1192_v2 = vsel %vm1107_vm2, %v667_v57, -inf  ;;  %v626_v3 = vcombine.high %v562_v50, %v562_v50  ;;  %v1770_v41 = vpack.c.bf16 %v5834_v52, %v5834_v52 }
 0x103   : > { %v5852_v4 = vpop.f32.mrb[14].mxu1  ;;  %v5856_v5 = vunpack.c.l.b16 %v1768_v53  ;;  %v5858_v6 = vunpack.c.l.b16 %v1769_v54  ;;  %v676_v7 = vcombine.high %v674_v63, %v674_v63  ;;  %v1193_v9 = vrot.slane %v1192_v2, 4 }
 0x104   : > { %v5860_v8 = vpop.f32.mrb[15].mxu1  ;;  %v1199_v10 = vsel %vm1107_vm2, %v675_v1, -inf  ;;  %v1206_v11 = vsel %vm1107_vm2, %v674_v63, -inf  ;;  %v633_v12 = vrot.slane %v562_v50, %v5794_v25  ;;  %v1135_v13 = vmax.f32 %v1133_v47, %v1134_v62 }
 0x105   : > { %v1200_v14 = vrot.slane %v1199_v10, 4  ;;  %v1207_v15 = vrot.slane %v1206_v11, 4  ;;  %v1213_v17 = vsel %vm1107_vm2, %v676_v7, -inf  ;;  %v1194_v18 = vmax.f32 %v1192_v2, %v1193_v9 }
 0x106   : > { %v1214_v20 = vrot.slane %v1213_v17, 4  ;;  %v640_v23 = vrot.slane %v626_v3, %v5794_v25  ;;  %v641_v24 = vcombine.high %v633_v12, %v633_v12  ;;  %v1760_v26 = vpack.c.bf16 %v5842_v59, %v5842_v59 }
 0x107   : > { %v1201_v28 = vmax.f32 %v1199_v10, %v1200_v14  ;;  %v1208_v29 = vmax.f32 %v1206_v11, %v1207_v15  ;;  %v1136_v30 = vsel %vm1107_vm2, %v633_v12, -inf  ;;  %v1195_v31 = vrot.slane %v1194_v18, 2 }
 0x108   : > { %v1215_v33 = vmax.f32 %v1213_v17, %v1214_v20  ;;  %v642_v34 = vcombine.high %v640_v23, %v640_v23  ;;  %v1137_v35 = vrot.slane %v1136_v30, 4  ;;  %v1143_v40 = vsel %vm1107_vm2, %v641_v24, -inf }
 0x109   : > { %v5870_v36 = vpop.f32.mrb[16].mxu1  ;;  %v1209_v39 = vrot.slane %v1208_v29, 2  ;;  %v1150_v42 = vsel %vm1107_vm2, %v640_v23, -inf  ;;  %v491_v43 = vadd.f32 %v5809_v46, %v5790_v22  ;;  %v1196_v45 = vmax.f32 %v1194_v18, %v1195_v31  ;;  %v5614_v18 = vld [vmem:[%s7508_s3] sm:$0xff]  }
 0x10a   : > { %v5876_v44 = vpop.f32.mrb[17].mxu1  ;;  %v1216_v47 = vrot.slane %v1215_v33, 2  ;;  %v1138_v48 = vmax.f32 %v1136_v30, %v1137_v35  ;;  %v1144_v49 = vrot.slane %v1143_v40, 4  ;;  %v1202_v50 = vrot.slane %v1201_v28, 2  ;;  %5478 = vmatpush3.bf16.msra.mxu0 %v5614_v18 }
 0x10b   : > { %v1210_v52 = vmax.f32 %v1208_v29, %v1209_v39  ;;  %v1151_v53 = vrot.slane %v1150_v42, 4  ;;  %v1157_v54 = vsel %vm1107_vm2, %v642_v34, -inf  ;;  %v1197_v57 = vrot.slane %v1196_v45, 1  ;;  %5479 = vmatprep.subr.bf16.mxu0 %v7513_v16 }
 0x10c   : > { %v1217_v59 = vmax.f32 %v1215_v33, %v1216_v47  ;;  %v1139_v62 = vrot.slane %v1138_v48, 2  ;;  %v1145_v63 = vmax.f32 %v1143_v40, %v1144_v49  ;;  %v1761_v1 = vpack.c.bf16 %v5844_v60, %v5844_v60  ;;  %v5893_v33 = vpop.f32.mrb[18].mxu1 }
 0x10d   : > { %v1211_v2 = vrot.slane %v1210_v52, 1  ;;  %v1152_v46 = vmax.f32 %v1150_v42, %v1151_v53  ;;  %v1158_v3 = vrot.slane %v1157_v54, 4  ;;  %v1762_v7 = vpack.c.bf16 %v1135_v13, %v1135_v13  ;;  %v5899_v40 = vpop.f32.mrb[19].mxu1 }
 0x10e   : > { %v1198_v9 = vmax.f32 %v1196_v45, %v1197_v57  ;;  %v1218_v10 = vrot.slane %v1217_v59, 1  ;;  %v1140_v11 = vmax.f32 %v1138_v48, %v1139_v62  ;;  %v5881_v12 = vmax.f32 %v1201_v28, %v1202_v50  ;;  %v5613_v28 = vld [vmem:[%s7508_s3 + $0x18] sm:$0xff]  }
 0x10f   : > { %v1153_v14 = vrot.slane %v1152_v46, 2  ;;  %v1159_v15 = vmax.f32 %v1157_v54, %v1158_v3  ;;  %v567_v17 = vmax.f32 %v491_v43, 0.0  ;;  %v5886_v20 = vunpack.c.l.b16 %v1770_v41  ;;  %5440 = vmatpush3.bf16.msra.mxu1 %v5613_v28 }
 0x110   : > { %v1212_v23 = vmax.f32 %v1210_v52, %v1211_v2  ;;  %v1219_v60 = vmax.f32 %v1217_v59, %v1218_v10  ;;  %v1146_v24 = vrot.slane %v1145_v63, 2  ;;  %v5888_v29 = vunpack.c.l.b16 %v1760_v26  ;;  %5557 = vmatprep.subr.bf16.mxu1 %v7513_v16 }
 0x111   : > { %v1154_v13 = vmax.f32 %v1152_v46, %v1153_v14  ;;  %v1160_v30 = vrot.slane %v1159_v15, 2  ;;  %v711_v31 = vcombine.high %v567_v17, %v567_v17  ;;  %v5895_v34 = vunpack.c.l.b16 %v1761_v1 }
 0x112   : > { %v5897_v35 = vunpack.c.l.b16 %v1762_v7  ;;  %v1771_v41 = vpack.c.bf16 %v1198_v9, %v1198_v9  ;;  %v1141_v39 = vrot.slane %v1140_v11, 1  ;;  %v718_v45 = vrot.slane %v567_v17, %v5794_v25 }
 0x113   : > { %v1155_v42 = vrot.slane %v1154_v13, 1  ;;  %v1161_v43 = vmax.f32 %v1159_v15, %v1160_v30  ;;  %v1773_v47 = vpack.c.bf16 %v1212_v23, %v1212_v23  ;;  %v1774_v48 = vpack.c.bf16 %v1219_v60, %v1219_v60 }
 0x114   : > { %v5904_v49 = vmax.f32 %v1145_v63, %v1146_v24  ;;  %v725_v50 = vrot.slane %v711_v31, %v5794_v25  ;;  %v726_v53 = vcombine.high %v718_v45, %v718_v45  ;;  %v1276_v54 = vsel %vm1107_vm2, %v718_v45, -inf }
 0x115   : > { %v1162_v52 = vrot.slane %v1161_v43, 1  ;;  %v483_v57 = vadd.f32 %v5790_v22, %v5813_v51  ;;  %v5911_v59 = vunpack.c.l.b16 %v1771_v41  ;;  %v1142_v62 = vmax.f32 %v1140_v11, %v1141_v39 }
 0x116   : > { %v727_v1 = vcombine.high %v725_v50, %v725_v50  ;;  %v1277_v2 = vrot.slane %v1276_v54, 4  ;;  %v1156_v46 = vmax.f32 %v1154_v13, %v1155_v42  ;;  %v1283_v63 = vsel %vm1107_vm2, %v726_v53, -inf }
 0x117   : > { %v1163_v3 = vmax.f32 %v1161_v43, %v1162_v52  ;;  %v1290_v7 = vsel %vm1107_vm2, %v725_v50, -inf  ;;  %v1284_v10 = vrot.slane %v1283_v63, 4  ;;  %v1959_v17 = vunpack.c.l.b16 %v1773_v47 }
 0x118   : > { %v1278_v9 = vmax.f32 %v1276_v54, %v1277_v2  ;;  %v1291_v14 = vrot.slane %v1290_v7, 4  ;;  %v1297_v15 = vsel %vm1107_vm2, %v727_v1, -inf  ;;  %v565_v23 = vmax.f32 %v483_v57, 0.0 }
 0x119   : > { %v1298_v18 = vrot.slane %v1297_v15, 4  ;;  %v1960_v11 = vunpack.c.l.b16 %v1774_v48  ;;  %v1285_v24 = vmax.f32 %v1283_v63, %v1284_v10  ;;  %v1765_v30 = vpack.c.bf16 %v1156_v46, %v1156_v46 }
 0x11a   : > { %v1279_v60 = vrot.slane %v1278_v9, 2  ;;  %v1292_v13 = vmax.f32 %v1290_v7, %v1291_v14  ;;  %v677_v28 = vcombine.high %v565_v23, %v565_v23  ;;  %v684_v41 = vrot.slane %v565_v23, %v5794_v25 }
 0x11b   : > { %v1299_v31 = vmax.f32 %v1297_v15, %v1298_v18  ;;  %v1766_v39 = vpack.c.bf16 %v1163_v3, %v1163_v3  ;;  %v1286_v43 = vrot.slane %v1285_v24, 2  ;;  %v494_v53 = vadd.f32 %v5815_v56, %v5790_v22 }
 0x11c   : > { %v1280_v42 = vmax.f32 %v1278_v9, %v1279_v60  ;;  %v1293_v45 = vrot.slane %v1292_v13, 2  ;;  %v691_v47 = vrot.slane %v677_v28, %v5794_v25  ;;  %v692_v52 = vcombine.high %v684_v41, %v684_v41 }
 0x11d   : > { %v1300_v50 = vrot.slane %v1299_v31, 2  ;;  %v1287_v54 = vmax.f32 %v1285_v24, %v1286_v43  ;;  %v1220_v1 = vsel %vm1107_vm2, %v684_v41, -inf  ;;  %v1763_v7 = vpack.c.bf16 %v1142_v62, %v1142_v62 }
 0x11e   : > { %v1281_v48 = vrot.slane %v1280_v42, 1  ;;  %v1294_v57 = vmax.f32 %v1292_v13, %v1293_v45  ;;  %v693_v46 = vcombine.high %v691_v47, %v691_v47  ;;  %v1221_v63 = vrot.slane %v1220_v1, 4 }
 0x11f   : > { %v1301_v2 = vmax.f32 %v1299_v31, %v1300_v50  ;;  %v1227_v3 = vsel %vm1107_vm2, %v692_v52, -inf  ;;  %v1951_v9 = vunpack.c.l.b16 %v1765_v30  ;;  %v1952_v10 = vunpack.c.l.b16 %v1766_v39 }
 0x120   : > { %v1228_v14 = vrot.slane %v1227_v3, 4  ;;  %v1288_v15 = vrot.slane %v1287_v54, 1  ;;  %v1222_v18 = vmax.f32 %v1220_v1, %v1221_v63  ;;  %v1234_v23 = vsel %vm1107_vm2, %v691_v47, -inf }
 0x121   : > { %v1241_v56 = vsel %vm1107_vm2, %v693_v46, -inf  ;;  %v1282_v60 = vmax.f32 %v1280_v42, %v1281_v48  ;;  %v1295_v24 = vrot.slane %v1294_v57, 1  ;;  %v568_v28 = vmax.f32 %v494_v53, 0.0 }
 0x122   : > { %v1229_v13 = vmax.f32 %v1227_v3, %v1228_v14  ;;  %v1302_v41 = vrot.slane %v1301_v2, 1  ;;  %v1223_v31 = vrot.slane %v1222_v18, 2  ;;  %v1235_v43 = vrot.slane %v1234_v23, 4 }
 0x123   : > { %v1242_v45 = vrot.slane %v1241_v56, 4  ;;  %v2057_v50 = vsel %vm2048_vm3, %v1960_v11, %v1959_v17  ;;  %v5926_v62 = vunpack.c.l.b16 %v1763_v7  ;;  %v5929_v30 = vsel %vm2048_vm3, %v1952_v10, %v1951_v9 }
 0x124   : > { %v1230_v39 = vrot.slane %v1229_v13, 2  ;;  %v1289_v47 = vmax.f32 %v1287_v54, %v1288_v15  ;;  %v1224_v52 = vmax.f32 %v1222_v18, %v1223_v31  ;;  %v1236_v1 = vmax.f32 %v1234_v23, %v1235_v43 }
 0x125   : > { %v1243_v42 = vmax.f32 %v1241_v56, %v1242_v45  ;;  %v1296_v48 = vmax.f32 %v1294_v57, %v1295_v24  ;;  %v1783_v46 = vpack.c.bf16 %v1282_v60, %v1282_v60  ;;  %v728_v63 = vcombine.high %v568_v28, %v568_v28  ;;  %v5615_v57 = vld [vmem:[%s7508_s3 + $0x8] sm:$0xff]  }
 0x126   : > { %v1231_v53 = vmax.f32 %v1229_v13, %v1230_v39  ;;  %v1303_v3 = vmax.f32 %v1301_v2, %v1302_v41  ;;  %v1225_v14 = vrot.slane %v1224_v52, 1  ;;  %v1237_v26 = vrot.slane %v1236_v1, 2  ;;  %5480 = vmatpush3.bf16.msra.mxu0 %v5615_v57 }
 0x127   : > { %v1244_v51 = vrot.slane %v1243_v42, 2  ;;  %v735_v11 = vrot.slane %v568_v28, %v5794_v25  ;;  %v742_v7 = vrot.slane %v728_v63, %v5794_v25  ;;  %v486_v9 = vadd.f32 %v5790_v22, %v5820_v61 }
 0x128   : > { %v1232_v17 = vrot.slane %v1231_v53, 1  ;;  %v1784_v54 = vpack.c.bf16 %v1289_v47, %v1289_v47  ;;  %v1226_v10 = vmax.f32 %v1224_v52, %v1225_v14  ;;  %v1238_v15 = vmax.f32 %v1236_v1, %v1237_v26  ;;  %v5945_v52 = vpop.f32.mrb[20].mxu1 }
 0x129   : > { %v1245_v18 = vmax.f32 %v1243_v42, %v1244_v51  ;;  %v1785_v2 = vpack.c.bf16 %v1296_v48, %v1296_v48  ;;  %v5938_v23 = vunpack.c.l.b16 %v1783_v46  ;;  %v743_v56 = vcombine.high %v735_v11, %v735_v11 }
 0x12a   : > { %v1304_v60 = vsel %vm1107_vm2, %v735_v11, -inf  ;;  %v1786_v24 = vpack.c.bf16 %v1303_v3, %v1303_v3  ;;  %v1233_v13 = vmax.f32 %v1231_v53, %v1232_v17  ;;  %v1775_v28 = vpack.c.bf16 %v1226_v10, %v1226_v10 }
 0x12b   : > { %7528 = vst [vmem:[#allocation3_spill] sm:$0xff] %v5938_v23  ;;  %v1305_v41 = vrot.slane %v1304_v60, 4  ;;  %v1311_v61 = vsel %vm1107_vm2, %v743_v56, -inf  ;;  %v1318_v26 = vsel %vm1107_vm2, %v742_v7, -inf  ;;  %v566_v51 = vmax.f32 %v486_v9, 0.0  ;;  %v5956_v9 = vpop.f32.mrb[21].mxu1 }
 0x12c   : > { %v507_v31 = vadd.f32 %v5823_v19, %v5790_v22  ;;  %v1239_v43 = vrot.slane %v1238_v15, 1  ;;  %v1246_v45 = vrot.slane %v1245_v18, 1  ;;  %v1961_v39 = vunpack.c.l.b16 %v1775_v28 }
 0x12d   : > { %v1306_v47 = vmax.f32 %v1304_v60, %v1305_v41  ;;  %v5947_v1 = vunpack.c.l.b16 %v1784_v54  ;;  %v5949_v42 = vunpack.c.l.b16 %v1785_v2  ;;  %v1312_v48 = vrot.slane %v1311_v61, 4 }
 0x12e   : > { %v694_v46 = vcombine.high %v566_v51, %v566_v51  ;;  %v1776_v53 = vpack.c.bf16 %v1233_v13, %v1233_v13  ;;  %v5952_v63 = vsel %vm2050_vm4, %v1961_v39, %v2057_v50  ;;  %v1319_v14 = vrot.slane %v1318_v26, 4 }
 0x12f   : > { %7529 = vst [vmem:[#allocation4_spill] sm:$0xff] %v5947_v1  ;;  %7530 = vst [vmem:[#allocation5_spill] sm:$0xff] %v5949_v42  ;;  %v1307_v3 = vrot.slane %v1306_v47, 2  ;;  %v1313_v17 = vmax.f32 %v1311_v61, %v1312_v48  ;;  %v701_v19 = vrot.slane %v566_v51, %v5794_v25  ;;  %v571_v7 = vmax.f32 %v507_v31, 0.0 }
 0x130   : > { %v708_v11 = vrot.slane %v694_v46, %v5794_v25  ;;  %v5958_v54 = vunpack.c.l.b16 %v1786_v24  ;;  %v1240_v10 = vmax.f32 %v1238_v15, %v1239_v43  ;;  %v5960_v57 = vmax.f32 %v1245_v18, %v1246_v45 }
 0x131   : > { %v1308_v2 = vmax.f32 %v1306_v47, %v1307_v3  ;;  %v1314_v56 = vrot.slane %v1313_v17, 2  ;;  %v709_v60 = vcombine.high %v701_v19, %v701_v19  ;;  %v1248_v13 = vsel %vm1107_vm2, %v701_v19, -inf }
 0x132   : > { %7531 = vst [vmem:[#allocation6_spill] sm:$0xff] %v5958_v54  ;;  %v710_v50 = vcombine.high %v708_v11, %v708_v11  ;;  %v5963_v28 = vunpack.c.l.b16 %v1776_v53  ;;  %v1249_v41 = vrot.slane %v1248_v13, 4  ;;  %v1262_v61 = vsel %vm1107_vm2, %v708_v11, -inf }
 0x133   : > { %v778_v51 = vcombine.high %v571_v7, %v571_v7  ;;  %v5966_v31 = vmax.f32 %v1318_v26, %v1319_v14  ;;  %v1255_v24 = vsel %vm1107_vm2, %v709_v60, -inf  ;;  %v1263_v39 = vrot.slane %v1262_v61, 4 }
 0x134   : > { %v1269_v15 = vsel %vm1107_vm2, %v710_v50, -inf  ;;  %v1309_v18 = vrot.slane %v1308_v2, 1  ;;  %v1250_v43 = vmax.f32 %v1248_v13, %v1249_v41  ;;  %v1256_v45 = vrot.slane %v1255_v24, 4 }
 0x135   : > { %7532 = vst [vmem:[#allocation7_spill] sm:$0xff] %v5966_v31  ;;  %v1270_v47 = vrot.slane %v1269_v15, 4  ;;  %v1315_v48 = vmax.f32 %v1313_v17, %v1314_v56  ;;  %v1264_v46 = vmax.f32 %v1262_v61, %v1263_v39  ;;  %v785_v53 = vrot.slane %v571_v7, %v5794_v25 }
 0x136   : > { %v792_v3 = vrot.slane %v778_v51, %v5794_v25  ;;  %v1777_v19 = vpack.c.bf16 %v1240_v10, %v1240_v10  ;;  %v1251_v11 = vrot.slane %v1250_v43, 2  ;;  %v1257_v16 = vmax.f32 %v1255_v24, %v1256_v45 }
 0x137   : > { %v1271_v26 = vmax.f32 %v1269_v15, %v1270_v47  ;;  %v1778_v14 = vpack.c.bf16 %v5960_v57, %v5960_v57  ;;  %v1265_v60 = vrot.slane %v1264_v46, 2  ;;  %v793_v21 = vcombine.high %v785_v53, %v785_v53 }
 0x138   : > { %v794_v50 = vcombine.high %v792_v3, %v792_v3  ;;  %v1310_v31 = vmax.f32 %v1308_v2, %v1309_v18  ;;  %v1252_v13 = vmax.f32 %v1250_v43, %v1251_v11  ;;  %v1258_v41 = vrot.slane %v1257_v16, 2 }
 0x139   : > { %v1272_v54 = vrot.slane %v1271_v26, 2  ;;  %v1316_v17 = vrot.slane %v1315_v48, 1  ;;  %v1266_v56 = vmax.f32 %v1264_v46, %v1265_v60  ;;  %v1381_v7 = vsel %vm1107_vm2, %v785_v53, -inf }
 0x13a   : > { %v1388_v61 = vsel %vm1107_vm2, %v793_v21, -inf  ;;  %v1253_v10 = vrot.slane %v1252_v13, 1  ;;  %v1259_v51 = vmax.f32 %v1257_v16, %v1258_v41  ;;  %v1382_v39 = vrot.slane %v1381_v7, 4 }
 0x13b   : > { %v1273_v24 = vmax.f32 %v1271_v26, %v1272_v54  ;;  %v1267_v15 = vrot.slane %v1266_v56, 1  ;;  %v1389_v45 = vrot.slane %v1388_v61, 4  ;;  %v1395_v57 = vsel %vm1107_vm2, %v792_v3, -inf }
 0x13c   : > { %v1402_v47 = vsel %vm1107_vm2, %v794_v50, -inf  ;;  %v1254_v2 = vmax.f32 %v1252_v13, %v1253_v10  ;;  %v1260_v18 = vrot.slane %v1259_v51, 1  ;;  %v1383_v11 = vmax.f32 %v1381_v7, %v1382_v39 }
 0x13d   : > { %v1274_v43 = vrot.slane %v1273_v24, 1  ;;  %v5978_v42 = vunpack.c.l.b16 %v1777_v19  ;;  %v1390_v46 = vmax.f32 %v1388_v61, %v1389_v45  ;;  %v1396_v53 = vrot.slane %v1395_v57, 4 }
 0x13e   : > { %v1403_v60 = vrot.slane %v1402_v47, 4  ;;  %v1787_v21 = vpack.c.bf16 %v1310_v31, %v1310_v31  ;;  %v1384_v16 = vrot.slane %v1383_v11, 2  ;;  %v499_v54 = vadd.f32 %v5790_v22, %v5825_v27 }
 0x13f   : > { %v1275_v1 = vmax.f32 %v1273_v24, %v1274_v43  ;;  %v1268_v26 = vmax.f32 %v1266_v56, %v1267_v15  ;;  %v1391_v41 = vrot.slane %v1390_v46, 2  ;;  %v1397_v3 = vmax.f32 %v1395_v57, %v1396_v53 }
 0x140   : > { %v1404_v23 = vmax.f32 %v1402_v47, %v1403_v60  ;;  %v5982_v50 = vmax.f32 %v1315_v48, %v1316_v17  ;;  %v5984_v13 = vmax.f32 %v1259_v51, %v1260_v18  ;;  %v1779_v7 = vpack.c.bf16 %v1254_v2, %v1254_v2 }
 0x141   : > { %v1385_v19 = vmax.f32 %v1383_v11, %v1384_v16  ;;  %v1782_v10 = vpack.c.bf16 %v1275_v1, %v1275_v1  ;;  %v1392_v61 = vmax.f32 %v1390_v46, %v1391_v41  ;;  %v1398_v39 = vrot.slane %v1397_v3, 2 }
 0x142   : > { %7533 = vst [vmem:[#allocation8_spill] sm:$0xff] %v5982_v50  ;;  %v1405_v45 = vrot.slane %v1404_v23, 2  ;;  %v5986_v31 = vunpack.c.l.b16 %v1778_v14  ;;  %v5988_v24 = vunpack.c.l.b16 %v1787_v21  ;;  %v569_v43 = vmax.f32 %v499_v54, 0.0 }
 0x143   : > { %v510_v27 = vadd.f32 %v5827_v32, %v5790_v22  ;;  %v1781_v56 = vpack.c.bf16 %v1268_v26, %v1268_v26  ;;  %v1386_v15 = vrot.slane %v1385_v19, 1  ;;  %v1399_v48 = vmax.f32 %v1397_v3, %v1398_v39 }
 0x144   : > { %7534 = vst [vmem:[#allocation9_spill] sm:$0xff] %v5986_v31  ;;  %7535 = vst [vmem:[#allocation10_spill] sm:$0xff] %v5988_v24  ;;  %v1406_v17 = vmax.f32 %v1404_v23, %v1405_v45  ;;  %v744_v57 = vcombine.high %v569_v43, %v569_v43  ;;  %v751_v14 = vrot.slane %v569_v43, %v5794_v25  ;;  %v5997_v47 = vunpack.c.l.b16 %v1779_v7 }
 0x145   : > { %v1968_v2 = vunpack.c.l.b16 %v1782_v10  ;;  %v1393_v18 = vrot.slane %v1392_v61, 1  ;;  %v1400_v11 = vrot.slane %v1399_v48, 1  ;;  %v572_v23 = vmax.f32 %v510_v27, 0.0 }
 0x146   : > { %7536 = vst [vmem:[#allocation11_spill] sm:$0xff] %v5997_v47  ;;  %v758_v32 = vrot.slane %v744_v57, %v5794_v25  ;;  %v759_v46 = vcombine.high %v751_v14, %v751_v14  ;;  %v1325_v53 = vsel %vm1107_vm2, %v751_v14, -inf  ;;  %v1967_v60 = vunpack.c.l.b16 %v1781_v56 }
 0x147   : > { %v1387_v21 = vmax.f32 %v1385_v19, %v1386_v15  ;;  %v1407_v16 = vrot.slane %v1406_v17, 1  ;;  %v1326_v54 = vrot.slane %v1325_v53, 4  ;;  %v502_v7 = vadd.f32 %v5790_v22, %v5829_v38 }
 0x148   : > { %v760_v26 = vcombine.high %v758_v32, %v758_v32  ;;  %v1332_v41 = vsel %vm1107_vm2, %v759_v46, -inf  ;;  %v1339_v3 = vsel %vm1107_vm2, %v758_v32, -inf  ;;  %v6006_v10 = vsel %vm2048_vm3, %v1968_v2, %v1967_v60 }
 0x149   : > { %7537 = vst [vmem:[#allocation12_spill] sm:$0xff] %v6006_v10  ;;  %v1394_v39 = vmax.f32 %v1392_v61, %v1393_v18  ;;  %v1401_v45 = vmax.f32 %v1399_v48, %v1400_v11  ;;  %v1327_v43 = vmax.f32 %v1325_v53, %v1326_v54  ;;  %v1333_v57 = vrot.slane %v1332_v41, 4 }
 0x14a   : > { %v1340_v27 = vrot.slane %v1339_v3, 4  ;;  %v1346_v19 = vsel %vm1107_vm2, %v760_v26, -inf  ;;  %v795_v56 = vcombine.high %v572_v23, %v572_v23  ;;  %v1408_v15 = vmax.f32 %v1406_v17, %v1407_v16 }
 0x14b   : > { %v1798_v14 = vpack.c.bf16 %v1387_v21, %v1387_v21  ;;  %v1328_v51 = vrot.slane %v1327_v43, 2  ;;  %v1347_v46 = vrot.slane %v1346_v19, 4  ;;  %v1334_v1 = vmax.f32 %v1332_v41, %v1333_v57 }
 0x14c   : > { %v1341_v32 = vmax.f32 %v1339_v3, %v1340_v27  ;;  %v802_v24 = vrot.slane %v572_v23, %v5794_v25  ;;  %v809_v38 = vrot.slane %v795_v56, %v5794_v25  ;;  %v1799_v2 = vpack.c.bf16 %v1394_v39, %v1394_v39 }
 0x14d   : > { %v1800_v60 = vpack.c.bf16 %v1401_v45, %v1401_v45  ;;  %v1329_v61 = vmax.f32 %v1327_v43, %v1328_v51  ;;  %v1348_v48 = vmax.f32 %v1346_v19, %v1347_v46  ;;  %v1335_v18 = vrot.slane %v1334_v1, 2 }
 0x14e   : > { %v1342_v11 = vrot.slane %v1341_v32, 2  ;;  %v810_v53 = vcombine.high %v802_v24, %v802_v24  ;;  %v811_v54 = vcombine.high %v809_v38, %v809_v38  ;;  %v1409_v17 = vsel %vm1107_vm2, %v802_v24, -inf }
 0x14f   : > { %v1330_v26 = vrot.slane %v1329_v61, 1  ;;  %v1349_v50 = vrot.slane %v1348_v48, 2  ;;  %v1423_v21 = vsel %vm1107_vm2, %v809_v38, -inf  ;;  %v1336_v16 = vmax.f32 %v1334_v1, %v1335_v18 }
 0x150   : > { %v1343_v41 = vmax.f32 %v1341_v32, %v1342_v11  ;;  %v1410_v3 = vrot.slane %v1409_v17, 4  ;;  %v1416_v23 = vsel %vm1107_vm2, %v810_v53, -inf  ;;  %v1424_v51 = vrot.slane %v1423_v21, 4 }
 0x151   : > { %v1331_v57 = vmax.f32 %v1329_v61, %v1330_v26  ;;  %v1350_v39 = vmax.f32 %v1348_v48, %v1349_v50  ;;  %v1417_v45 = vrot.slane %v1416_v23, 4  ;;  %v1337_v43 = vrot.slane %v1336_v16, 1 }
 0x152   : > { %v1344_v27 = vrot.slane %v1343_v41, 1  ;;  %v1411_v19 = vmax.f32 %v1409_v17, %v1410_v3  ;;  %v1430_v56 = vsel %vm1107_vm2, %v811_v54, -inf  ;;  %v1425_v47 = vmax.f32 %v1423_v21, %v1424_v51 }
 0x153   : > { %v1351_v46 = vrot.slane %v1350_v39, 1  ;;  %v1418_v10 = vmax.f32 %v1416_v23, %v1417_v45  ;;  %v570_v24 = vmax.f32 %v502_v7, 0.0  ;;  %v1338_v31 = vmax.f32 %v1336_v16, %v1337_v43  ;;  %v6031_v43 = vpop.f32.mrb[22].mxu1 }
 0x154   : > { %v1345_v38 = vmax.f32 %v1343_v41, %v1344_v27  ;;  %v1412_v1 = vrot.slane %v1411_v19, 2  ;;  %v1431_v32 = vrot.slane %v1430_v56, 4  ;;  %v1801_v18 = vpack.c.bf16 %v1408_v15, %v1408_v15 }
 0x155   : > { %v1352_v11 = vmax.f32 %v1350_v39, %v1351_v46  ;;  %v1790_v53 = vpack.c.bf16 %v1331_v57, %v1331_v57  ;;  %v1426_v61 = vrot.slane %v1425_v47, 2  ;;  %v6015_v50 = vunpack.c.l.b16 %v1798_v14 }
 0x156   : > { %v1419_v48 = vrot.slane %v1418_v10, 2  ;;  %v1432_v26 = vmax.f32 %v1430_v56, %v1431_v32  ;;  %v523_v17 = vadd.f32 %v5840_v58, %v5790_v22  ;;  %v6019_v54 = vunpack.c.l.b16 %v1799_v2  ;;  %v6036_v56 = vpop.f32.mrb[23].mxu1 }
 0x157   : > { %7538 = vst [vmem:[#allocation13_spill] sm:$0xff] %v6015_v50  ;;  %v1791_v3 = vpack.c.bf16 %v1338_v31, %v1338_v31  ;;  %v1413_v21 = vmax.f32 %v1411_v19, %v1412_v1  ;;  %v761_v7 = vcombine.high %v570_v24, %v570_v24  ;;  %v6021_v16 = vunpack.c.l.b16 %v1800_v60 }
 0x158   : > { %7539 = vst [vmem:[#allocation14_spill] sm:$0xff] %v6019_v54  ;;  %v1792_v41 = vpack.c.bf16 %v1345_v38, %v1345_v38  ;;  %v1427_v23 = vmax.f32 %v1425_v47, %v1426_v61  ;;  %v1433_v15 = vrot.slane %v1432_v26, 2  ;;  %v6023_v39 = vunpack.c.l.b16 %v1801_v18 }
 0x159   : > { %7540 = vst [vmem:[#allocation15_spill] sm:$0xff] %v6021_v16  ;;  %v1793_v57 = vpack.c.bf16 %v1352_v11, %v1352_v11  ;;  %v6025_v14 = vunpack.c.l.b16 %v1790_v53  ;;  %v768_v45 = vrot.slane %v570_v24, %v5794_v25  ;;  %v6028_v51 = vmax.f32 %v1418_v10, %v1419_v48 }
 0x15a   : > { %7541 = vst [vmem:[#allocation16_spill] sm:$0xff] %v6023_v39  ;;  %v1434_v58 = vmax.f32 %v1432_v26, %v1433_v15  ;;  %v775_v2 = vrot.slane %v761_v7, %v5794_v25  ;;  %v575_v31 = vmax.f32 %v523_v17, 0.0  ;;  %v6033_v60 = vunpack.c.l.b16 %v1791_v3 }
 0x15b   : > { %7542 = vst [vmem:[#allocation17_spill] sm:$0xff] %v6025_v14  ;;  %7543 = vst [vmem:[#allocation18_spill] sm:$0xff] %v6028_v51  ;;  %v1414_v27 = vrot.slane %v1413_v21, 1  ;;  %v776_v47 = vcombine.high %v768_v45, %v768_v45  ;;  %v1353_v19 = vsel %vm1107_vm2, %v768_v45, -inf  ;;  %v6038_v46 = vunpack.c.l.b16 %v1792_v41 }
 0x15c   : > { %7544 = vst [vmem:[#allocation19_spill] sm:$0xff] %v6033_v60  ;;  %v1428_v38 = vrot.slane %v1427_v23, 1  ;;  %v777_v24 = vcombine.high %v775_v2, %v775_v2  ;;  %v1354_v10 = vrot.slane %v1353_v19, 4  ;;  %v6040_v1 = vunpack.c.l.b16 %v1793_v57 }
 0x15d   : > { %7545 = vst [vmem:[#allocation20_spill] sm:$0xff] %v6038_v46  ;;  %v1360_v32 = vsel %vm1107_vm2, %v776_v47, -inf  ;;  %v1367_v18 = vsel %vm1107_vm2, %v775_v2, -inf  ;;  %v846_v11 = vcombine.high %v575_v31, %v575_v31  ;;  %v1435_v61 = vrot.slane %v1434_v58, 1 }
 0x15e   : > { %7546 = vst [vmem:[#allocation21_spill] sm:$0xff] %v6040_v1  ;;  %v1355_v48 = vmax.f32 %v1353_v19, %v1354_v10  ;;  %v1361_v26 = vrot.slane %v1360_v32, 4  ;;  %v1415_v17 = vmax.f32 %v1413_v21, %v1414_v27  ;;  %v1368_v3 = vrot.slane %v1367_v18, 4 }
 0x15f   : > { %v1374_v7 = vsel %vm1107_vm2, %v777_v24, -inf  ;;  %v853_v41 = vrot.slane %v575_v31, %v5794_v25  ;;  %v1429_v15 = vmax.f32 %v1427_v23, %v1428_v38  ;;  %v515_v47 = vadd.f32 %v5790_v22, %v5847_v0 }
 0x160   : > { %v1356_v45 = vrot.slane %v1355_v48, 2  ;;  %v1375_v57 = vrot.slane %v1374_v7, 4  ;;  %v1369_v39 = vmax.f32 %v1367_v18, %v1368_v3  ;;  %v860_v2 = vrot.slane %v846_v11, %v5794_v25 }
 0x161   : > { %v861_v16 = vcombine.high %v853_v41, %v853_v41  ;;  %v1493_v53 = vsel %vm1107_vm2, %v853_v41, -inf  ;;  %v1436_v19 = vmax.f32 %v1434_v58, %v1435_v61  ;;  %v1362_v21 = vmax.f32 %v1360_v32, %v1361_v26 }
 0x162   : > { %v1357_v10 = vmax.f32 %v1355_v48, %v1356_v45  ;;  %v1376_v27 = vmax.f32 %v1374_v7, %v1375_v57  ;;  %v1370_v54 = vrot.slane %v1369_v39, 2  ;;  %v862_v24 = vcombine.high %v860_v2, %v860_v2 }
 0x163   : > { %v1494_v1 = vrot.slane %v1493_v53, 4  ;;  %v1500_v23 = vsel %vm1107_vm2, %v861_v16, -inf  ;;  %v1802_v31 = vpack.c.bf16 %v1415_v17, %v1415_v17  ;;  %v1804_v38 = vpack.c.bf16 %v1429_v15, %v1429_v15 }
 0x164   : > { %v1358_v46 = vrot.slane %v1357_v10, 1  ;;  %v1377_v50 = vrot.slane %v1376_v27, 2  ;;  %v1371_v22 = vmax.f32 %v1369_v39, %v1370_v54  ;;  %v1501_v18 = vrot.slane %v1500_v23, 4 }
 0x165   : > { %v1495_v0 = vmax.f32 %v1493_v53, %v1494_v1  ;;  %v1507_v11 = vsel %vm1107_vm2, %v860_v2, -inf  ;;  %v1805_v3 = vpack.c.bf16 %v1436_v19, %v1436_v19  ;;  %v1363_v41 = vrot.slane %v1362_v21, 2 }
 0x166   : > { %v1378_v58 = vmax.f32 %v1376_v27, %v1377_v50  ;;  %v1508_v61 = vrot.slane %v1507_v11, 4  ;;  %v1372_v32 = vrot.slane %v1371_v22, 1  ;;  %v1502_v26 = vmax.f32 %v1500_v23, %v1501_v18 }
 0x167   : > { %v1496_v48 = vrot.slane %v1495_v0, 2  ;;  %v1514_v7 = vsel %vm1107_vm2, %v862_v24, -inf  ;;  %v1359_v45 = vmax.f32 %v1357_v10, %v1358_v46  ;;  %v573_v39 = vmax.f32 %v515_v47, 0.0 }
 0x168   : > { %v1379_v16 = vrot.slane %v1378_v58, 1  ;;  %v1509_v17 = vmax.f32 %v1507_v11, %v1508_v61  ;;  %v1515_v15 = vrot.slane %v1514_v7, 4  ;;  %v1373_v57 = vmax.f32 %v1371_v22, %v1372_v32 }
 0x169   : > { %v1497_v60 = vmax.f32 %v1495_v0, %v1496_v48  ;;  %v1503_v54 = vrot.slane %v1502_v26, 2  ;;  %v1991_v1 = vunpack.c.l.b16 %v1805_v3  ;;  %v6054_v14 = vmax.f32 %v1362_v21, %v1363_v41 }
 0x16a   : > { %v1380_v53 = vmax.f32 %v1378_v58, %v1379_v16  ;;  %v1510_v2 = vrot.slane %v1509_v17, 2  ;;  %v1516_v19 = vmax.f32 %v1514_v7, %v1515_v15  ;;  %v812_v51 = vcombine.high %v573_v39, %v573_v39 }
 0x16b   : > { %v1498_v50 = vrot.slane %v1497_v60, 1  ;;  %v1504_v27 = vmax.f32 %v1502_v26, %v1503_v54  ;;  %v819_v46 = vrot.slane %v573_v39, %v5794_v25  ;;  %v1990_v10 = vunpack.c.l.b16 %v1804_v38 }
 0x16c   : > { %v1797_v23 = vpack.c.bf16 %v1380_v53, %v1380_v53  ;;  %v1511_v18 = vmax.f32 %v1509_v17, %v1510_v2  ;;  %v1517_v24 = vrot.slane %v1516_v19, 2  ;;  %v1794_v11 = vpack.c.bf16 %v1359_v45, %v1359_v45  ;;  %v6073_v2 = vld [vmem:[%s7507_s2] ss:$0 sm:$0xff] }
 0x16d   : > { %v1796_v22 = vpack.c.bf16 %v1373_v57, %v1373_v57  ;;  %v826_v0 = vrot.slane %v812_v51, %v5794_v25  ;;  %v6058_v47 = vunpack.c.l.b16 %v1802_v31  ;;  %v1505_v3 = vrot.slane %v1504_v27, 1 }
 0x16e   : > { %v1518_v58 = vmax.f32 %v1516_v19, %v1517_v24  ;;  %v827_v61 = vcombine.high %v819_v46, %v819_v46  ;;  %v6061_v21 = vsel %vm2048_vm3, %v1991_v1, %v1990_v10  ;;  %v1499_v41 = vmax.f32 %v1497_v60, %v1498_v50 }
 0x16f   : > { %7547 = vst [vmem:[#allocation22_spill] sm:$0xff] %v6058_v47  ;;  %v828_v32 = vcombine.high %v826_v0, %v826_v0  ;;  %v1437_v48 = vsel %vm1107_vm2, %v819_v46, -inf  ;;  %v1983_v7 = vunpack.c.l.b16 %v1797_v23  ;;  %v1512_v38 = vrot.slane %v1511_v18, 1 }
 0x170   : > { %v1438_v45 = vrot.slane %v1437_v48, 4  ;;  %v6065_v16 = vunpack.c.l.b16 %v1794_v11  ;;  %v1982_v51 = vunpack.c.l.b16 %v1796_v22  ;;  %v1444_v31 = vsel %vm1107_vm2, %v827_v61, -inf }
 0x171   : > { %v1451_v17 = vsel %vm1107_vm2, %v826_v0, -inf  ;;  %v1506_v15 = vmax.f32 %v1504_v27, %v1505_v3  ;;  %v1519_v57 = vrot.slane %v1518_v58, 1  ;;  %v1445_v39 = vrot.slane %v1444_v31, 4 }
 0x172   : > { %7548 = vst [vmem:[#allocation23_spill] sm:$0xff] %v6065_v16  ;;  %v1439_v54 = vmax.f32 %v1437_v48, %v1438_v45  ;;  %v1814_v60 = vpack.c.bf16 %v1499_v41, %v1499_v41  ;;  %v1452_v1 = vrot.slane %v1451_v17, 4  ;;  %v1458_v53 = vsel %vm1107_vm2, %v828_v32, -inf }
 0x173   : > { %v526_v19 = vadd.f32 %v6073_v2, %v5852_v4  ;;  %v6078_v50 = vsel %vm2048_vm3, %v1983_v7, %v1982_v51  ;;  %v1513_v23 = vmax.f32 %v1511_v18, %v1512_v38  ;;  %v1446_v24 = vmax.f32 %v1444_v31, %v1445_v39 }
 0x174   : > { %7549 = vst [vmem:[#allocation24_spill] sm:$0xff] %v6078_v50  ;;  %v1440_v27 = vrot.slane %v1439_v54, 2  ;;  %v1453_v46 = vmax.f32 %v1451_v17, %v1452_v1  ;;  %v1459_v10 = vrot.slane %v1458_v53, 4  ;;  %v518_v22 = vadd.f32 %v6073_v2, %v5860_v8 }
 0x175   : > { %v576_v11 = vmax.f32 %v526_v19, 0.0  ;;  %v1520_v0 = vmax.f32 %v1518_v58, %v1519_v57  ;;  %v1815_v3 = vpack.c.bf16 %v1506_v15, %v1506_v15  ;;  %v1447_v41 = vrot.slane %v1446_v24, 2 }
 0x176   : > { %v1441_v61 = vmax.f32 %v1439_v54, %v1440_v27  ;;  %v1454_v32 = vrot.slane %v1453_v46, 2  ;;  %v1460_v48 = vmax.f32 %v1458_v53, %v1459_v10  ;;  %v1816_v7 = vpack.c.bf16 %v1513_v23, %v1513_v23 }
 0x177   : > { %v863_v45 = vcombine.high %v576_v11, %v576_v11  ;;  %v870_v4 = vrot.slane %v576_v11, %v5794_v25  ;;  %v1448_v18 = vmax.f32 %v1446_v24, %v1447_v41  ;;  %v574_v38 = vmax.f32 %v518_v22, 0.0 }
 0x178   : > { %v1442_v51 = vrot.slane %v1441_v61, 1  ;;  %v1455_v31 = vmax.f32 %v1453_v46, %v1454_v32  ;;  %v1461_v17 = vrot.slane %v1460_v48, 2  ;;  %v1817_v19 = vpack.c.bf16 %v1520_v0, %v1520_v0 }
 0x179   : > { %v877_v39 = vrot.slane %v863_v45, %v5794_v25  ;;  %v878_v1 = vcombine.high %v870_v4, %v870_v4  ;;  %v1449_v58 = vrot.slane %v1448_v18, 1  ;;  %v1521_v15 = vsel %vm1107_vm2, %v870_v4, -inf }
 0x17a   : > { %v1443_v8 = vmax.f32 %v1441_v61, %v1442_v51  ;;  %v1456_v57 = vrot.slane %v1455_v31, 1  ;;  %v1462_v54 = vmax.f32 %v1460_v48, %v1461_v17  ;;  %v1522_v53 = vrot.slane %v1521_v15, 4 }
 0x17b   : > { %v1528_v27 = vsel %vm1107_vm2, %v878_v1, -inf  ;;  %v1535_v24 = vsel %vm1107_vm2, %v877_v39, -inf  ;;  %v829_v11 = vcombine.high %v574_v38, %v574_v38  ;;  %v6087_v46 = vunpack.c.l.b16 %v1814_v60 }
 0x17c   : > { %v1806_v10 = vpack.c.bf16 %v1443_v8, %v1443_v8  ;;  %v1529_v23 = vrot.slane %v1528_v27, 4  ;;  %v1450_v22 = vmax.f32 %v1448_v18, %v1449_v58  ;;  %v1523_v41 = vmax.f32 %v1521_v15, %v1522_v53 }
 0x17d   : > { %7550 = vst [vmem:[#allocation25_spill] sm:$0xff] %v6087_v46  ;;  %v539_v0 = vadd.f32 %v6073_v2, %v5870_v36  ;;  %v1463_v61 = vrot.slane %v1462_v54, 1  ;;  %v836_v48 = vrot.slane %v574_v38, %v5794_v25  ;;  %v6092_v4 = vunpack.c.l.b16 %v1815_v3 }
 0x17e   : > { %v1992_v32 = vunpack.c.l.b16 %v1806_v10  ;;  %v1530_v45 = vmax.f32 %v1528_v27, %v1529_v23  ;;  %v6094_v51 = vunpack.c.l.b16 %v1816_v7  ;;  %v1457_v17 = vmax.f32 %v1455_v31, %v1456_v57 }
 0x17f   : > { %7551 = vst [vmem:[#allocation26_spill] sm:$0xff] %v6092_v4  ;;  %v1536_v1 = vrot.slane %v1535_v24, 4  ;;  %v6096_v39 = vunpack.c.l.b16 %v1817_v19  ;;  %v1524_v18 = vrot.slane %v1523_v41, 2  ;;  %v843_v36 = vrot.slane %v829_v11, %v5794_v25 }
 0x180   : > { %7552 = vst [vmem:[#allocation27_spill] sm:$0xff] %v6094_v51  ;;  %v6100_v60 = vsel %vm2050_vm4, %v1992_v32, %v6061_v21  ;;  %v1807_v8 = vpack.c.bf16 %v1450_v22, %v1450_v22  ;;  %v1531_v58 = vrot.slane %v1530_v45, 2  ;;  %v844_v15 = vcombine.high %v836_v48, %v836_v48 }
 0x181   : > { %7553 = vst [vmem:[#allocation28_spill] sm:$0xff] %v6096_v39  ;;  %7554 = vst [vmem:[#allocation29_spill] sm:$0xff] %v6100_v60  ;;  %v579_v53 = vmax.f32 %v539_v0, 0.0  ;;  %v1464_v38 = vmax.f32 %v1462_v54, %v1463_v61  ;;  %v845_v3 = vcombine.high %v843_v36, %v843_v36  ;;  %v1465_v7 = vsel %vm1107_vm2, %v836_v48, -inf }
 0x182   : > { %v1479_v31 = vsel %vm1107_vm2, %v843_v36, -inf  ;;  %v1808_v57 = vpack.c.bf16 %v1457_v17, %v1457_v17  ;;  %v6105_v19 = vmax.f32 %v1535_v24, %v1536_v1  ;;  %v1466_v27 = vrot.slane %v1465_v7, 4 }
 0x183   : > { %v1472_v21 = vsel %vm1107_vm2, %v844_v15, -inf  ;;  %v1525_v10 = vmax.f32 %v1523_v41, %v1524_v18  ;;  %v1480_v32 = vrot.slane %v1479_v31, 4  ;;  %v1486_v11 = vsel %vm1107_vm2, %v845_v3, -inf }
 0x184   : > { %7555 = vst [vmem:[#allocation30_spill] sm:$0xff] %v6105_v19  ;;  %v1473_v23 = vrot.slane %v1472_v21, 4  ;;  %v1532_v22 = vmax.f32 %v1530_v45, %v1531_v58  ;;  %v1467_v26 = vmax.f32 %v1465_v7, %v1466_v27  ;;  %v1487_v0 = vrot.slane %v1486_v11, 4 }
 0x185   : > { %v913_v54 = vcombine.high %v579_v53, %v579_v53  ;;  %v6109_v61 = vunpack.c.l.b16 %v1807_v8  ;;  %v1481_v39 = vmax.f32 %v1479_v31, %v1480_v32  ;;  %v920_v17 = vrot.slane %v579_v53, %v5794_v25 }
 0x186   : > { %v1474_v48 = vmax.f32 %v1472_v21, %v1473_v23  ;;  %v1809_v24 = vpack.c.bf16 %v1464_v38, %v1464_v38  ;;  %v1468_v1 = vrot.slane %v1467_v26, 2  ;;  %v1488_v36 = vmax.f32 %v1486_v11, %v1487_v0 }
 0x187   : > { %7556 = vst [vmem:[#allocation31_spill] sm:$0xff] %v6109_v61  ;;  %v927_v15 = vrot.slane %v913_v54, %v5794_v25  ;;  %v1526_v41 = vrot.slane %v1525_v10, 1  ;;  %v1482_v51 = vrot.slane %v1481_v39, 2  ;;  %v928_v4 = vcombine.high %v920_v17, %v920_v17 }
 0x188   : > { %v1475_v18 = vrot.slane %v1474_v48, 2  ;;  %v1533_v3 = vrot.slane %v1532_v22, 1  ;;  %v1469_v45 = vmax.f32 %v1467_v26, %v1468_v1  ;;  %v1489_v58 = vrot.slane %v1488_v36, 2 }
 0x189   : > { %v929_v7 = vcombine.high %v927_v15, %v927_v15  ;;  %v1483_v8 = vmax.f32 %v1481_v39, %v1482_v51  ;;  %v1598_v21 = vsel %vm1107_vm2, %v920_v17, -inf  ;;  %v1605_v31 = vsel %vm1107_vm2, %v928_v4, -inf }
 0x18a   : > { %v1476_v27 = vmax.f32 %v1474_v48, %v1475_v18  ;;  %v1470_v53 = vrot.slane %v1469_v45, 1  ;;  %v1490_v38 = vmax.f32 %v1488_v36, %v1489_v58  ;;  %v1599_v23 = vrot.slane %v1598_v21, 4 }
 0x18b   : > { %v1606_v32 = vrot.slane %v1605_v31, 4  ;;  %v1527_v11 = vmax.f32 %v1525_v10, %v1526_v41  ;;  %v1484_v0 = vrot.slane %v1483_v8, 1  ;;  %v1612_v54 = vsel %vm1107_vm2, %v927_v15, -inf }
 0x18c   : > { %v1619_v19 = vsel %vm1107_vm2, %v929_v7, -inf  ;;  %v1477_v46 = vrot.slane %v1476_v27, 1  ;;  %v1491_v26 = vrot.slane %v1490_v38, 1  ;;  %v1600_v1 = vmax.f32 %v1598_v21, %v1599_v23 }
 0x18d   : > { %v1607_v61 = vmax.f32 %v1605_v31, %v1606_v32  ;;  %v6117_v48 = vunpack.c.l.b16 %v1808_v57  ;;  %v1471_v51 = vmax.f32 %v1469_v45, %v1470_v53  ;;  %v1613_v39 = vrot.slane %v1612_v54, 4 }
 0x18e   : > { %v1620_v17 = vrot.slane %v1619_v19, 4  ;;  %v6119_v4 = vunpack.c.l.b16 %v1809_v24  ;;  %v1485_v36 = vmax.f32 %v1483_v8, %v1484_v0  ;;  %v1601_v18 = vrot.slane %v1600_v1, 2 }
 0x18f   : > { %7557 = vst [vmem:[#allocation32_spill] sm:$0xff] %v6117_v48  ;;  %v1608_v58 = vrot.slane %v1607_v61, 2  ;;  %v6121_v10 = vmax.f32 %v1532_v22, %v1533_v3  ;;  %v1818_v41 = vpack.c.bf16 %v1527_v11, %v1527_v11  ;;  %v1614_v15 = vmax.f32 %v1612_v54, %v1613_v39 }
 0x190   : > { %7558 = vst [vmem:[#allocation33_spill] sm:$0xff] %v6119_v4  ;;  %v1621_v60 = vmax.f32 %v1619_v19, %v1620_v17  ;;  %v6123_v7 = vmax.f32 %v1476_v27, %v1477_v46  ;;  %v1492_v47 = vmax.f32 %v1490_v38, %v1491_v26  ;;  %v1602_v21 = vmax.f32 %v1600_v1, %v1601_v18 }
 0x191   : > { %7559 = vst [vmem:[#allocation34_spill] sm:$0xff] %v6121_v10  ;;  %v1609_v31 = vmax.f32 %v1607_v61, %v1608_v58  ;;  %v1810_v57 = vpack.c.bf16 %v1471_v51, %v1471_v51  ;;  %v1615_v23 = vrot.slane %v1614_v15, 2  ;;  %v531_v24 = vadd.f32 %v6073_v2, %v5876_v44 }
 0x192   : > { %7560 = vst [vmem:[#allocation35_spill] sm:$0xff] %v6123_v7  ;;  %v1622_v45 = vrot.slane %v1621_v60, 2  ;;  %v1812_v53 = vpack.c.bf16 %v1485_v36, %v1485_v36  ;;  %v1603_v8 = vrot.slane %v1602_v21, 1  ;;  %v542_v22 = vadd.f32 %v6073_v2, %v5893_v33 }
 0x193   : > { %v1610_v32 = vrot.slane %v1609_v31, 1  ;;  %v1616_v46 = vmax.f32 %v1614_v15, %v1615_v23  ;;  %v577_v27 = vmax.f32 %v531_v24, 0.0  ;;  %v6131_v38 = vunpack.c.l.b16 %v1818_v41 }
 0x194   : > { %v1623_v3 = vmax.f32 %v1621_v60, %v1622_v45  ;;  %v1813_v11 = vpack.c.bf16 %v1492_v47, %v1492_v47  ;;  %v580_v0 = vmax.f32 %v542_v22, 0.0  ;;  %v6135_v44 = vmax.f32 %v1602_v21, %v1603_v8 }
 0x195   : > { %7561 = vst [vmem:[#allocation36_spill] sm:$0xff] %v6131_v38  ;;  %v6137_v54 = vmax.f32 %v1609_v31, %v1610_v32  ;;  %v879_v26 = vcombine.high %v577_v27, %v577_v27  ;;  %v886_v33 = vrot.slane %v577_v27, %v5794_v25  ;;  %v6140_v1 = vunpack.c.l.b16 %v1810_v57 }
 0x196   : > { %v6142_v51 = vunpack.c.l.b16 %v1812_v53  ;;  %v930_v60 = vcombine.high %v580_v0, %v580_v0  ;;  %v937_v39 = vrot.slane %v580_v0, %v5794_v25  ;;  %v1617_v17 = vrot.slane %v1616_v46, 1 }
 0x197   : > { %7562 = vst [vmem:[#allocation37_spill] sm:$0xff] %v6140_v1  ;;  %v1624_v36 = vrot.slane %v1623_v3, 1  ;;  %v893_v18 = vrot.slane %v879_v26, %v5794_v25  ;;  %v894_v47 = vcombine.high %v886_v33, %v886_v33  ;;  %v1999_v58 = vunpack.c.l.b16 %v1813_v11 }
 0x198   : > { %v1542_v41 = vsel %vm1107_vm2, %v886_v33, -inf  ;;  %v944_v15 = vrot.slane %v930_v60, %v5794_v25  ;;  %v6150_v21 = vadd.f32 %v6073_v2, %v5899_v40  ;;  %v1829_v31 = vpack.c.bf16 %v6135_v44, %v6135_v44 }
 0x199   : > { %v1830_v57 = vpack.c.bf16 %v6137_v54, %v6137_v54  ;;  %v895_v23 = vcombine.high %v893_v18, %v893_v18  ;;  %v1543_v45 = vrot.slane %v1542_v41, 4  ;;  %v1549_v24 = vsel %vm1107_vm2, %v894_v47, -inf }
 0x19a   : > { %v1556_v53 = vsel %vm1107_vm2, %v893_v18, -inf  ;;  %v945_v8 = vcombine.high %v937_v39, %v937_v39  ;;  %v946_v32 = vcombine.high %v944_v15, %v944_v15  ;;  %v1618_v22 = vmax.f32 %v1616_v46, %v1617_v17 }
 0x19b   : > { %v1625_v27 = vmax.f32 %v1623_v3, %v1624_v36  ;;  %v1544_v11 = vmax.f32 %v1542_v41, %v1543_v45  ;;  %v1550_v0 = vrot.slane %v1549_v24, 4  ;;  %v1557_v40 = vrot.slane %v1556_v53, 4 }
 0x19c   : > { %v1563_v26 = vsel %vm1107_vm2, %v895_v23, -inf  ;;  %v1626_v44 = vsel %vm1107_vm2, %v937_v39, -inf  ;;  %v1633_v33 = vsel %vm1107_vm2, %v945_v8, -inf  ;;  %v1640_v18 = vsel %vm1107_vm2, %v944_v15, -inf }
 0x19d   : > { %v1545_v54 = vrot.slane %v1544_v11, 2  ;;  %v1551_v60 = vmax.f32 %v1549_v24, %v1550_v0  ;;  %v1564_v19 = vrot.slane %v1563_v26, 4  ;;  %v1627_v61 = vrot.slane %v1626_v44, 4 }
 0x19e   : > { %v1558_v47 = vmax.f32 %v1556_v53, %v1557_v40  ;;  %v1634_v38 = vrot.slane %v1633_v33, 4  ;;  %v1647_v46 = vsel %vm1107_vm2, %v946_v32, -inf  ;;  %v1641_v10 = vrot.slane %v1640_v18, 4 }
 0x19f   : > { %v1546_v3 = vmax.f32 %v1544_v11, %v1545_v54  ;;  %v1552_v17 = vrot.slane %v1551_v60, 2  ;;  %v1565_v36 = vmax.f32 %v1563_v26, %v1564_v19  ;;  %v1628_v41 = vmax.f32 %v1626_v44, %v1627_v61 }
 0x1a0   : > { %v1559_v45 = vrot.slane %v1558_v47, 2  ;;  %v1635_v23 = vmax.f32 %v1633_v33, %v1634_v38  ;;  %v1648_v39 = vrot.slane %v1647_v46, 4  ;;  %v1642_v53 = vmax.f32 %v1640_v18, %v1641_v10 }
 0x1a1   : > { %v1547_v1 = vrot.slane %v1546_v3, 1  ;;  %v1553_v8 = vmax.f32 %v1551_v60, %v1552_v17  ;;  %v1566_v4 = vrot.slane %v1565_v36, 2  ;;  %v1629_v24 = vrot.slane %v1628_v41, 2 }
 0x1a2   : > { %v1560_v0 = vmax.f32 %v1558_v47, %v1559_v45  ;;  %v1636_v48 = vrot.slane %v1635_v23, 2  ;;  %v1649_v40 = vmax.f32 %v1647_v46, %v1648_v39  ;;  %v1831_v11 = vpack.c.bf16 %v1618_v22, %v1618_v22 }
 0x1a3   : > { %v1548_v7 = vmax.f32 %v1546_v3, %v1547_v1  ;;  %v1554_v15 = vrot.slane %v1553_v8, 1  ;;  %v1567_v16 = vmax.f32 %v1565_v36, %v1566_v4  ;;  %v1630_v32 = vmax.f32 %v1628_v41, %v1629_v24 }
 0x1a4   : > { %v1561_v54 = vrot.slane %v1560_v0, 1  ;;  %v1643_v19 = vrot.slane %v1642_v53, 2  ;;  %v1650_v61 = vrot.slane %v1649_v40, 2  ;;  %v1832_v26 = vpack.c.bf16 %v1625_v27, %v1625_v27 }
 0x1a5   : > { %v1555_v38 = vmax.f32 %v1553_v8, %v1554_v15  ;;  %v1568_v44 = vrot.slane %v1567_v16, 1  ;;  %v6163_v33 = vmax.f32 %v1635_v23, %v1636_v48  ;;  %v1821_v60 = vpack.c.bf16 %v1548_v7, %v1548_v7 }
 0x1a6   : > { %v1631_v17 = vrot.slane %v1630_v32, 1  ;;  %v1644_v50 = vmax.f32 %v1642_v53, %v1643_v19  ;;  %v1651_v47 = vmax.f32 %v1649_v40, %v1650_v61  ;;  %v6167_v10 = vsel %vm2048_vm3, %v1999_v58, %v6142_v51 }
 0x1a7   : > { %v6169_v1 = vunpack.c.l.b16 %v1829_v31  ;;  %v6171_v4 = vmax.f32 %v1560_v0, %v1561_v54  ;;  %v6173_v22 = vmax.f32 %v1567_v16, %v1568_v44  ;;  %v6175_v18 = vunpack.c.l.b16 %v1830_v57 }
 0x1a8   : > { %v1822_v27 = vpack.c.bf16 %v1555_v38, %v1555_v38  ;;  %v1645_v46 = vrot.slane %v1644_v50, 1  ;;  %v578_v48 = vmax.f32 %v6150_v21, 0.0  ;;  %v6178_v7 = vunpack.c.l.b16 %v1831_v11 }
 0x1a9   : > { %7563 = vst [vmem:[#allocation38_spill] sm:$0xff] %v6169_v1  ;;  %7564 = vst [vmem:[#allocation39_spill] sm:$0xff] %v6175_v18  ;;  %v6180_v3 = vunpack.c.l.b16 %v1832_v26  ;;  %v555_v51 = vadd.f32 %v6073_v2, %v5945_v52  ;;  %v6185_v58 = vunpack.c.l.b16 %v1821_v60  ;;  %v6187_v31 = vmax.f32 %v1630_v32, %v1631_v17 }
 0x1aa   : > { %7565 = vst [vmem:[#allocation40_spill] sm:$0xff] %v6178_v7  ;;  %v1652_v16 = vrot.slane %v1651_v47, 1  ;;  %v896_v57 = vcombine.high %v578_v48, %v578_v48  ;;  %v903_v45 = vrot.slane %v578_v48, %v5794_v25  ;;  %v6194_v39 = vunpack.c.l.b16 %v1822_v27 }
 0x1ab   : > { %7566 = vst [vmem:[#allocation41_spill] sm:$0xff] %v6180_v3  ;;  %7567 = vst [vmem:[#allocation42_spill] sm:$0xff] %v6185_v58  ;;  %v583_v23 = vmax.f32 %v555_v51, 0.0  ;;  %v1646_v8 = vmax.f32 %v1644_v50, %v1645_v46  ;;  %v7569_v15 = vmov 0.0  }
 0x1ac   : > { %7568 = vst [vmem:[#allocation43_spill] sm:$0xff] %v6194_v39  ;;  %v910_v52 = vrot.slane %v896_v57, %v5794_v25  ;;  %v911_v24 = vcombine.high %v903_v45, %v903_v45  ;;  %v1570_v0 = vsel %vm1107_vm2, %v903_v45, -inf  ;;  %5481 = vmatprep.mubr.msk.bf16.mxu0 %vm5703_vm5, %v7569_v15  ;;  %5441 = vmatprep.mubr.msk.bf16.mxu1 %vm5703_vm5, %v7569_v15 }
 0x1ad   : > { %v981_v53 = vcombine.high %v583_v23, %v583_v23  ;;  %v988_v40 = vrot.slane %v583_v23, %v5794_v25  ;;  %v1653_v32 = vmax.f32 %v1651_v47, %v1652_v16  ;;  %v1571_v54 = vrot.slane %v1570_v0, 4 }
 0x1ae   : > { %v912_v50 = vcombine.high %v910_v52, %v910_v52  ;;  %v1577_v19 = vsel %vm1107_vm2, %v911_v24, -inf  ;;  %v1584_v61 = vsel %vm1107_vm2, %v910_v52, -inf  ;;  %v1835_v44 = vpack.c.bf16 %v1646_v8, %v1646_v8 }
 0x1af   : > { %v995_v26 = vrot.slane %v981_v53, %v5794_v25  ;;  %v996_v38 = vcombine.high %v988_v40, %v988_v40  ;;  %v1572_v60 = vmax.f32 %v1570_v0, %v1571_v54  ;;  %v1578_v17 = vrot.slane %v1577_v19, 4 }
 0x1b0   : > { %v1585_v27 = vrot.slane %v1584_v61, 4  ;;  %v1591_v46 = vsel %vm1107_vm2, %v912_v50, -inf  ;;  %v1710_v47 = vsel %vm1107_vm2, %v988_v40, -inf  ;;  %v1836_v16 = vpack.c.bf16 %v1653_v32, %v1653_v32 }
 0x1b1   : > { %v997_v48 = vcombine.high %v995_v26, %v995_v26  ;;  %v1717_v51 = vsel %vm1107_vm2, %v996_v38, -inf  ;;  %v1573_v57 = vrot.slane %v1572_v60, 2  ;;  %v1592_v23 = vrot.slane %v1591_v46, 4 }
 0x1b2   : > { %v1586_v45 = vmax.f32 %v1584_v61, %v1585_v27  ;;  %v1711_v24 = vrot.slane %v1710_v47, 4  ;;  %v1718_v52 = vrot.slane %v1717_v51, 4  ;;  %v1724_v53 = vsel %vm1107_vm2, %v995_v26, -inf }
 0x1b3   : > { %v1731_v8 = vsel %vm1107_vm2, %v997_v48, -inf  ;;  %v1574_v0 = vmax.f32 %v1572_v60, %v1573_v57  ;;  %v1579_v54 = vmax.f32 %v1577_v19, %v1578_v17  ;;  %v1593_v11 = vmax.f32 %v1591_v46, %v1592_v23 }
 0x1b4   : > { %v1587_v36 = vrot.slane %v1586_v45, 2  ;;  %v1712_v50 = vmax.f32 %v1710_v47, %v1711_v24  ;;  %v1719_v21 = vmax.f32 %v1717_v51, %v1718_v52  ;;  %v1725_v41 = vrot.slane %v1724_v53, 4 }
 0x1b5   : > { %v1732_v40 = vrot.slane %v1731_v8, 4  ;;  %v2021_v3 = vunpack.c.l.b16 %v1835_v44  ;;  %v1575_v38 = vrot.slane %v1574_v0, 1  ;;  %v1594_v7 = vrot.slane %v1593_v11, 2 }
 0x1b6   : > { %v1588_v32 = vmax.f32 %v1586_v45, %v1587_v36  ;;  %v1713_v61 = vrot.slane %v1712_v50, 2  ;;  %v1720_v27 = vrot.slane %v1719_v21, 2  ;;  %v1726_v18 = vmax.f32 %v1724_v53, %v1725_v41 }
 0x1b7   : > { %v1733_v1 = vmax.f32 %v1731_v8, %v1732_v40  ;;  %v1576_v39 = vmax.f32 %v1574_v0, %v1575_v38  ;;  %v1580_v26 = vrot.slane %v1579_v54, 2  ;;  %v1595_v48 = vmax.f32 %v1593_v11, %v1594_v7 }
 0x1b8   : > { %v1589_v58 = vrot.slane %v1588_v32, 1  ;;  %v1714_v60 = vmax.f32 %v1712_v50, %v1713_v61  ;;  %v1721_v19 = vmax.f32 %v1719_v21, %v1720_v27  ;;  %v1727_v17 = vrot.slane %v1726_v18, 2 }
 0x1b9   : > { %v1734_v46 = vrot.slane %v1733_v1, 2  ;;  %v2022_v47 = vunpack.c.l.b16 %v1836_v16  ;;  %v1596_v57 = vrot.slane %v1595_v48, 1  ;;  %v547_v44 = vadd.f32 %v6073_v2, %v5956_v9 }
 0x1ba   : > { %v1590_v51 = vmax.f32 %v1588_v32, %v1589_v58  ;;  %v1715_v36 = vrot.slane %v1714_v60, 1  ;;  %v1722_v45 = vrot.slane %v1721_v19, 1  ;;  %v1728_v23 = vmax.f32 %v1726_v18, %v1727_v17 }
 0x1bb   : > { %v1735_v24 = vmax.f32 %v1733_v1, %v1734_v46  ;;  %v7570_v41 = vpack.c.bf16 %v6171_v4, %v6171_v4  ;;  %v6220_v7 = vmax.f32 %v1579_v54, %v1580_v26  ;;  %v1597_v21 = vmax.f32 %v1595_v48, %v1596_v57 }
 0x1bc   : > { %v581_v11 = vmax.f32 %v547_v44, 0.0  ;;  %v1825_v53 = vpack.c.bf16 %v1576_v39, %v1576_v39  ;;  %v1827_v16 = vpack.c.bf16 %v1590_v51, %v1590_v51  ;;  %v1729_v58 = vrot.slane %v1728_v23, 1 }
 0x1bd   : > { %v6218_v52 = vunpack.c.l.b16 %v7570_v41  ;;  %v1736_v8 = vrot.slane %v1735_v24, 1  ;;  %v7571_v9 = vpack.c.bf16 %v6173_v22, %v6173_v22  ;;  %v6227_v18 = vmax.f32 %v1714_v60, %v1715_v36 }
 0x1be   : > { %v947_v1 = vcombine.high %v581_v11, %v581_v11  ;;  %v954_v4 = vrot.slane %v581_v11, %v5794_v25  ;;  %v7572_v54 = vpack.c.bf16 %v6187_v31, %v6187_v31  ;;  %v6236_v39 = vsel %vm2048_vm3, %v2022_v47, %v2021_v3 }
 0x1bf   : > { %v6225_v0 = vunpack.c.l.b16 %v7571_v9  ;;  %v1828_v40 = vpack.c.bf16 %v1597_v21, %v1597_v21  ;;  %v1723_v38 = vmax.f32 %v1721_v19, %v1722_v45  ;;  %v1582_v32 = vrot.slane %v6220_v7, 1 }
 0x1c0   : > { %v6233_v50 = vunpack.c.l.b16 %v7572_v54  ;;  %v961_v22 = vrot.slane %v947_v1, %v5794_v25  ;;  %v962_v61 = vcombine.high %v954_v4, %v954_v4  ;;  %v1654_v27 = vsel %vm1107_vm2, %v954_v4, -inf }
 0x1c1   : > { %v6241_v26 = vunpack.c.l.b16 %v1825_v53  ;;  %v2013_v48 = vunpack.c.l.b16 %v1827_v16  ;;  %v6243_v60 = vmax.f32 %v1728_v23, %v1729_v58  ;;  %v6245_v31 = vmax.f32 %v1735_v24, %v1736_v8 }
 0x1c2   : > { %v1845_v3 = vpack.c.bf16 %v6227_v18, %v6227_v18  ;;  %v963_v17 = vcombine.high %v961_v22, %v961_v22  ;;  %v1655_v46 = vrot.slane %v1654_v27, 4  ;;  %v1661_v19 = vsel %vm1107_vm2, %v962_v61, -inf }
 0x1c3   : > { %v2014_v47 = vunpack.c.l.b16 %v1828_v40  ;;  %v1846_v51 = vpack.c.bf16 %v1723_v38, %v1723_v38  ;;  %v1662_v57 = vrot.slane %v1661_v19, 4  ;;  %v1668_v44 = vsel %vm1107_vm2, %v961_v22, -inf }
 0x1c4   : > { %v1656_v36 = vmax.f32 %v1654_v27, %v1655_v46  ;;  %v1669_v45 = vrot.slane %v1668_v44, 4  ;;  %v1675_v41 = vsel %vm1107_vm2, %v963_v17, -inf  ;;  %v7573_v23 = vrot.slane %v5904_v49, 1 }
 0x1c5   : > { %v1663_v21 = vmax.f32 %v1661_v19, %v1662_v57  ;;  %v1676_v11 = vrot.slane %v1675_v41, 4  ;;  %v7574_v53 = vrot.slane %v5881_v12, 1  ;;  %v2039_v18 = vsel %vm2038_vm6, %v5888_v29, %v5849_v37 }
 0x1c6   : > { %v1149_v24 = vmax.f32 %v5904_v49, %v7573_v23  ;;  %v1657_v58 = vrot.slane %v1656_v36, 2  ;;  %v1670_v8 = vmax.f32 %v1668_v44, %v1669_v45  ;;  %v1847_v1 = vpack.c.bf16 %v6243_v60, %v6243_v60 }
 0x1c7   : > { %v1205_v16 = vmax.f32 %v5881_v12, %v7574_v53  ;;  %v1664_v4 = vrot.slane %v1663_v21, 2  ;;  %v1677_v54 = vmax.f32 %v1675_v41, %v1676_v11  ;;  %v2041_v12 = vsel %vm2040_vm7, %v5895_v34, %v2039_v18 }
 0x1c8   : > { %v1764_v9 = vpack.c.bf16 %v1149_v24, %v1149_v24  ;;  %v1658_v49 = vmax.f32 %v1656_v36, %v1657_v58  ;;  %v1671_v40 = vrot.slane %v1670_v8, 2  ;;  %v2043_v37 = vsel %vm2042_vm8, %v5897_v35, %v2041_v12 }
 0x1c9   : > { %v1772_v38 = vpack.c.bf16 %v1205_v16, %v1205_v16  ;;  %v1665_v22 = vmax.f32 %v1663_v21, %v1664_v4  ;;  %v1678_v61 = vrot.slane %v1677_v54, 2  ;;  %v2045_v19 = vsel %vm2044_vm9, %v5926_v62, %v2043_v37 }
 0x1ca   : > { %v1950_v27 = vunpack.c.l.b16 %v1764_v9  ;;  %v1659_v17 = vrot.slane %v1658_v49, 1  ;;  %v1672_v46 = vmax.f32 %v1670_v8, %v1671_v40  ;;  %v2051_v36 = vsel %vm2050_vm4, %v5836_v55, %v5929_v30 }
 0x1cb   : > { %v1666_v29 = vrot.slane %v1665_v22, 1  ;;  %v1679_v60 = vmax.f32 %v1677_v54, %v1678_v61  ;;  %v1848_v45 = vpack.c.bf16 %v6245_v31, %v6245_v31  ;;  %v2052_v23 = vsel %vm2038_vm6, %v5856_v5, %v2051_v36 }
 0x1cc   : > { %v1660_v57 = vmax.f32 %v1658_v49, %v1659_v17  ;;  %v1673_v44 = vrot.slane %v1672_v46, 1  ;;  %v2047_v34 = vsel %vm2046_vm10, %v1950_v27, %v2045_v19  ;;  %v6277_v24 = vunpack.c.l.b16 %v1845_v3 }
 0x1cd   : > { %v1667_v41 = vmax.f32 %v1665_v22, %v1666_v29  ;;  %v1680_v35 = vrot.slane %v1679_v60, 1  ;;  %v6279_v62 = vunpack.c.l.b16 %v1846_v51  ;;  %v2053_v11 = vsel %vm2040_vm7, %v5858_v6, %v2052_v23 }
 0x1ce   : > { %v1837_v21 = vpack.c.bf16 %v1660_v57, %v1660_v57  ;;  %v1674_v53 = vmax.f32 %v1672_v46, %v1673_v44  ;;  %v1958_v16 = vunpack.c.l.b16 %v1772_v38  ;;  %v2054_v55 = vsel %vm2042_vm8, %v5886_v20, %v2053_v11 }
 0x1cf   : > { %v558_v30 = vadd.f32 %v6073_v2, %v6031_v43  ;;  %v6288_v31 = vsel %vm2048_vm3, %v2014_v47, %v2013_v48  ;;  %v2055_v3 = vsel %vm2044_vm9, %v5911_v59, %v2054_v55  ;;  %v550_v51 = vadd.f32 %v6073_v2, %v6036_v56 }
 0x1d0   : > { %v2023_v5 = vunpack.c.l.b16 %v1837_v21  ;;  %v6294_v58 = vmax.f32 %v1679_v60, %v1680_v35  ;;  %v1838_v6 = vpack.c.bf16 %v1667_v41, %v1667_v41  ;;  %v2056_v8 = vsel %vm2046_vm10, %v1958_v16, %v2055_v3 }
 0x1d1   : > { %v584_v9 = vmax.f32 %v558_v30, 0.0  ;;  %v2123_v43 = vpack.c.b16 %v2056_v8, %v2047_v34  ;;  %v582_v48 = vmax.f32 %v550_v51, 0.0  ;;  %v1839_v47 = vpack.c.bf16 %v1674_v53, %v1674_v53 }
 0x1d2   : > { %v6299_v20 = vsel %vm2050_vm4, %v2023_v5, %v6236_v39  ;;  %v6302_v4 = vunpack.c.l.b16 %v1847_v1  ;;  %v6308_v49 = vunpack.c.l.b16 %v1848_v45  ;;  %v1840_v39 = vpack.c.bf16 %v6294_v58, %v6294_v58 }
 0x1d3   : > { %v998_v18 = vcombine.high %v584_v9, %v584_v9  ;;  %v1005_v59 = vrot.slane %v584_v9, %v5794_v25  ;;  %v6305_v56 = vsel %vm2135_vm12, 0, %v2123_v43  ;;  %v964_v2 = vcombine.high %v582_v48, %v582_v48 }
 0x1d4   : > { %v971_v54 = vrot.slane %v582_v48, %v5794_v25  ;;  %v6312_v40 = vunpack.c.l.b16 %v1838_v6  ;;  %5482 = vmatmul.mubr.msk.bf16.vlgmr.msra.gmra.mrb[0].mxu0 %vm2243_vm11, %v6305_v56  ;;  %v6321_v27 = vunpack.c.l.b16 %v1839_v47  ;;  %v7575_v45 = vpack.c.bf16 %v5984_v13, %v5984_v13 }
 0x1d5   : > { %v1012_v38 = vrot.slane %v998_v18, %v5794_v25  ;;  %v1013_v1 = vcombine.high %v1005_v59, %v1005_v59  ;;  %v1738_v12 = vsel %vm1107_vm2, %v1005_v59, -inf  ;;  %v978_v22 = vrot.slane %v964_v2, %v5794_v25  ;;  %5485 = vmatprep.mubr.msk.bf16.mxu0 %vm5703_vm5, %v7569_v15 }
 0x1d6   : > { %v979_v61 = vcombine.high %v971_v54, %v971_v54  ;;  %v1739_v17 = vrot.slane %v1738_v12, 4  ;;  %v1682_v37 = vsel %vm1107_vm2, %v971_v54, -inf  ;;  %v1966_v41 = vunpack.c.l.b16 %v7575_v45 }
 0x1d7   : > { %v1752_v46 = vsel %vm1107_vm2, %v1012_v38, -inf  ;;  %v1745_v29 = vsel %vm1107_vm2, %v1013_v1, -inf  ;;  %v980_v19 = vcombine.high %v978_v22, %v978_v22  ;;  %v1683_v57 = vrot.slane %v1682_v37, 4 }
 0x1d8   : > { %v1753_v60 = vrot.slane %v1752_v46, 4  ;;  %v1740_v44 = vmax.f32 %v1738_v12, %v1739_v17  ;;  %v1746_v34 = vrot.slane %v1745_v29, 4  ;;  %v1689_v36 = vsel %vm1107_vm2, %v979_v61, -inf }
 0x1d9   : > { %v1684_v23 = vmax.f32 %v1682_v37, %v1683_v57  ;;  %v1690_v21 = vrot.slane %v1689_v36, 4  ;;  %v1696_v11 = vsel %vm1107_vm2, %v978_v22, -inf  ;;  %v1703_v30 = vsel %vm1107_vm2, %v980_v19, -inf  ;;  %vm7121_vm2 = vmneg %vm2135_vm12 }
 0x1da   : > { %v1754_v35 = vmax.f32 %v1752_v46, %v1753_v60  ;;  %v1741_v53 = vrot.slane %v1740_v44, 2  ;;  %v1747_v16 = vmax.f32 %v1745_v29, %v1746_v34  ;;  %v1697_v55 = vrot.slane %v1696_v11, 4  ;;  %v7576_v60 = vld [vmem:[#allocation9_spill] sm:$0xff] }
 0x1db   : > { %v2161_v5 = vshll.u32 %v6305_v56, 16  ;;  %v1685_v3 = vrot.slane %v1684_v23, 2  ;;  %v1691_v51 = vmax.f32 %v1689_v36, %v1690_v21  ;;  %v1704_v6 = vrot.slane %v1703_v30, 4 }
 0x1dc   : > { %v1742_v8 = vmax.f32 %v1740_v44, %v1741_v53  ;;  %v1748_v9 = vrot.slane %v1747_v16, 2  ;;  %v1698_v43 = vmax.f32 %v1696_v11, %v1697_v55  ;;  %v2059_v13 = vsel %vm2038_vm6, %v5963_v28, %v5952_v63  ;;  %v7577_v44 = vld [vmem:[#allocation11_spill] sm:$0xff] }
 0x1dd   : > { %v1755_v48 = vrot.slane %v1754_v35, 2  ;;  %v1686_v47 = vmax.f32 %v1684_v23, %v1685_v3  ;;  %v1692_v18 = vrot.slane %v1691_v51, 2  ;;  %v1705_v59 = vmax.f32 %v1703_v30, %v1704_v6  ;;  %v7579_v55 = vld [vmem:[#allocation3_spill] sm:$0xff] }
 0x1de   : > { %v1743_v2 = vrot.slane %v1742_v8, 1  ;;  %v1749_v54 = vmax.f32 %v1747_v16, %v1748_v9  ;;  %v1699_v38 = vrot.slane %v1698_v43, 2  ;;  %v2060_v1 = vsel %vm2040_vm7, %v5978_v42, %v2059_v13  ;;  %v7578_v16 = vld [vmem:[#allocation12_spill] sm:$0xff] }
 0x1df   : > { %v2159_v12 = vshrl.u32 %v6305_v56, 16  ;;  %v1687_v22 = vrot.slane %v1686_v47, 1  ;;  %v1693_v61 = vmax.f32 %v1691_v51, %v1692_v18  ;;  %v1706_v17 = vrot.slane %v1705_v59, 2  ;;  %v7580_v51 = vld [vmem:[#allocation8_spill] sm:$0xff] }
 0x1e0   : > { %v2163_v46 = vrot.slane %v2161_v5, 1  ;;  %v1750_v37 = vrot.slane %v1749_v54, 1  ;;  %v1700_v29 = vmax.f32 %v1698_v43, %v1699_v38  ;;  %v2061_v63 = vsel %vm2042_vm8, %v7576_v60, %v2060_v1 }
 0x1e1   : > { %v1688_v28 = vmax.f32 %v1686_v47, %v1687_v22  ;;  %v1694_v19 = vrot.slane %v1693_v61, 1  ;;  %v1707_v57 = vmax.f32 %v1705_v59, %v1706_v17  ;;  %v2062_v34 = vsel %vm2044_vm9, %v7577_v44, %v2061_v63  ;;  %v7586_v22 = vld [vmem:[#allocation10_spill] sm:$0xff] }
 0x1e2   : > { %v6343_v36 = vmax.f32 %v1742_v8, %v1743_v2  ;;  %v1756_v42 = vmax.f32 %v1754_v35, %v1755_v48  ;;  %v1701_v45 = vrot.slane %v1700_v29, 1  ;;  %v2063_v23 = vsel %vm2046_vm10, %v1966_v41, %v2062_v34  ;;  %v7582_v41 = vld [vmem:[#allocation4_spill] sm:$0xff]  ;;  %v7583_v48 = vld [vmem:[#allocation5_spill] sm:$0xff]  ;;  %v7585_v2 = vld [vmem:[#allocation7_spill] sm:$0xff] }
 0x1e3   : > { %v6346_v21 = vmax.f32 %v1749_v54, %v1750_v37  ;;  %v6348_v11 = vmax.f32 %v1693_v61, %v1694_v19  ;;  %v1708_v53 = vrot.slane %v1707_v57, 1  ;;  %v2065_v30 = vsel %vm2050_vm4, %v7579_v55, %v7578_v16  ;;  %v7588_v19 = vld [vmem:[#allocation18_spill] sm:$0xff]  ;;  %v7591_v16 = vld [vmem:[#allocation19_spill] sm:$0xff] }
 0x1e4   : > { %v6356_v5 = vunpack.c.l.b16 %v1840_v39  ;;  %v1702_v3 = vmax.f32 %v1700_v29, %v1701_v45  ;;  %v7581_v35 = vpack.c.bf16 %v7580_v51, %v7580_v51  ;;  %v2066_v8 = vsel %vm2038_vm6, %v7582_v41, %v2065_v30  ;;  %v7584_v39 = vld [vmem:[#allocation6_spill] sm:$0xff]  ;;  %v7592_v30 = vld [vmem:[#allocation24_spill] sm:$0xff] }
 0x1e5   : > { %v2164_v9 = vor.u32 %v2163_v46, %v2159_v12  ;;  %v2512_v43 = vrot.slane %v6305_v56, 1  ;;  %v1841_v13 = vpack.c.bf16 %v1688_v28, %v1688_v28  ;;  %v2067_v47 = vsel %vm2040_vm7, %v7583_v48, %v2066_v8 }
 0x1e6   : > { %v1974_v6 = vunpack.c.l.b16 %v7581_v35  ;;  %v1757_v18 = vrot.slane %v1756_v42, 1  ;;  %v1849_v58 = vpack.c.bf16 %v6343_v36, %v6343_v36  ;;  %v2068_v59 = vsel %vm2042_vm8, %v7584_v39, %v2067_v47 }
 0x1e7   : > { %v1321_v54 = vrot.slane %v7585_v2, 2  ;;  %v1850_v38 = vpack.c.bf16 %v6346_v21, %v6346_v21  ;;  %v6373_v1 = vmax.f32 %v1707_v57, %v1708_v53  ;;  %v1842_v12 = vpack.c.bf16 %v6348_v11, %v6348_v11  ;;  %v7590_v53 = vld [vmem:[#allocation17_spill] sm:$0xff] }
 0x1e8   : > { %v2069_v61 = vsel %vm2044_vm9, %v7586_v22, %v2068_v59  ;;  %v1843_v17 = vpack.c.bf16 %v1702_v3, %v1702_v3  ;;  %v7587_v29 = vrot.slane %v6054_v14, 1  ;;  %v6384_v63 = vunpack.c.l.b16 %v1841_v13  ;;  %v7593_v3 = vld [vmem:[#allocation13_spill] sm:$0xff]  ;;  %v7594_v13 = vld [vmem:[#allocation20_spill] sm:$0xff] }
 0x1e9   : > { %v2070_v46 = vsel %vm2046_vm10, %v1974_v6, %v2069_v61  ;;  %v1322_v37 = vmax.f32 %v7585_v2, %v1321_v54  ;;  %v7589_v57 = vrot.slane %v7588_v19, 1  ;;  %v2071_v55 = vsel %vm2038_vm6, %v7591_v16, %v7590_v53  ;;  %v7598_v2 = vld [vmem:[#allocation14_spill] sm:$0xff]  ;;  %v7599_v61 = vld [vmem:[#allocation23_spill] sm:$0xff] }
 0x1ea   : > { %v1366_v60 = vmax.f32 %v6054_v14, %v7587_v29  ;;  %v6386_v28 = vpack.c.b16 %v2070_v46, %v2063_v23  ;;  %v2077_v51 = vsel %vm2050_vm4, %v7593_v3, %v7592_v30  ;;  %v1844_v14 = vpack.c.bf16 %v6373_v1, %v6373_v1  ;;  %v7600_v46 = vld [vmem:[#allocation15_spill] sm:$0xff] }
 0x1eb   : > { %v1422_v44 = vmax.f32 %v7588_v19, %v7589_v57  ;;  %v1323_v34 = vrot.slane %v1322_v37, 1  ;;  %v6402_v35 = vmax.f32 %v1756_v42, %v1757_v18  ;;  %v6404_v6 = vunpack.c.l.b16 %v1843_v17  ;;  %v7597_v42 = vld [vmem:[#allocation21_spill] sm:$0xff]  ;;  %v7601_v57 = vld [vmem:[#allocation16_spill] sm:$0xff]  ;;  %v7603_v16 = vld [vmem:[#allocation35_spill] sm:$0xff] }
 0x1ec   : > { %v1795_v45 = vpack.c.bf16 %v1366_v60, %v1366_v60  ;;  %5486 = vmatmul.mubr.msk.bf16.gmra.mrb[4].mxu0 %vm2243_vm11, %v6386_v28  ;;  %v2166_v23 = vshll.u32 %v6386_v28, 16  ;;  %v2072_v48 = vsel %vm2040_vm7, %v7594_v13, %v2071_v55  ;;  %v2078_v54 = vsel %vm2038_vm6, %v7598_v2, %v2077_v51  ;;  %v7606_v3 = vld [vmem:[#allocation31_spill] sm:$0xff]  ;;  %v7608_v2 = vld [vmem:[#allocation25_spill] sm:$0xff] }
 0x1ed   : > { %5489 = vmatprep.mubr.msk.bf16.mxu0 %vm5703_vm5, %v7569_v15  ;;  %v1324_v41 = vmax.f32 %v1322_v37, %v1323_v34  ;;  %v1803_v8 = vpack.c.bf16 %v1422_v44, %v1422_v44  ;;  %v2073_v18 = vsel %vm2042_vm8, %v7597_v42, %v2072_v48  ;;  %v2170_v22 = vshrl.u32 %v6386_v28, 16  ;;  %v7607_v42 = vld [vmem:[#allocation32_spill] sm:$0xff] }
 0x1ee   : > { %v2168_v47 = vrot.slane %v2166_v23, 1  ;;  %v1981_v59 = vunpack.c.l.b16 %v1795_v45  ;;  %v2074_v17 = vsel %vm2044_vm9, %v7599_v61, %v2073_v18  ;;  %v2079_v37 = vsel %vm2040_vm7, %v7600_v46, %v2078_v54  ;;  %v7602_v45 = vld [vmem:[#allocation22_spill] sm:$0xff]  ;;  %v7610_v46 = vld [vmem:[#allocation33_spill] sm:$0xff] }
 0x1ef   : > { %v5359_v1 = vpack.c.bf16 %v1324_v41, %v1324_v41  ;;  %v1989_v60 = vunpack.c.l.b16 %v1803_v8  ;;  %v2080_v44 = vsel %vm2042_vm8, %v7601_v57, %v2079_v37  ;;  %v7604_v55 = vpack.c.bf16 %v7603_v16, %v7603_v16  ;;  %v5691_v23 = vld [vmem:[%s7508_s3] sm:$0xff]   ;;  %v7613_v57 = vld [vmem:[#allocation27_spill] sm:$0xff] }
 0x1f0   : > { %v2169_v29 = vsel %vm2158_vm14, %v2164_v9, %v2168_v47  ;;  %v2075_v19 = vsel %vm2046_vm10, %v1981_v59, %v2074_v17  ;;  %v2081_v53 = vsel %vm2044_vm9, %v7602_v45, %v2080_v44  ;;  %v7605_v9 = vld [vmem:[#allocation29_spill] sm:$0xff]  ;;  %v2172_v13 = vor.u32 %v2170_v22, %v2168_v47  ;;  %v7611_v22 = vld [vmem:[#allocation26_spill] sm:$0xff] }
 0x1f1   : > { %5442 = vmatmul.mubr.msk.bf16.vlgmr.msra.gmra.mrb[24].mxu1 %vm2243_vm11, %v2169_v29  ;;  %v6432_v34 = vsel %vm6412_vm15, %v5359_v1, 0  ;;  %v1997_v30 = vunpack.c.l.b16 %v7604_v55  ;;  %v2085_v51 = vsel %vm2038_vm6, %v7606_v3, %v7605_v9  ;;  %v2082_v48 = vsel %vm2046_vm10, %v1989_v60, %v2081_v53  ;;  %v7609_v1 = vld [vmem:[#allocation30_spill] sm:$0xff]  ;;  %v7612_v60 = vld [vmem:[#allocation37_spill] sm:$0xff]  ;;  %v5692_v3 = vld [vmem:[%s7508_s3 + $0x8] sm:$0xff]  }
 0x1f2   : > { %5559 = vmatpush3.bf16.msra.mxu1 %v5691_v23  ;;  %v2174_v41 = vshll.u32 %v6432_v34, 16  ;;  %v2178_v8 = vshrl.u32 %v6432_v34, 16  ;;  %5445 = vmatprep.mubr.msk.bf16.mxu1 %vm5703_vm5, %v7569_v15  ;;  %v2126_v59 = vpack.c.b16 %v2082_v48, %v2075_v19  ;;  %v2086_v18 = vsel %vm2040_vm7, %v7607_v42, %v2085_v51 }
 0x1f3   : > { %v2091_v54 = vsel %vm2050_vm4, %v7608_v2, %v6167_v10  ;;  %v1538_v61 = vrot.slane %v7609_v1, 2  ;;  %5558 = vmatprep.subr.bf16.mxu1 %v7569_v15  ;;  %v2087_v47 = vsel %vm2042_vm8, %v7610_v46, %v2086_v18  ;;  %v1583_v29 = vmax.f32 %v6220_v7, %v1582_v32  ;;  %v7614_v7 = vld [vmem:[#allocation34_spill] sm:$0xff] }
 0x1f4   : > { %5490 = vmatmul.mubr.msk.bf16.gmra.mrb[8].mxu0 %vm2243_vm11, %v6432_v34  ;;  %v2176_v17 = vrot.slane %v2174_v41, 1  ;;  %v2092_v37 = vsel %vm2038_vm6, %v7611_v22, %v2091_v54  ;;  %v6469_v10 = vsel %vm2135_vm12, 0, %v2126_v59  ;;  %v2088_v19 = vsel %vm2044_vm9, %v7612_v60, %v2087_v47  ;;  %v7616_v41 = vld [vmem:[#allocation28_spill] sm:$0xff]  ;;  %v7621_v46 = vld [vmem:[#allocation38_spill] sm:$0xff] }
 0x1f5   : > { %5493 = vmatprep.mubr.msk.bf16.mxu0 %vm5703_vm5, %v7569_v15  ;;  %v2093_v44 = vsel %vm2040_vm7, %v7613_v57, %v2092_v37  ;;  %v1539_v45 = vmax.f32 %v7609_v1, %v1538_v61  ;;  %v2030_v53 = vunpack.c.l.b16 %v1844_v14  ;;  %v2181_v55 = vshll.u32 %v6469_v10, 16  ;;  %v7617_v59 = vld [vmem:[#allocation36_spill] sm:$0xff]  ;;  %v7619_v1 = vld [vmem:[#allocation42_spill] sm:$0xff]  ;;  %v7620_v61 = vld [vmem:[#allocation43_spill] sm:$0xff] }
 0x1f6   : > { %v2177_v16 = vsel %vm2158_vm14, %v2172_v13, %v2176_v17  ;;  %v7615_v32 = vpack.c.bf16 %v7614_v7, %v7614_v7  ;;  %5560 = vmatpush3.bf16.msra.mxu1 %v5692_v3  ;;  %v2180_v51 = vor.u32 %v2178_v8, %v2176_v17  ;;  %v2089_v23 = vsel %vm2046_vm10, %v1997_v30, %v2088_v19 }
 0x1f7   : > { %v2094_v48 = vsel %vm2042_vm8, %v7616_v41, %v2093_v44  ;;  %v1540_v14 = vrot.slane %v1539_v45, 1  ;;  %5517 = vmatprep.subr.bf16.mxu1 %v7569_v15  ;;  %v2183_v13 = vrot.slane %v2181_v55, 1  ;;  %v7618_v18 = vrot.slane %v6163_v33, 1  ;;  %v7622_v44 = vld [vmem:[#allocation39_spill] sm:$0xff]  ;;  %v7624_v41 = vld [vmem:[#allocation41_spill] sm:$0xff] }
 0x1f8   : > { %v2005_v9 = vunpack.c.l.b16 %v7615_v32  ;;  %v2095_v42 = vsel %vm2044_vm9, %v7617_v59, %v2094_v48  ;;  %v1826_v54 = vpack.c.bf16 %v1583_v29, %v1583_v29  ;;  %v2097_v17 = vsel %vm2038_vm6, %v7620_v61, %v7619_v1 }
 0x1f9   : > { %v1639_v2 = vmax.f32 %v6163_v33, %v7618_v18  ;;  %5446 = vmatmul.mubr.msk.bf16.gmra.mrb[28].mxu1 %vm2243_vm11, %v2177_v16  ;;  %v1541_v30 = vmax.f32 %v1539_v45, %v1540_v14  ;;  %v2103_v47 = vsel %vm2050_vm4, %v7621_v46, %v6288_v31  ;;  %v2185_v22 = vshrl.u32 %v6469_v10, 16 }
 0x1fa   : > { %v2096_v8 = vsel %vm2046_vm10, %v2005_v9, %v2095_v42  ;;  %5449 = vmatprep.mubr.msk.bf16.mxu1 %vm5703_vm5, %v7569_v15  ;;  %v2184_v33 = vsel %vm2158_vm14, %v2180_v51, %v2183_v13  ;;  %v2012_v19 = vunpack.c.l.b16 %v1826_v54  ;;  %v2098_v57 = vsel %vm2040_vm7, %v6218_v52, %v2097_v17 }
 0x1fb   : > { %v6505_v37 = vpack.c.b16 %v2096_v8, %v2089_v23  ;;  %v1834_v29 = vpack.c.bf16 %v1639_v2, %v1639_v2  ;;  %v5360_v60 = vpack.c.bf16 %v1541_v30, %v1541_v30  ;;  %v2104_v45 = vsel %vm2038_vm6, %v7622_v44, %v2103_v47 }
 0x1fc   : > { %v2116_v31 = vsel %vm2048_vm3, %v2030_v53, %v6404_v6  ;;  %v5361_v16 = vpack.c.bf16 %v6402_v35, %v6402_v35  ;;  %5494 = vmatmul.mubr.msk.bf16.gmra.mrb[12].mxu0 %vm2243_vm11, %v6469_v10  ;;  %v2099_v7 = vsel %vm2042_vm8, %v6225_v0, %v2098_v57  ;;  %v2187_v52 = vor.u32 %v2185_v22, %v2183_v13  ;;  %v7623_v53 = vld [vmem:[#allocation40_spill] sm:$0xff] }
 0x1fd   : > { %v2189_v55 = vshll.u32 %v6505_v37, 16  ;;  %5497 = vmatprep.mubr.msk.bf16.mxu0 %vm5703_vm5, %v7569_v15  ;;  %v2147_v32 = vsel %vm6412_vm15, %v5360_v60, 0  ;;  %v2100_v6 = vsel %vm2044_vm9, %v6241_v26, %v2099_v7  ;;  %v2105_v35 = vsel %vm2040_vm7, %v7623_v53, %v2104_v45 }
 0x1fe   : > { %v2197_v3 = vshll.u32 %v2147_v32, 16  ;;  %v2193_v51 = vshrl.u32 %v6505_v37, 16  ;;  %v2020_v23 = vunpack.c.l.b16 %v1834_v29  ;;  %v2101_v0 = vsel %vm2046_vm10, %v2012_v19, %v2100_v6 }
 0x1ff   : > { %v2191_v9 = vrot.slane %v2189_v55, 1  ;;  %v2106_v48 = vsel %vm2042_vm8, %v7624_v41, %v2105_v35  ;;  %v2028_v14 = vunpack.c.l.b16 %v1842_v12  ;;  %v2111_v26 = vsel %vm2038_vm6, %v6312_v40, %v6299_v20  ;;  %v5616_v41 = vld [vmem:[%s7508_s3 + $0x20] sm:$0xff]  }
 0x200   : > { %v2199_v42 = vrot.slane %v2197_v3, 1  ;;  %v2107_v18 = vsel %vm2044_vm9, %v6233_v50, %v2106_v48  ;;  %v2035_v2 = vunpack.c.l.b16 %v1849_v58  ;;  %v2112_v12 = vsel %vm2040_vm7, %v6321_v27, %v2111_v26  ;;  %v5617_v48 = vld [vmem:[%s7508_s3 + $0x28] sm:$0xff]  }
 0x201   : > { %v2192_v13 = vsel %vm2158_vm14, %v2187_v52, %v2191_v9  ;;  %v2195_v59 = vor.u32 %v2193_v51, %v2191_v9  ;;  %5450 = vmatmul.mubr.msk.bf16.gmra.mrb[32].mxu1 %vm2243_vm11, %v2184_v33  ;;  %v2108_v11 = vsel %vm2046_vm10, %v2020_v23, %v2107_v18  ;;  %v2117_v20 = vsel %vm2050_vm4, %v6277_v24, %v2116_v31 }
 0x202   : > { %v6552_v40 = vsel %vm6412_vm15, %v5361_v16, 0  ;;  %5453 = vmatprep.mubr.msk.bf16.mxu1 %vm5703_vm5, %v7569_v15  ;;  %v2129_v36 = vpack.c.b16 %v2108_v11, %v2101_v0  ;;  %v2113_v58 = vsel %vm2042_vm8, %v6356_v5, %v2112_v12  ;;  %v2517_v54 = vrot.slane %v6469_v10, 1  ;;  %v5620_v11 = vld [vmem:[%s7510_s5 + $0x84] ss:$8 sps:$4 sm:$0xff]  }
 0x203   : > { %v2200_v50 = vsel %vm2158_vm14, %v2195_v59, %v2199_v42  ;;  %v2036_v27 = vunpack.c.l.b16 %v1850_v38  ;;  %v2114_v24 = vsel %vm2044_vm9, %v6384_v63, %v2113_v58  ;;  %v2118_v39 = vsel %vm2038_vm6, %v6279_v62, %v2117_v20  ;;  %3681 = vmatprep.subr.bf16.mxu0 %v5620_v11 }
 0x204   : > { %5498 = vmatmul.mubr.msk.bf16.gmra.mrb[16].mxu0 %vm2243_vm11, %v6505_v37  ;;  %v2201_v8 = vshrl.u32 %v2147_v32, 16  ;;  %v2142_v30 = vsel %vm2135_vm12, 0, %v2129_v36  ;;  %v2115_v5 = vsel %vm2046_vm10, %v2028_v14, %v2114_v24  ;;  %v2119_v10 = vsel %vm2040_vm7, %v6302_v4, %v2118_v39 }
 0x205   : > { %v2515_v21 = vrot.slane %v6432_v34, 1  ;;  %5501 = vmatprep.mubr.msk.bf16.mxu0 %vm5703_vm5, %v7569_v15  ;;  %v2204_v38 = vshll.u32 %v2142_v30, 16  ;;  %v2523_v63 = vrot.slane %v2142_v30, 1  ;;  %v2120_v62 = vsel %vm2042_vm8, %v6308_v49, %v2119_v10 }
 0x206   : > { %v2521_v1 = vrot.slane %v2147_v32, 1  ;;  %v2203_v61 = vor.u32 %v2201_v8, %v2199_v42  ;;  %v2121_v17 = vsel %vm2044_vm9, %v2035_v2, %v2120_v62  ;;  %v2513_v4 = vrot.slane %v6386_v28, 1 }
 0x207   : > { %v2206_v46 = vrot.slane %v2204_v38, 1  ;;  %v2122_v47 = vsel %vm2046_vm10, %v2036_v27, %v2121_v17  ;;  %v2518_v34 = vsel %vm2511_vm0, %v2515_v21, %v2517_v54  ;;  %v2519_v33 = vrot.slane %v6505_v37, 1  ;;  %v5629_v17 = vld [vmem:[%s7510_s5 + $0xb4] ss:$8 sps:$4 sm:$0xff]  }
 0x208   : > { %v2130_v22 = vpack.c.b16 %v2122_v47, %v2115_v5  ;;  %v2524_v29 = vsel %vm2511_vm0, %v2521_v1, %v2523_v63  ;;  %v2220_v60 = vshll.u32 %v6552_v40, 16  ;;  %v2514_v19 = vsel %vm2511_vm0, %v2512_v43, %v2513_v4  ;;  %v5626_v5 = vld [vmem:[%s7510_s5 + $0xa4] ss:$8 sps:$4 sm:$0xff]  }
 0x209   : > { %5454 = vmatmul.mubr.msk.bf16.gmra.mrb[36].mxu1 %vm2243_vm11, %v2192_v13  ;;  %v2207_v49 = vsel %vm2158_vm14, %v2203_v61, %v2206_v46  ;;  %v2516_v57 = vsel %vm2511_vm0, %v2513_v4, %v2515_v21  ;;  %v2208_v28 = vshrl.u32 %v2142_v30, 16  ;;  %v2520_v37 = vsel %vm2511_vm0, %v2517_v54, %v2519_v33  ;;  %v5621_v54 = vld [vmem:[%s7510_s5 + $0x90] ss:$8 sps:$4 sm:$0xff]   ;;  %v5624_v21 = vld [vmem:[%s7510_s5 + $0xa0] ss:$8 sps:$4 sm:$0xff]  }
 0x20a   : > { %5457 = vmatprep.mubr.msk.bf16.mxu1 %vm5703_vm5, %v7569_v15  ;;  %v2212_v44 = vshll.u32 %v2130_v22, 16  ;;  %v2522_v45 = vsel %vm2511_vm0, %v2519_v33, %v2521_v1  ;;  %v2525_v31 = vrot.slane %v2130_v22, 1  ;;  %v2527_v16 = vrot.slane %v6552_v40, 1 }
 0x20b   : > { %v2210_v55 = vor.u32 %v2208_v28, %v2206_v46  ;;  %v2216_v7 = vshrl.u32 %v2130_v22, 16  ;;  %v2222_v35 = vrot.slane %v2220_v60, 1  ;;  %v2224_v3 = vshrl.u32 %v6552_v40, 16 }
 0x20c   : > { %5502 = vmatmul.mubr.msk.bf16.gmra.mrb[20].mxu0 %vm2243_vm11, %v2147_v32  ;;  %v2214_v56 = vrot.slane %v2212_v44, 1  ;;  %v2526_v43 = vsel %vm2511_vm0, %v2523_v63, %v2525_v31  ;;  %v2528_v52 = vsel %vm2511_vm0, %v2525_v31, %v2527_v16  ;;  %v5704_v32 = vmov 0  }
 0x20d   : > { %5505 = vmatprep.mubr.msk.bf16.mxu0 %vm5703_vm5, %v7569_v15  ;;  %v2226_v51 = vor.u32 %v2224_v3, %v2222_v35  ;;  %v6622_v23 = vrot.slane %v5704_v32, 1 }
 0x20e   : > { %v2215_v6 = vsel %vm2158_vm14, %v2210_v55, %v2214_v56  ;;  %v2218_v53 = vor.u32 %v2216_v7, %v2214_v56 }
 0x20f   : > { %v2230_v0 = vsel %vm2158_vm14, %v2226_v51, %v6622_v23  ;;  %v2530_v14 = vsel %vm2511_vm0, %v2527_v16, %v6622_v23 }
 0x210   : > { %v2223_v9 = vsel %vm2158_vm14, %v2218_v53, %v2222_v35  ;;  %v5632_v53 = vld [vmem:[%s7510_s5 + $0xc4] ss:$8 sps:$4 sm:$0xff]  }
 0x211   : > { %5458 = vmatmul.mubr.msk.bf16.gmra.mrb[40].mxu1 %vm2243_vm11, %v2200_v50  ;;  %v5623_v50 = vld [vmem:[%s7510_s5 + $0x94] ss:$8 sps:$4 sm:$0xff]  }
 0x212   : > { %5461 = vmatprep.mubr.msk.bf16.mxu1 %vm5703_vm5, %v7569_v15 }
 0x214   : > { %5506 = vmatmul.mubr.msk.bf16.gmra.mrb[24].mxu0 %vm2243_vm11, %v2142_v30 }
 0x215   : > { %5509 = vmatprep.mubr.msk.bf16.mxu0 %vm5703_vm5, %v7569_v15 }
 0x219   : > { %5462 = vmatmul.mubr.msk.bf16.gmra.mrb[44].mxu1 %vm2243_vm11, %v2207_v49 }
 0x21a   : > { %5465 = vmatprep.mubr.msk.bf16.mxu1 %vm5703_vm5, %v7569_v15 }
 0x21c   : > { %5510 = vmatmul.mubr.msk.bf16.gmra.mrb[28].mxu0 %vm2243_vm11, %v2130_v22 }
 0x21d   : > { %3713 = vmatprep.mubr.bf16.mxu0 %v5704_v32 }
 0x221   : > { %5466 = vmatmul.mubr.msk.bf16.gmra.mrb[48].mxu1 %vm2243_vm11, %v2215_v6 }
 0x222   : > { %5469 = vmatprep.mubr.msk.bf16.mxu1 %vm5703_vm5, %v7569_v15 }
 0x229   : > { %5470 = vmatmul.mubr.msk.bf16.gmra.mrb[52].mxu1 %vm2243_vm11, %v2223_v9  ;;  %v5630_v9 = vld [vmem:[%s7510_s5 + $0xc0] ss:$8 sps:$4 sm:$0xff]  }
 0x22a   : > { %5473 = vmatprep.mubr.msk.bf16.mxu1 %vm5703_vm5, %v7569_v15 }
 0x231   : > { %5474 = vmatmul.mubr.msk.bf16.gmra.mrb[56].mxu1 %vm2243_vm11, %v2230_v0  ;;  %v5635_v0 = vld [vmem:[%s7510_s5 + $0xd4] ss:$8 sps:$4 sm:$0xff]  }
 0x232   : > { %5513 = vmatprep.mubr.msk.bf16.mxu1 %vm5703_vm5, %v7569_v15 }
 0x239   : > { %5514 = vmatmul.mubr.msk.bf16.vlgmr.msra.gmra.mrb[60].mxu1 %vm2243_vm11, %v6552_v40 }
 0x23a   : > { %5518 = vmatpush3.bf16.msra.mxu1 %v5616_v41  ;;  %5521 = vmatprep.mubr.msk.bf16.mxu1 %vm5703_vm5, %v7569_v15 }
 0x23b   : > { %5519 = vmatprep.subr.bf16.mxu1 %v7569_v15 }
 0x23e   : > { %5520 = vmatpush3.bf16.msra.mxu1 %v5617_v48 }
 0x241   : > { %5522 = vmatmul.mubr.msk.bf16.vlgmr.msra.gmra.mrb[64].mxu1 %vm2243_vm11, %v2514_v19 }
 0x242   : > { %5525 = vmatprep.mubr.msk.bf16.mxu1 %vm5703_vm5, %v7569_v15 }
 0x249   : > { %5526 = vmatmul.mubr.msk.bf16.gmra.mrb[68].mxu1 %vm2243_vm11, %v2516_v57 }
 0x24a   : > { %5529 = vmatprep.mubr.msk.bf16.mxu1 %vm5703_vm5, %v7569_v15 }
 0x251   : > { %5530 = vmatmul.mubr.msk.bf16.gmra.mrb[72].mxu1 %vm2243_vm11, %v2518_v34  ;;  %v5627_v34 = vld [vmem:[%s7510_s5 + $0xb0] ss:$8 sps:$4 sm:$0xff]  }
 0x252   : > { %5533 = vmatprep.mubr.msk.bf16.mxu1 %vm5703_vm5, %v7569_v15 }
 0x259   : > { %5534 = vmatmul.mubr.msk.bf16.gmra.mrb[76].mxu1 %vm2243_vm11, %v2520_v37 }
 0x25a   : > { %5537 = vmatprep.mubr.msk.bf16.mxu1 %vm5703_vm5, %v7569_v15 }
 0x261   : > { %5538 = vmatmul.mubr.msk.bf16.gmra.mrb[80].mxu1 %vm2243_vm11, %v2522_v45 }
 0x262   : > { %5541 = vmatprep.mubr.msk.bf16.mxu1 %vm5703_vm5, %v7569_v15 }
 0x269   : > { %5542 = vmatmul.mubr.msk.bf16.gmra.mrb[84].mxu1 %vm2243_vm11, %v2524_v29 }
 0x26a   : > { %5545 = vmatprep.mubr.msk.bf16.mxu1 %vm5703_vm5, %v7569_v15 }
 0x271   : > { %5546 = vmatmul.mubr.msk.bf16.gmra.mrb[88].mxu1 %vm2243_vm11, %v2526_v43 }
 0x272   : > { %5549 = vmatprep.mubr.msk.bf16.mxu1 %vm5703_vm5, %v7569_v15 }
 0x279   : > { %5550 = vmatmul.mubr.msk.bf16.gmra.mrb[92].mxu1 %vm2243_vm11, %v2528_v52 }
 0x27a   : > { %5553 = vmatprep.mubr.msk.bf16.mxu1 %vm5703_vm5, %v7569_v15  ;;  %v5618_v15 = vld [vmem:[%s7510_s5 + $0x80] ss:$8 sps:$4 sm:$0xff]  }
 0x27b   : > { %3682 = vmatpush1.bf16.msra.mxu0 %v5618_v15 }
 0x27c   : > { %3683 = vmatprep.subr.bf16.mxu0 %v5623_v50 }
 0x27f   : > { %3684 = vmatpush1.bf16.msra.mxu0 %v5621_v54 }
 0x280   : > { %3685 = vmatprep.subr.bf16.mxu0 %v5626_v5 }
 0x281   : > { %5554 = vmatmul.mubr.msk.bf16.gmra.mrb[96].mxu1 %vm2243_vm11, %v2530_v14  ;;  %v5633_v14 = vld [vmem:[%s7510_s5 + $0xd0] ss:$8 sps:$4 sm:$0xff]  }
 0x283   : > { %3686 = vmatpush1.bf16.msra.mxu0 %v5624_v21 }
 0x284   : > { %3687 = vmatprep.subr.bf16.mxu0 %v5629_v17 }
 0x287   : > { %3688 = vmatpush1.bf16.msra.mxu0 %v5627_v34 }
 0x288   : > { %3689 = vmatprep.subr.bf16.mxu0 %v5632_v53 }
 0x28b   : > { %3690 = vmatpush1.bf16.msra.mxu0 %v5630_v9 }
 0x28c   : > { %3691 = vmatprep.subr.bf16.mxu0 %v5635_v0 }
 0x28f   : > { %3692 = vmatpush1.bf16.msra.mxu0 %v5633_v14 }
 0x2a7   : > { %v2434_v26 = vpop.f32.mrb[0].mxu0 }
 0x2a8   : > { %v5483_v13 = vpop.f32.mrb[1].mxu0 }
 0x2a9   : > { %v2437_v59 = vpop.f32.mrb[2].mxu0 }
 0x2aa   : > { %v5484_v42 = vpop.f32.mrb[3].mxu0 }
 0x2bf   : > { %v2442_v18 = vpop.f32.mrb[4].mxu0 }
 0x2c0   : > { %v5487_v2 = vpop.f32.mrb[5].mxu0 }
 0x2c1   : > { %v2445_v12 = vpop.f32.mrb[6].mxu0  ;;  %v5638_v2 = vld [vmem:[%s7510_s5 + $0xe4] ss:$8 sps:$4 sm:$0xff]  }
 0x2c2   : > { %v5488_v20 = vpop.f32.mrb[7].mxu0  ;;  %3693 = vmatprep.subr.bf16.mxu0 %v5638_v2 }
 0x2c4   : > { %v2305_v40 = vpop.f32.mrb[24].mxu1 }
 0x2c5   : > { %v6676_v36 = vadd.f32 %v2434_v26, %v2305_v40  ;;  %v5443_v58 = vpop.f32.mrb[25].mxu1  ;;  %v5641_v40 = vld [vmem:[%s7510_s5 + $0xf4] ss:$8 sps:$4 sm:$0xff]  }
 0x2c6   : > { %v2308_v27 = vpop.f32.mrb[26].mxu1  ;;  %v5639_v58 = vld [vmem:[%s7510_s5 + $0xf0] ss:$8 sps:$4 sm:$0xff]  }
 0x2c7   : > { %v6681_v24 = vadd.f32 %v2437_v59, %v2308_v27  ;;  %v5444_v39 = vpop.f32.mrb[27].mxu1  ;;  %v2450_v8 = vpop.f32.mrb[8].mxu0 }
 0x2c8   : > { %v5491_v30 = vpop.f32.mrb[9].mxu0 }
 0x2c9   : > { %v2452_v10 = vpop.f32.mrb[10].mxu0 }
 0x2ca   : > { %v5492_v38 = vpop.f32.mrb[11].mxu0 }
 0x2cc   : > { %v2313_v63 = vpop.f32.mrb[28].mxu1 }
 0x2cd   : > { %v6689_v62 = vadd.f32 %v2442_v18, %v2313_v63  ;;  %v5447_v1 = vpop.f32.mrb[29].mxu1 }
 0x2ce   : > { %v2316_v61 = vpop.f32.mrb[30].mxu1 }
 0x2cf   : > { %v6694_v46 = vadd.f32 %v2445_v12, %v2316_v61  ;;  %v5448_v47 = vpop.f32.mrb[31].mxu1  ;;  %v2456_v4 = vpop.f32.mrb[12].mxu0  ;;  %v5636_v12 = vld [vmem:[%s7510_s5 + $0xe0] ss:$8 sps:$4 sm:$0xff]  }
 0x2d0   : > { %v5495_v22 = vpop.f32.mrb[13].mxu0  ;;  %3694 = vmatpush1.bf16.msra.mxu0 %v5636_v12 }
 0x2d1   : > { %v2459_v33 = vpop.f32.mrb[14].mxu0  ;;  %3695 = vmatprep.subr.bf16.mxu0 %v5641_v40 }
 0x2d2   : > { %v5496_v29 = vpop.f32.mrb[15].mxu0 }
 0x2d4   : > { %v2321_v49 = vpop.f32.mrb[32].mxu1  ;;  %3696 = vmatpush1.bf16.msra.mxu0 %v5639_v58 }
 0x2d5   : > { %v5451_v60 = vpop.f32.mrb[33].mxu1 }
 0x2d6   : > { %v2323_v19 = vpop.f32.mrb[34].mxu1 }
 0x2d7   : > { %v5452_v57 = vpop.f32.mrb[35].mxu1  ;;  %v2464_v28 = vpop.f32.mrb[16].mxu0 }
 0x2d8   : > { %v5499_v44 = vpop.f32.mrb[17].mxu0 }
 0x2d9   : > { %v2467_v37 = vpop.f32.mrb[18].mxu0 }
 0x2da   : > { %v5500_v45 = vpop.f32.mrb[19].mxu0 }
 0x2dc   : > { %v2327_v31 = vpop.f32.mrb[36].mxu1 }
 0x2dd   : > { %v6699_v16 = vadd.f32 %v2456_v4, %v2327_v31  ;;  %v5455_v55 = vpop.f32.mrb[37].mxu1  ;;  %v6742_v31 = vld [vmem:[%s7509_s4] ss:$0 sm:$0xff] }
 0x2de   : > { %v2330_v56 = vpop.f32.mrb[38].mxu1 }
 0x2df   : > { %v6701_v7 = vadd.f32 %v2459_v33, %v2330_v56  ;;  %v5456_v43 = vpop.f32.mrb[39].mxu1  ;;  %v2472_v52 = vpop.f32.mrb[20].mxu0 }
 0x2e0   : > { %v5503_v6 = vpop.f32.mrb[21].mxu0 }
 0x2e1   : > { %v2474_v35 = vpop.f32.mrb[22].mxu0 }
 0x2e2   : > { %v5504_v3 = vpop.f32.mrb[23].mxu0 }
 0x2e4   : > { %v2335_v51 = vpop.f32.mrb[40].mxu1 }
 0x2e5   : > { %v6712_v41 = vadd.f32 %v2464_v28, %v2335_v51  ;;  %v5459_v48 = vpop.f32.mrb[41].mxu1 }
 0x2e6   : > { %v2338_v26 = vpop.f32.mrb[42].mxu1 }
 0x2e7   : > { %v6717_v13 = vadd.f32 %v2467_v37, %v2338_v26  ;;  %v5460_v59 = vpop.f32.mrb[43].mxu1  ;;  %v2478_v42 = vpop.f32.mrb[24].mxu0 }
 0x2e8   : > { %v5507_v18 = vpop.f32.mrb[25].mxu0 }
 0x2e9   : > { %v2481_v11 = vpop.f32.mrb[26].mxu0 }
 0x2ea   : > { %v5508_v15 = vpop.f32.mrb[27].mxu0 }
 0x2ec   : > { %v2343_v20 = vpop.f32.mrb[44].mxu1 }
 0x2ed   : > { %v5463_v50 = vpop.f32.mrb[45].mxu1 }
 0x2ee   : > { %v2345_v54 = vpop.f32.mrb[46].mxu1 }
 0x2ef   : > { %v5464_v27 = vpop.f32.mrb[47].mxu1  ;;  %v2486_v39 = vpop.f32.mrb[28].mxu0 }
 0x2f0   : > { %v5511_v8 = vpop.f32.mrb[29].mxu0 }
 0x2f1   : > { %v2489_v30 = vpop.f32.mrb[30].mxu0 }
 0x2f2   : > { %v5512_v5 = vpop.f32.mrb[31].mxu0 }
 0x2f4   : > { %v2349_v10 = vpop.f32.mrb[48].mxu1 }
 0x2f5   : > { %v6731_v21 = vadd.f32 %v2478_v42, %v2349_v10  ;;  %v5467_v38 = vpop.f32.mrb[49].mxu1 }
 0x2f6   : > { %v2352_v63 = vpop.f32.mrb[50].mxu1 }
 0x2f7   : > { %v6733_v1 = vadd.f32 %v2481_v11, %v2352_v63  ;;  %v5468_v61 = vpop.f32.mrb[51].mxu1 }
 0x2fc   : > { %v2357_v17 = vpop.f32.mrb[52].mxu1 }
 0x2fd   : > { %v6735_v47 = vadd.f32 %v2486_v39, %v2357_v17  ;;  %v5471_v4 = vpop.f32.mrb[53].mxu1 }
 0x2fe   : > { %v2360_v34 = vpop.f32.mrb[54].mxu1 }
 0x2ff   : > { %v6737_v22 = vadd.f32 %v2489_v30, %v2360_v34  ;;  %v5472_v33 = vpop.f32.mrb[55].mxu1 }
 0x304   : > { %v2365_v29 = vpop.f32.mrb[56].mxu1 }
 0x305   : > { %v5475_v49 = vpop.f32.mrb[57].mxu1 }
 0x306   : > { %v2367_v60 = vpop.f32.mrb[58].mxu1 }
 0x307   : > { %v5476_v19 = vpop.f32.mrb[59].mxu1 }
 0x30c   : > { %v2494_v57 = vpop.f32.mrb[60].mxu1 }
 0x30d   : > { %v5515_v28 = vpop.f32.mrb[61].mxu1 }
 0x30e   : > { %v2496_v44 = vpop.f32.mrb[62].mxu1 }
 0x30f   : > { %v5516_v37 = vpop.f32.mrb[63].mxu1 }
 0x314   : > { %v2604_v45 = vpop.f32.mrb[64].mxu1 }
 0x315   : > { %v2669_v55 = vadd.f32 %v2604_v45, %v6676_v36  ;;  %v5523_v56 = vpop.f32.mrb[65].mxu1 }
 0x316   : > { %v2607_v43 = vpop.f32.mrb[66].mxu1 }
 0x317   : > { %v2688_v52 = vadd.f32 %v6742_v31, %v2669_v55  ;;  %v2670_v6 = vadd.f32 %v2607_v43, %v6681_v24  ;;  %v5524_v53 = vpop.f32.mrb[67].mxu1 }
 0x319   : > { %v2700_v35 = vmax.f32 %v2688_v52, 0.0  ;;  %v2689_v9 = vadd.f32 %v6742_v31, %v2670_v6 }
 0x31b   : > { %v2724_v3 = vcombine.high %v2700_v35, %v2700_v35  ;;  %v2731_v51 = vrot.slane %v2700_v35, %v5794_v25  ;;  %v2701_v0 = vmax.f32 %v2689_v9, 0.0 }
 0x31c   : > { %v2612_v48 = vpop.f32.mrb[68].mxu1 }
 0x31d   : > { %v2738_v14 = vrot.slane %v2724_v3, %v5794_v25  ;;  %v2739_v26 = vcombine.high %v2731_v51, %v2731_v51  ;;  %v2977_v36 = vsel %vm2976_vm1, %v2731_v51, -inf  ;;  %v2741_v59 = vcombine.high %v2701_v0, %v2701_v0  ;;  %v5527_v42 = vpop.f32.mrb[69].mxu1 }
 0x31e   : > { %v2978_v18 = vrot.slane %v2977_v36, 4  ;;  %v2748_v24 = vrot.slane %v2701_v0, %v5794_v25  ;;  %v6753_v2 = vadd.f32 %v2612_v48, %v6689_v62  ;;  %v6755_v11 = vpop.f32.mrb[70].mxu1 }
 0x31f   : > { %v2740_v12 = vcombine.high %v2738_v14, %v2738_v14  ;;  %v2984_v15 = vsel %vm2976_vm1, %v2739_v26, -inf  ;;  %v2991_v20 = vsel %vm2976_vm1, %v2738_v14, -inf  ;;  %v2755_v40 = vrot.slane %v2741_v59, %v5794_v25  ;;  %v5528_v50 = vpop.f32.mrb[71].mxu1  ;;  %v5644_v59 = vld [vmem:[%s7510_s5 + $0x4] ss:$8 sps:$4 sm:$0xff]  }
 0x320   : > { %v2979_v58 = vmax.f32 %v2977_v36, %v2978_v18  ;;  %v2985_v54 = vrot.slane %v2984_v15, 4  ;;  %v2992_v27 = vrot.slane %v2991_v20, 4  ;;  %v2756_v39 = vcombine.high %v2748_v24, %v2748_v24  ;;  %3848 = vmatprep.subr.bf16.mxu0 %v5644_v59 }
 0x321   : > { %v2998_v8 = vsel %vm2976_vm1, %v2740_v12, -inf  ;;  %v2757_v30 = vcombine.high %v2755_v40, %v2755_v40  ;;  %v3005_v62 = vsel %vm2976_vm1, %v2748_v24, -inf  ;;  %v3019_v5 = vsel %vm2976_vm1, %v2755_v40, -inf }
 0x322   : > { %v2980_v10 = vrot.slane %v2979_v58, 2  ;;  %v2986_v38 = vmax.f32 %v2984_v15, %v2985_v54  ;;  %v2993_v63 = vmax.f32 %v2991_v20, %v2992_v27  ;;  %v2999_v61 = vrot.slane %v2998_v8, 4 }
 0x323   : > { %v3006_v17 = vrot.slane %v3005_v62, 4  ;;  %v3012_v4 = vsel %vm2976_vm1, %v2756_v39, -inf  ;;  %v3020_v34 = vrot.slane %v3019_v5, 4  ;;  %v3026_v33 = vsel %vm2976_vm1, %v2757_v30, -inf }
 0x324   : > { %v2981_v29 = vmax.f32 %v2979_v58, %v2980_v10  ;;  %v2987_v49 = vrot.slane %v2986_v38, 2  ;;  %v2994_v60 = vrot.slane %v2993_v63, 2  ;;  %v3000_v19 = vmax.f32 %v2998_v8, %v2999_v61  ;;  %v2620_v57 = vpop.f32.mrb[72].mxu1 }
 0x325   : > { %v3007_v28 = vmax.f32 %v3005_v62, %v3006_v17  ;;  %v3013_v44 = vrot.slane %v3012_v4, 4  ;;  %v3021_v37 = vmax.f32 %v3019_v5, %v3020_v34  ;;  %v3027_v45 = vrot.slane %v3026_v33, 4  ;;  %v5531_v55 = vpop.f32.mrb[73].mxu1 }
 0x326   : > { %v2982_v56 = vrot.slane %v2981_v29, 1  ;;  %v2988_v43 = vmax.f32 %v2986_v38, %v2987_v49  ;;  %v2995_v52 = vmax.f32 %v2993_v63, %v2994_v60  ;;  %v3001_v6 = vrot.slane %v3000_v19, 2  ;;  %v2622_v53 = vpop.f32.mrb[74].mxu1 }
 0x327   : > { %v3008_v35 = vrot.slane %v3007_v28, 2  ;;  %v3014_v9 = vmax.f32 %v3012_v4, %v3013_v44  ;;  %v3022_v3 = vrot.slane %v3021_v37, 2  ;;  %v3028_v51 = vmax.f32 %v3026_v33, %v3027_v45  ;;  %v5532_v0 = vpop.f32.mrb[75].mxu1 }
 0x328   : > { %v2983_v48 = vmax.f32 %v2981_v29, %v2982_v56  ;;  %v2989_v14 = vrot.slane %v2988_v43, 1  ;;  %v2996_v26 = vrot.slane %v2995_v52, 1  ;;  %v3002_v36 = vmax.f32 %v3000_v19, %v3001_v6 }
 0x329   : > { %v3009_v42 = vmax.f32 %v3007_v28, %v3008_v35  ;;  %v3015_v18 = vrot.slane %v3014_v9, 2  ;;  %v3023_v24 = vmax.f32 %v3021_v37, %v3022_v3  ;;  %v3029_v12 = vrot.slane %v3028_v51, 2 }
 0x32a   : > { %v2990_v15 = vmax.f32 %v2988_v43, %v2989_v14  ;;  %v2997_v20 = vmax.f32 %v2995_v52, %v2996_v26  ;;  %v3003_v40 = vrot.slane %v3002_v36, 1  ;;  %v3313_v50 = vpack.c.bf16 %v2983_v48, %v2983_v48 }
 0x32b   : > { %v3010_v58 = vrot.slane %v3009_v42, 1  ;;  %v3016_v54 = vmax.f32 %v3014_v9, %v3015_v18  ;;  %v3024_v27 = vrot.slane %v3023_v24, 1  ;;  %v3030_v39 = vmax.f32 %v3028_v51, %v3029_v12 }
 0x32c   : > { %v3004_v8 = vmax.f32 %v3002_v36, %v3003_v40  ;;  %v3314_v30 = vpack.c.bf16 %v2990_v15, %v2990_v15  ;;  %v3315_v62 = vpack.c.bf16 %v2997_v20, %v2997_v20  ;;  %v3409_v5 = vunpack.c.l.b16 %v3313_v50  ;;  %v2626_v10 = vpop.f32.mrb[76].mxu1 }
 0x32d   : > { %v3011_v38 = vmax.f32 %v3009_v42, %v3010_v58  ;;  %v3017_v63 = vrot.slane %v3016_v54, 1  ;;  %v3025_v61 = vmax.f32 %v3023_v24, %v3024_v27  ;;  %v3031_v17 = vrot.slane %v3030_v39, 1  ;;  %v5535_v4 = vpop.f32.mrb[77].mxu1 }
 0x32e   : > { %v3316_v34 = vpack.c.bf16 %v3004_v8, %v3004_v8  ;;  %v3410_v33 = vunpack.c.l.b16 %v3314_v30  ;;  %v3411_v29 = vunpack.c.l.b16 %v3315_v62  ;;  %v2690_v49 = vadd.f32 %v6742_v31, %v6753_v2  ;;  %v2629_v60 = vpop.f32.mrb[78].mxu1 }
 0x32f   : > { %v3018_v19 = vmax.f32 %v3016_v54, %v3017_v63  ;;  %v3032_v57 = vmax.f32 %v3030_v39, %v3031_v17  ;;  %v3317_v28 = vpack.c.bf16 %v3011_v38, %v3011_v38  ;;  %v3319_v44 = vpack.c.bf16 %v3025_v61, %v3025_v61  ;;  %v5536_v37 = vpop.f32.mrb[79].mxu1 }
 0x330   : > { %v3412_v45 = vunpack.c.l.b16 %v3316_v34  ;;  %v3457_v55 = vsel %vm2038_vm6, %v3410_v33, %v3409_v5  ;;  %v2702_v56 = vmax.f32 %v2690_v49, 0.0  ;;  %v2672_v43 = vadd.f32 %v6755_v11, %v6694_v46 }
 0x331   : > { %v3458_v52 = vsel %vm2040_vm7, %v3411_v29, %v3457_v55  ;;  %v3318_v6 = vpack.c.bf16 %v3018_v19, %v3018_v19  ;;  %v3320_v53 = vpack.c.bf16 %v3032_v57, %v3032_v57  ;;  %v3413_v35 = vunpack.c.l.b16 %v3317_v28 }
 0x332   : > { %v3415_v9 = vunpack.c.l.b16 %v3319_v44  ;;  %v3459_v2 = vsel %vm2042_vm8, %v3412_v45, %v3458_v52  ;;  %v2758_v3 = vcombine.high %v2702_v56, %v2702_v56  ;;  %v2765_v51 = vrot.slane %v2702_v56, %v5794_v25 }
 0x333   : > { %v6776_v0 = vunpack.c.l.b16 %v3318_v6  ;;  %v3416_v48 = vunpack.c.l.b16 %v3320_v53  ;;  %v6779_v14 = vsel %vm2044_vm9, %v3413_v35, %v3459_v2  ;;  %v2691_v26 = vadd.f32 %v6742_v31, %v2672_v43 }
 0x334   : > { %v2772_v46 = vrot.slane %v2758_v3, %v5794_v25  ;;  %v2773_v11 = vcombine.high %v2765_v51, %v2765_v51  ;;  %v3033_v36 = vsel %vm2976_vm1, %v2765_v51, -inf  ;;  %v2673_v59 = vadd.f32 %v2626_v10, %v6699_v16  ;;  %v6785_v42 = vpop.f32.mrb[80].mxu1 }
 0x335   : > { %v6788_v18 = vsel %vm2048_vm3, %v3416_v48, %v3415_v9  ;;  %v3034_v24 = vrot.slane %v3033_v36, 4  ;;  %v2703_v12 = vmax.f32 %v2691_v26, 0.0  ;;  %v2674_v15 = vadd.f32 %v2629_v60, %v6701_v7  ;;  %v5539_v20 = vpop.f32.mrb[81].mxu1 }
 0x336   : > { %v2774_v40 = vcombine.high %v2772_v46, %v2772_v46  ;;  %v3040_v50 = vsel %vm2976_vm1, %v2773_v11, -inf  ;;  %v3047_v58 = vsel %vm2976_vm1, %v2772_v46, -inf  ;;  %v2692_v54 = vadd.f32 %v6742_v31, %v2673_v59  ;;  %v6794_v27 = vpop.f32.mrb[82].mxu1 }
 0x337   : > { %v3035_v16 = vmax.f32 %v3033_v36, %v3034_v24  ;;  %v3041_v39 = vrot.slane %v3040_v50, 4  ;;  %v3048_v8 = vrot.slane %v3047_v58, 4  ;;  %v2775_v30 = vcombine.high %v2703_v12, %v2703_v12  ;;  %v5540_v62 = vpop.f32.mrb[83].mxu1 }
 0x338   : > { %v3054_v5 = vsel %vm2976_vm1, %v2774_v40, -inf  ;;  %v2782_v10 = vrot.slane %v2703_v12, %v5794_v25  ;;  %v6798_v7 = vmax.f32 %v2692_v54, 0.0  ;;  %v6801_v38 = vadd.f32 %v6742_v31, %v2674_v15 }
 0x339   : > { %v3036_v63 = vrot.slane %v3035_v16, 2  ;;  %v3042_v61 = vmax.f32 %v3040_v50, %v3041_v39  ;;  %v3049_v17 = vmax.f32 %v3047_v58, %v3048_v8  ;;  %v3055_v4 = vrot.slane %v3054_v5, 4 }
 0x33a   : > { %v2789_v34 = vrot.slane %v2775_v30, %v5794_v25  ;;  %v2790_v33 = vcombine.high %v2782_v10, %v2782_v10  ;;  %v3061_v29 = vsel %vm2976_vm1, %v2782_v10, -inf  ;;  %v2792_v49 = vcombine.high %v6798_v7, %v6798_v7 }
 0x33b   : > { %v3037_v60 = vmax.f32 %v3035_v16, %v3036_v63  ;;  %v3043_v19 = vrot.slane %v3042_v61, 2  ;;  %v3050_v57 = vrot.slane %v3049_v17, 2  ;;  %v3056_v28 = vmax.f32 %v3054_v5, %v3055_v4 }
 0x33c   : > { %v2791_v44 = vcombine.high %v2789_v34, %v2789_v34  ;;  %v3062_v37 = vrot.slane %v3061_v29, 4  ;;  %v3068_v45 = vsel %vm2976_vm1, %v2790_v33, -inf  ;;  %v3075_v55 = vsel %vm2976_vm1, %v2789_v34, -inf  ;;  %v2642_v56 = vpop.f32.mrb[84].mxu1 }
 0x33d   : > { %v3038_v43 = vrot.slane %v3037_v60, 1  ;;  %v3044_v52 = vmax.f32 %v3042_v61, %v3043_v19  ;;  %v3051_v6 = vmax.f32 %v3049_v17, %v3050_v57  ;;  %v3057_v53 = vrot.slane %v3056_v28, 2  ;;  %v5543_v35 = vpop.f32.mrb[85].mxu1 }
 0x33e   : > { %v3063_v9 = vmax.f32 %v3061_v29, %v3062_v37  ;;  %v3069_v2 = vrot.slane %v3068_v45, 4  ;;  %v3076_v3 = vrot.slane %v3075_v55, 4  ;;  %v3082_v51 = vsel %vm2976_vm1, %v2791_v44, -inf  ;;  %v2644_v48 = vpop.f32.mrb[86].mxu1 }
 0x33f   : > { %v3039_v26 = vmax.f32 %v3037_v60, %v3038_v43  ;;  %v3045_v46 = vrot.slane %v3044_v52, 1  ;;  %v3052_v11 = vrot.slane %v3051_v6, 1  ;;  %v3058_v36 = vmax.f32 %v3056_v28, %v3057_v53  ;;  %v5544_v59 = vpop.f32.mrb[87].mxu1 }
 0x340   : > { %v3064_v24 = vrot.slane %v3063_v9, 2  ;;  %v3070_v12 = vmax.f32 %v3068_v45, %v3069_v2  ;;  %v3077_v15 = vmax.f32 %v3075_v55, %v3076_v3  ;;  %v3083_v20 = vrot.slane %v3082_v51, 4 }
 0x341   : > { %v3046_v40 = vmax.f32 %v3044_v52, %v3045_v46  ;;  %v3053_v50 = vmax.f32 %v3051_v6, %v3052_v11  ;;  %v3059_v58 = vrot.slane %v3058_v36, 1  ;;  %v3321_v54 = vpack.c.bf16 %v3039_v26, %v3039_v26 }
 0x342   : > { %v3065_v16 = vmax.f32 %v3063_v9, %v3064_v24  ;;  %v3071_v39 = vrot.slane %v3070_v12, 2  ;;  %v3078_v8 = vrot.slane %v3077_v15, 2  ;;  %v3084_v30 = vmax.f32 %v3082_v51, %v3083_v20 }
 0x343   : > { %v3060_v62 = vmax.f32 %v3058_v36, %v3059_v58  ;;  %v3322_v5 = vpack.c.bf16 %v3046_v40, %v3046_v40  ;;  %v3323_v10 = vpack.c.bf16 %v3053_v50, %v3053_v50  ;;  %v3417_v63 = vunpack.c.l.b16 %v3321_v54 }
 0x344   : > { %v3066_v61 = vrot.slane %v3065_v16, 1  ;;  %v3072_v17 = vmax.f32 %v3070_v12, %v3071_v39  ;;  %v3079_v4 = vmax.f32 %v3077_v15, %v3078_v8  ;;  %v3085_v34 = vrot.slane %v3084_v30, 2  ;;  %v6810_v33 = vpop.f32.mrb[88].mxu1 }
 0x345   : > { %v3324_v29 = vpack.c.bf16 %v3060_v62, %v3060_v62  ;;  %v3418_v60 = vunpack.c.l.b16 %v3322_v5  ;;  %v3419_v19 = vunpack.c.l.b16 %v3323_v10  ;;  %v3463_v57 = vsel %vm2050_vm4, %v3417_v63, %v6788_v18  ;;  %v5547_v28 = vpop.f32.mrb[89].mxu1 }
 0x346   : > { %v3067_v44 = vmax.f32 %v3065_v16, %v3066_v61  ;;  %v3073_v37 = vrot.slane %v3072_v17, 1  ;;  %v3080_v45 = vrot.slane %v3079_v4, 1  ;;  %v3086_v55 = vmax.f32 %v3084_v30, %v3085_v34  ;;  %v6814_v56 = vpop.f32.mrb[90].mxu1 }
 0x347   : > { %v3420_v43 = vunpack.c.l.b16 %v3324_v29  ;;  %v3464_v52 = vsel %vm2038_vm6, %v3418_v60, %v3463_v57  ;;  %v2799_v6 = vrot.slane %v6798_v7, %v5794_v25  ;;  %v2806_v53 = vrot.slane %v2792_v49, %v5794_v25  ;;  %v5548_v35 = vpop.f32.mrb[91].mxu1 }
 0x348   : > { %v3465_v9 = vsel %vm2040_vm7, %v3419_v19, %v3464_v52  ;;  %v3074_v2 = vmax.f32 %v3072_v17, %v3073_v37  ;;  %v3081_v18 = vmax.f32 %v3079_v4, %v3080_v45  ;;  %v3087_v3 = vrot.slane %v3086_v55, 1 }
 0x349   : > { %v3325_v51 = vpack.c.bf16 %v3067_v44, %v3067_v44  ;;  %v3466_v48 = vsel %vm2042_vm8, %v3420_v43, %v3465_v9  ;;  %v2807_v26 = vcombine.high %v2799_v6, %v2799_v6  ;;  %v2808_v46 = vcombine.high %v2806_v53, %v2806_v53 }
 0x34a   : > { %v3088_v11 = vmax.f32 %v3086_v55, %v3087_v3  ;;  %v3326_v36 = vpack.c.bf16 %v3074_v2, %v3074_v2  ;;  %v3327_v59 = vpack.c.bf16 %v3081_v18, %v3081_v18  ;;  %v3089_v24 = vsel %vm2976_vm1, %v2799_v6, -inf }
 0x34b   : > { %v3421_v12 = vunpack.c.l.b16 %v3325_v51  ;;  %v3090_v7 = vrot.slane %v3089_v24, 4  ;;  %v3096_v49 = vsel %vm2976_vm1, %v2807_v26, -inf  ;;  %v3103_v15 = vsel %vm2976_vm1, %v2806_v53, -inf }
 0x34c   : > { %v3328_v20 = vpack.c.bf16 %v3088_v11, %v3088_v11  ;;  %v6825_v40 = vunpack.c.l.b16 %v3326_v36  ;;  %v6827_v50 = vunpack.c.l.b16 %v3327_v59  ;;  %v3097_v58 = vrot.slane %v3096_v49, 4  ;;  %v6829_v54 = vpop.f32.mrb[92].mxu1 }
 0x34d   : > { %v6832_v16 = vsel %vm2044_vm9, %v3421_v12, %v3466_v48  ;;  %v3091_v39 = vmax.f32 %v3089_v24, %v3090_v7  ;;  %v3104_v8 = vrot.slane %v3103_v15, 4  ;;  %v3110_v30 = vsel %vm2976_vm1, %v2808_v46, -inf  ;;  %v5551_v62 = vpop.f32.mrb[93].mxu1 }
 0x34e   : > { %v6835_v5 = vunpack.c.l.b16 %v3328_v20  ;;  %v3098_v10 = vmax.f32 %v3096_v49, %v3097_v58  ;;  %v3111_v63 = vrot.slane %v3110_v30, 4  ;;  %v2705_v61 = vmax.f32 %v6801_v38, 0.0  ;;  %v6838_v17 = vpop.f32.mrb[94].mxu1 }
 0x34f   : > { %v3092_v4 = vrot.slane %v3091_v39, 2  ;;  %v3105_v34 = vmax.f32 %v3103_v15, %v3104_v8  ;;  %v2675_v29 = vadd.f32 %v6785_v42, %v6712_v41  ;;  %v2676_v60 = vadd.f32 %v6794_v27, %v6717_v13  ;;  %v5552_v19 = vpop.f32.mrb[95].mxu1 }
 0x350   : > { %v3099_v57 = vrot.slane %v3098_v10, 2  ;;  %v3112_v28 = vmax.f32 %v3110_v30, %v3111_v63  ;;  %v2809_v44 = vcombine.high %v2705_v61, %v2705_v61  ;;  %v2816_v37 = vrot.slane %v2705_v61, %v5794_v25 }
 0x351   : > { %v3093_v45 = vmax.f32 %v3091_v39, %v3092_v4  ;;  %v3106_v55 = vrot.slane %v3105_v34, 2  ;;  %v2694_v38 = vadd.f32 %v6742_v31, %v2675_v29  ;;  %v2695_v43 = vadd.f32 %v6742_v31, %v2676_v60 }
 0x352   : > { %v3100_v52 = vmax.f32 %v3098_v10, %v3099_v57  ;;  %v3113_v6 = vrot.slane %v3112_v28, 2  ;;  %v2823_v53 = vrot.slane %v2809_v44, %v5794_v25  ;;  %v2824_v41 = vcombine.high %v2816_v37, %v2816_v37 }
 0x353   : > { %v3094_v42 = vrot.slane %v3093_v45, 1  ;;  %v3107_v35 = vmax.f32 %v3105_v34, %v3106_v55  ;;  %v3117_v13 = vsel %vm2976_vm1, %v2816_v37, -inf  ;;  %v2706_v27 = vmax.f32 %v2694_v38, 0.0 }
 0x354   : > { %v3101_v9 = vrot.slane %v3100_v52, 1  ;;  %v3114_v2 = vmax.f32 %v3112_v28, %v3113_v6  ;;  %v2825_v18 = vcombine.high %v2823_v53, %v2823_v53  ;;  %v3118_v3 = vrot.slane %v3117_v13, 4  ;;  %v2664_v51 = vpop.f32.mrb[96].mxu1 }
 0x355   : > { %v3095_v48 = vmax.f32 %v3093_v45, %v3094_v42  ;;  %v3108_v26 = vrot.slane %v3107_v35, 1  ;;  %v3124_v46 = vsel %vm2976_vm1, %v2824_v41, -inf  ;;  %v3131_v11 = vsel %vm2976_vm1, %v2823_v53, -inf  ;;  %v5555_v36 = vpop.f32.mrb[97].mxu1 }
 0x356   : > { %v3102_v59 = vmax.f32 %v3100_v52, %v3101_v9  ;;  %v3115_v24 = vrot.slane %v3114_v2, 1  ;;  %v3119_v12 = vmax.f32 %v3117_v13, %v3118_v3  ;;  %v3125_v7 = vrot.slane %v3124_v46, 4  ;;  %v2666_v49 = vpop.f32.mrb[98].mxu1 }
 0x357   : > { %v3109_v15 = vmax.f32 %v3107_v35, %v3108_v26  ;;  %v3329_v20 = vpack.c.bf16 %v3095_v48, %v3095_v48  ;;  %v3132_v58 = vrot.slane %v3131_v11, 4  ;;  %v3138_v39 = vsel %vm2976_vm1, %v2825_v18, -inf  ;;  %v5556_v8 = vpop.f32.mrb[99].mxu1 }
 0x358   : > { %v3116_v30 = vmax.f32 %v3114_v2, %v3115_v24  ;;  %v3330_v62 = vpack.c.bf16 %v3102_v59, %v3102_v59  ;;  %v3120_v10 = vrot.slane %v3119_v12, 2  ;;  %v3126_v63 = vmax.f32 %v3124_v46, %v3125_v7 }
 0x359   : > { %v3331_v61 = vpack.c.bf16 %v3109_v15, %v3109_v15  ;;  %v3425_v4 = vunpack.c.l.b16 %v3329_v20  ;;  %v3133_v34 = vmax.f32 %v3131_v11, %v3132_v58  ;;  %v3139_v29 = vrot.slane %v3138_v39, 4 }
 0x35a   : > { %v3332_v60 = vpack.c.bf16 %v3116_v30, %v3116_v30  ;;  %v3426_v19 = vunpack.c.l.b16 %v3330_v62  ;;  %v3121_v57 = vmax.f32 %v3119_v12, %v3120_v10  ;;  %v3127_v28 = vrot.slane %v3126_v63, 2 }
 0x35b   : > { %v6852_v44 = vunpack.c.l.b16 %v3331_v61  ;;  %v3134_v37 = vrot.slane %v3133_v34, 2  ;;  %v3140_v45 = vmax.f32 %v3138_v39, %v3139_v29  ;;  %v2826_v55 = vcombine.high %v2706_v27, %v2706_v27 }
 0x35c   : > { %v6854_v38 = vunpack.c.l.b16 %v3332_v60  ;;  %v6857_v52 = vsel %vm2038_vm6, %v3426_v19, %v3425_v4  ;;  %v3122_v6 = vrot.slane %v3121_v57, 1  ;;  %v3128_v53 = vmax.f32 %v3126_v63, %v3127_v28 }
 0x35d   : > { %v3135_v41 = vmax.f32 %v3133_v34, %v3134_v37  ;;  %v3141_v42 = vrot.slane %v3140_v45, 2  ;;  %v2833_v35 = vrot.slane %v2706_v27, %v5794_v25  ;;  %v2840_v13 = vrot.slane %v2826_v55, %v5794_v25 }
 0x35e   : > { %v3123_v9 = vmax.f32 %v3121_v57, %v3122_v6  ;;  %v3129_v2 = vrot.slane %v3128_v53, 1  ;;  %v2707_v18 = vmax.f32 %v2695_v43, 0.0  ;;  %v2677_v3 = vadd.f32 %v6810_v33, %v6731_v21 }
 0x35f   : > { %v3136_v51 = vrot.slane %v3135_v41, 1  ;;  %v3142_v48 = vmax.f32 %v3140_v45, %v3141_v42  ;;  %v2841_v26 = vcombine.high %v2833_v35, %v2833_v35  ;;  %v2842_v46 = vcombine.high %v2840_v13, %v2840_v13 }
 0x360   : > { %v3130_v11 = vmax.f32 %v3128_v53, %v3129_v2  ;;  %v3333_v36 = vpack.c.bf16 %v3123_v9, %v3123_v9  ;;  %v3145_v59 = vsel %vm2976_vm1, %v2833_v35, -inf  ;;  %v3159_v24 = vsel %vm2976_vm1, %v2840_v13, -inf }
 0x361   : > { %v3137_v12 = vmax.f32 %v3135_v41, %v3136_v51  ;;  %v3143_v27 = vrot.slane %v3142_v48, 1  ;;  %v3146_v7 = vrot.slane %v3145_v59, 4  ;;  %v3152_v49 = vsel %vm2976_vm1, %v2841_v26, -inf }
 0x362   : > { %v3334_v15 = vpack.c.bf16 %v3130_v11, %v3130_v11  ;;  %v6866_v43 = vunpack.c.l.b16 %v3333_v36  ;;  %v3153_v20 = vrot.slane %v3152_v49, 4  ;;  %v3160_v21 = vrot.slane %v3159_v24, 4 }
 0x363   : > { %v3144_v33 = vmax.f32 %v3142_v48, %v3143_v27  ;;  %v3335_v58 = vpack.c.bf16 %v3137_v12, %v3137_v12  ;;  %v3147_v39 = vmax.f32 %v3145_v59, %v3146_v7  ;;  %v3166_v8 = vsel %vm2976_vm1, %v2842_v46, -inf }
 0x364   : > { %v6869_v30 = vunpack.c.l.b16 %v3334_v15  ;;  %v3154_v62 = vmax.f32 %v3152_v49, %v3153_v20  ;;  %v3161_v10 = vmax.f32 %v3159_v24, %v3160_v21  ;;  %v3167_v63 = vrot.slane %v3166_v8, 4 }
 0x365   : > { %v3336_v61 = vpack.c.bf16 %v3144_v33, %v3144_v33  ;;  %v3431_v4 = vunpack.c.l.b16 %v3335_v58  ;;  %v3148_v34 = vrot.slane %v3147_v39, 2  ;;  %v2843_v29 = vcombine.high %v2707_v18, %v2707_v18 }
 0x366   : > { %v3155_v60 = vrot.slane %v3154_v62, 2  ;;  %v3162_v19 = vrot.slane %v3161_v10, 2  ;;  %v3168_v57 = vmax.f32 %v3166_v8, %v3167_v63  ;;  %v2850_v28 = vrot.slane %v2707_v18, %v5794_v25 }
 0x367   : > { %v3432_v37 = vunpack.c.l.b16 %v3336_v61  ;;  %v3149_v45 = vmax.f32 %v3147_v39, %v3148_v34  ;;  %v2857_v55 = vrot.slane %v2843_v29, %v5794_v25  ;;  %v2696_v6 = vadd.f32 %v6742_v31, %v2677_v3 }
 0x368   : > { %v3156_v53 = vmax.f32 %v3154_v62, %v3155_v60  ;;  %v3163_v41 = vmax.f32 %v3161_v10, %v3162_v19  ;;  %v3169_v42 = vrot.slane %v3168_v57, 2  ;;  %v2858_v35 = vcombine.high %v2850_v28, %v2850_v28 }
 0x369   : > { %v3475_v13 = vsel %vm2048_vm3, %v3432_v37, %v3431_v4  ;;  %v3150_v9 = vrot.slane %v3149_v45, 1  ;;  %v2859_v2 = vcombine.high %v2857_v55, %v2857_v55  ;;  %v3173_v51 = vsel %vm2976_vm1, %v2850_v28, -inf }
 0x36a   : > { %v3157_v48 = vrot.slane %v3156_v53, 1  ;;  %v3164_v26 = vrot.slane %v3163_v41, 1  ;;  %v3170_v46 = vmax.f32 %v3168_v57, %v3169_v42  ;;  %v3174_v18 = vrot.slane %v3173_v51, 4 }
 0x36b   : > { %v3151_v11 = vmax.f32 %v3149_v45, %v3150_v9  ;;  %v3180_v36 = vsel %vm2976_vm1, %v2858_v35, -inf  ;;  %v3187_v59 = vsel %vm2976_vm1, %v2857_v55, -inf  ;;  %v3194_v3 = vsel %vm2976_vm1, %v2859_v2, -inf }
 0x36c   : > { %v3158_v24 = vmax.f32 %v3156_v53, %v3157_v48  ;;  %v3165_v12 = vmax.f32 %v3163_v41, %v3164_v26  ;;  %v3171_v27 = vrot.slane %v3170_v46, 1  ;;  %v3175_v7 = vmax.f32 %v3173_v51, %v3174_v18 }
 0x36d   : > { %v3337_v49 = vpack.c.bf16 %v3151_v11, %v3151_v11  ;;  %v3181_v15 = vrot.slane %v3180_v36, 4  ;;  %v3188_v20 = vrot.slane %v3187_v59, 4  ;;  %v3195_v21 = vrot.slane %v3194_v3, 4 }
 0x36e   : > { %v3172_v33 = vmax.f32 %v3170_v46, %v3171_v27  ;;  %v3338_v58 = vpack.c.bf16 %v3158_v24, %v3158_v24  ;;  %v3339_v39 = vpack.c.bf16 %v3165_v12, %v3165_v12  ;;  %v3176_v8 = vrot.slane %v3175_v7, 2 }
 0x36f   : > { %v3433_v62 = vunpack.c.l.b16 %v3337_v49  ;;  %v3182_v10 = vmax.f32 %v3180_v36, %v3181_v15  ;;  %v3189_v63 = vmax.f32 %v3187_v59, %v3188_v20  ;;  %v3196_v61 = vmax.f32 %v3194_v3, %v3195_v21 }
 0x370   : > { %v3340_v4 = vpack.c.bf16 %v3172_v33, %v3172_v33  ;;  %v3434_v34 = vunpack.c.l.b16 %v3338_v58  ;;  %v6879_v29 = vunpack.c.l.b16 %v3339_v39  ;;  %v3177_v60 = vmax.f32 %v3175_v7, %v3176_v8 }
 0x371   : > { %v3476_v19 = vsel %vm2050_vm4, %v3433_v62, %v3475_v13  ;;  %v3183_v57 = vrot.slane %v3182_v10, 2  ;;  %v3190_v28 = vrot.slane %v3189_v63, 2  ;;  %v3197_v37 = vrot.slane %v3196_v61, 2 }
 0x372   : > { %v6882_v45 = vunpack.c.l.b16 %v3340_v4  ;;  %v6885_v55 = vsel %vm2038_vm6, %v3434_v34, %v3476_v19  ;;  %v3178_v53 = vrot.slane %v3177_v60, 1  ;;  %v2708_v41 = vmax.f32 %v2696_v6, 0.0 }
 0x373   : > { %v3184_v42 = vmax.f32 %v3182_v10, %v3183_v57  ;;  %v3191_v35 = vmax.f32 %v3189_v63, %v3190_v28  ;;  %v3198_v9 = vmax.f32 %v3196_v61, %v3197_v37  ;;  %v2678_v2 = vadd.f32 %v6814_v56, %v6733_v1 }
 0x374   : > { %v3179_v51 = vmax.f32 %v3177_v60, %v3178_v53  ;;  %v2860_v48 = vcombine.high %v2708_v41, %v2708_v41  ;;  %v2867_v13 = vrot.slane %v2708_v41, %v5794_v25  ;;  %v3461_v26 = vsel %vm2046_vm10, %v6776_v0, %v6779_v14 }
 0x375   : > { %v3185_v46 = vrot.slane %v3184_v42, 1  ;;  %v3192_v18 = vrot.slane %v3191_v35, 1  ;;  %v3199_v11 = vrot.slane %v3198_v9, 1  ;;  %v2697_v36 = vadd.f32 %v6742_v31, %v2678_v2 }
 0x376   : > { %v3341_v6 = vpack.c.bf16 %v3179_v51, %v3179_v51  ;;  %v2874_v59 = vrot.slane %v2860_v48, %v5794_v25  ;;  %v2875_v3 = vcombine.high %v2867_v13, %v2867_v13  ;;  %v3201_v24 = vsel %vm2976_vm1, %v2867_v13, -inf }
 0x377   : > { %v3186_v1 = vmax.f32 %v3184_v42, %v3185_v46  ;;  %v3193_v56 = vmax.f32 %v3191_v35, %v3192_v18  ;;  %v6896_v12 = vmax.f32 %v3198_v9, %v3199_v11  ;;  %v3202_v27 = vrot.slane %v3201_v24, 4 }
 0x378   : > { %v6898_v7 = vunpack.c.l.b16 %v3341_v6  ;;  %v2876_v49 = vcombine.high %v2874_v59, %v2874_v59  ;;  %v3208_v0 = vsel %vm2976_vm1, %v2875_v3, -inf  ;;  %v3215_v14 = vsel %vm2976_vm1, %v2874_v59, -inf }
 0x379   : > { %v3342_v15 = vpack.c.bf16 %v3186_v1, %v3186_v1  ;;  %v3343_v20 = vpack.c.bf16 %v3193_v56, %v3193_v56  ;;  %v3203_v21 = vmax.f32 %v3201_v24, %v3202_v27  ;;  %v3209_v33 = vrot.slane %v3208_v0, 4 }
 0x37a   : > { %v3216_v58 = vrot.slane %v3215_v14, 4  ;;  %v3222_v39 = vsel %vm2976_vm1, %v2876_v49, -inf  ;;  %v2709_v8 = vmax.f32 %v2697_v36, 0.0  ;;  %v3468_v62 = vsel %vm2046_vm10, %v6825_v40, %v6832_v16 }
 0x37b   : > { %v6906_v10 = vunpack.c.l.b16 %v3342_v15  ;;  %v6908_v63 = vunpack.c.l.b16 %v3343_v20  ;;  %v3204_v61 = vrot.slane %v3203_v21, 2  ;;  %v3210_v4 = vmax.f32 %v3208_v0, %v3209_v33 }
 0x37c   : > { %v3217_v34 = vmax.f32 %v3215_v14, %v3216_v58  ;;  %v3223_v60 = vrot.slane %v3222_v39, 4  ;;  %v2877_v19 = vcombine.high %v2709_v8, %v2709_v8  ;;  %v2884_v57 = vrot.slane %v2709_v8, %v5794_v25 }
 0x37d   : > { %v3205_v28 = vmax.f32 %v3203_v21, %v3204_v61  ;;  %v3211_v37 = vrot.slane %v3210_v4, 2  ;;  %v3469_v53 = vsel %vm2048_vm3, %v6835_v5, %v6827_v50  ;;  %v6914_v41 = vpack.c.b16 %v3468_v62, %v3461_v26 }
 0x37e   : > { %v3218_v40 = vrot.slane %v3217_v34, 2  ;;  %v3224_v16 = vmax.f32 %v3222_v39, %v3223_v60  ;;  %v2891_v42 = vrot.slane %v2877_v19, %v5794_v25  ;;  %v2892_v35 = vcombine.high %v2884_v57, %v2884_v57 }
 0x37f   : > { %v3206_v9 = vrot.slane %v3205_v28, 1  ;;  %v3212_v2 = vmax.f32 %v3210_v4, %v3211_v37  ;;  %v3229_v51 = vsel %vm2976_vm1, %v2884_v57, -inf  ;;  %v6918_v48 = vpack.c.b16 %v3469_v53, %v3469_v53 }
 0x380   : > { %v3219_v13 = vmax.f32 %v3217_v34, %v3218_v40  ;;  %v3225_v46 = vrot.slane %v3224_v16, 2  ;;  %v2893_v18 = vcombine.high %v2891_v42, %v2891_v42  ;;  %v3230_v11 = vrot.slane %v3229_v51, 4 }
 0x381   : > { %v3207_v36 = vmax.f32 %v3205_v28, %v3206_v9  ;;  %v3213_v6 = vrot.slane %v3212_v2, 1  ;;  %v3236_v50 = vsel %vm2976_vm1, %v2892_v35, -inf  ;;  %v3243_v5 = vsel %vm2976_vm1, %v2891_v42, -inf }
 0x382   : > { %v3220_v26 = vrot.slane %v3219_v13, 1  ;;  %v3226_v59 = vmax.f32 %v3224_v16, %v3225_v46  ;;  %v3231_v3 = vmax.f32 %v3229_v51, %v3230_v11  ;;  %v3237_v24 = vrot.slane %v3236_v50, 4 }
 0x383   : > { %v3214_v1 = vmax.f32 %v3212_v2, %v3213_v6  ;;  %v3345_v56 = vpack.c.bf16 %v3207_v36, %v3207_v36  ;;  %v3244_v27 = vrot.slane %v3243_v5, 4  ;;  %v3250_v49 = vsel %vm2976_vm1, %v2893_v18, -inf }
 0x384   : > { %v3221_v0 = vmax.f32 %v3219_v13, %v3220_v26  ;;  %v3227_v14 = vrot.slane %v3226_v59, 1  ;;  %v3232_v15 = vrot.slane %v3231_v3, 2  ;;  %v3238_v20 = vmax.f32 %v3236_v50, %v3237_v24 }
 0x385   : > { %v3346_v21 = vpack.c.bf16 %v3214_v1, %v3214_v1  ;;  %v3441_v33 = vunpack.c.l.b16 %v3345_v56  ;;  %v3245_v58 = vmax.f32 %v3243_v5, %v3244_v27  ;;  %v3251_v39 = vrot.slane %v3250_v49, 4 }
 0x386   : > { %v3228_v8 = vmax.f32 %v3226_v59, %v3227_v14  ;;  %v3347_v62 = vpack.c.bf16 %v3221_v0, %v3221_v0  ;;  %v3233_v61 = vmax.f32 %v3231_v3, %v3232_v15  ;;  %v3239_v4 = vrot.slane %v3238_v20, 2 }
 0x387   : > { %v3442_v34 = vunpack.c.l.b16 %v3346_v21  ;;  %v3246_v60 = vrot.slane %v3245_v58, 2  ;;  %v3252_v19 = vmax.f32 %v3250_v49, %v3251_v39  ;;  %v6925_v57 = vsel %vm2135_vm12, 0, %v6914_v41 }
 0x388   : > { %v3348_v28 = vpack.c.bf16 %v3228_v8, %v3228_v8  ;;  %v6927_v37 = vunpack.c.l.b16 %v3347_v62  ;;  %v3234_v53 = vrot.slane %v3233_v61, 1  ;;  %v3240_v40 = vmax.f32 %v3238_v20, %v3239_v4 }
 0x389   : > { %v6930_v16 = vsel %vm2038_vm6, %v3442_v34, %v3441_v33  ;;  %v3247_v42 = vmax.f32 %v3245_v58, %v3246_v60  ;;  %v3253_v35 = vrot.slane %v3252_v19, 2  ;;  %v6934_v9 = vsel %vm2135_vm12, %v6918_v48, 0 }
 0x38a   : > { %v6936_v2 = vunpack.c.l.b16 %v3348_v28  ;;  %v3235_v51 = vmax.f32 %v3233_v61, %v3234_v53  ;;  %v3241_v13 = vrot.slane %v3240_v40, 1  ;;  %v3553_v46 = vshrl.u32 %v6925_v57, 16  ;;  %v5645_v28 = vld [vmem:[%s7510_s5 + $0x10] ss:$8 sps:$4 sm:$0xff]  }
 0x38b   : > { %v3248_v18 = vrot.slane %v3247_v42, 1  ;;  %v3254_v11 = vmax.f32 %v3252_v19, %v3253_v35  ;;  %v3555_v36 = vshll.u32 %v6925_v57, 16  ;;  %v3559_v6 = vshll.u32 %v6934_v9, 16 }
 0x38c   : > { %v3242_v50 = vmax.f32 %v3240_v40, %v3241_v13  ;;  %v3349_v5 = vpack.c.bf16 %v3235_v51, %v3235_v51  ;;  %v2679_v26 = vadd.f32 %v6829_v54, %v6735_v47  ;;  %v2680_v59 = vadd.f32 %v6838_v17, %v6737_v22  ;;  %v5642_v47 = vld [vmem:[%s7510_s5] ss:$8 sps:$4 sm:$0xff]  }
 0x38d   : > { %v3249_v3 = vmax.f32 %v3247_v42, %v3248_v18  ;;  %v3255_v24 = vrot.slane %v3254_v11, 1  ;;  %v3557_v1 = vrot.slane %v3555_v36, 1  ;;  %v6945_v56 = vrot.slane %v3559_v6, 1 }
 0x38e   : > { %v3350_v27 = vpack.c.bf16 %v3242_v50, %v3242_v50  ;;  %v6947_v49 = vunpack.c.l.b16 %v3349_v5  ;;  %v2698_v0 = vadd.f32 %v6742_v31, %v2679_v26  ;;  %v2699_v14 = vadd.f32 %v6742_v31, %v2680_v59  ;;  %v5647_v31 = vld [vmem:[%s7510_s5 + $0x14] ss:$8 sps:$4 sm:$0xff]   ;;  %v5648_v59 = vld [vmem:[%s7510_s5 + $0x20] ss:$8 sps:$4 sm:$0xff]  }
 0x38f   : > { %v3256_v15 = vmax.f32 %v3254_v11, %v3255_v24  ;;  %v3351_v20 = vpack.c.bf16 %v3249_v3, %v3249_v3  ;;  %v3558_v21 = vor.u32 %v3557_v1, %v3553_v46  ;;  %v3471_v22 = vsel %vm2040_vm7, %v6852_v44, %v6857_v52 }
 0x390   : > { %v6957_v54 = vunpack.c.l.b16 %v3350_v27  ;;  %v2710_v17 = vmax.f32 %v2698_v0, 0.0  ;;  %v2711_v33 = vmax.f32 %v2699_v14, 0.0  ;;  %v3472_v58 = vsel %vm2042_vm8, %v6854_v38, %v3471_v22  ;;  %v5653_v0 = vld [vmem:[%s7510_s5 + $0x34] ss:$8 sps:$4 sm:$0xff]  }
 0x391   : > { %v3352_v39 = vpack.c.bf16 %v3256_v15, %v3256_v15  ;;  %v3447_v8 = vunpack.c.l.b16 %v3351_v20  ;;  %v3562_v62 = vsel %vm2158_vm14, %v3558_v21, %v6945_v56  ;;  %v3473_v61 = vsel %vm2044_vm9, %v6866_v43, %v3472_v58 }
 0x392   : > { %3714 = vmatmul.mubr.bf16.vlgmr.msra.gmra.mrb[32].mxu0 %v3562_v62  ;;  %v2894_v44 = vcombine.high %v2710_v17, %v2710_v17  ;;  %v2901_v52 = vrot.slane %v2710_v17, %v5794_v25  ;;  %v2911_v4 = vcombine.high %v2711_v33, %v2711_v33  ;;  %v2918_v34 = vrot.slane %v2711_v33, %v5794_v25  ;;  %v5651_v62 = vld [vmem:[%s7510_s5 + $0x30] ss:$8 sps:$4 sm:$0xff]  }
 0x393   : > { %v3448_v38 = vunpack.c.l.b16 %v3352_v39  ;;  %3723 = vmatprep.mubr.bf16.mxu0 %v5704_v32  ;;  %v6973_v60 = vsel %vm2046_vm10, %v6869_v30, %v3473_v61  ;;  %v6978_v19 = vsel %vm2040_vm7, %v6879_v29, %v6885_v55  ;;  %v3563_v43 = vshrl.u32 %v6934_v9, 16  ;;  %3849 = vmatpush1.bf16.msra.mxu0 %v5642_v47  ;;  %v5650_v29 = vld [vmem:[%s7510_s5 + $0x24] ss:$8 sps:$4 sm:$0xff]  }
 0x394   : > { %v2908_v53 = vrot.slane %v2894_v44, %v5794_v25  ;;  %v2909_v40 = vcombine.high %v2901_v52, %v2901_v52  ;;  %v3257_v42 = vsel %vm2976_vm1, %v2901_v52, -inf  ;;  %v2925_v30 = vrot.slane %v2911_v4, %v5794_v25  ;;  %3850 = vmatprep.subr.bf16.mxu0 %v5647_v31 }
 0x395   : > { %v6991_v55 = vsel %vm2048_vm3, %v3448_v38, %v3447_v8  ;;  %v3258_v35 = vrot.slane %v3257_v42, 4  ;;  %v2926_v51 = vcombine.high %v2918_v34, %v2918_v34  ;;  %v3285_v13 = vsel %vm2976_vm1, %v2918_v34, -inf  ;;  %v5656_v34 = vld [vmem:[%s7510_s5 + $0x44] ss:$8 sps:$4 sm:$0xff]  }
 0x396   : > { %v2910_v46 = vcombine.high %v2908_v53, %v2908_v53  ;;  %v3264_v18 = vsel %vm2976_vm1, %v2909_v40, -inf  ;;  %v3271_v11 = vsel %vm2976_vm1, %v2908_v53, -inf  ;;  %v2927_v36 = vcombine.high %v2925_v30, %v2925_v30 }
 0x397   : > { %v3259_v6 = vmax.f32 %v3257_v42, %v3258_v35  ;;  %v3265_v50 = vrot.slane %v3264_v18, 4  ;;  %v3272_v5 = vrot.slane %v3271_v11, 4  ;;  %v3286_v26 = vrot.slane %v3285_v13, 4  ;;  %3851 = vmatpush1.bf16.msra.mxu0 %v5645_v28 }
 0x398   : > { %v3278_v3 = vsel %vm2976_vm1, %v2910_v46, -inf  ;;  %v3292_v24 = vsel %vm2976_vm1, %v2926_v51, -inf  ;;  %v3299_v1 = vsel %vm2976_vm1, %v2925_v30, -inf  ;;  %v3306_v27 = vsel %vm2976_vm1, %v2927_v36, -inf  ;;  %3852 = vmatprep.subr.bf16.mxu0 %v5650_v29 }
 0x399   : > { %v3260_v14 = vrot.slane %v3259_v6, 2  ;;  %v3266_v15 = vmax.f32 %v3264_v18, %v3265_v50  ;;  %v3273_v20 = vmax.f32 %v3271_v11, %v3272_v5  ;;  %v3279_v21 = vrot.slane %v3278_v3, 4  ;;  %v5654_v11 = vld [vmem:[%s7510_s5 + $0x40] ss:$8 sps:$4 sm:$0xff]  }
 0x39a   : > { %v3287_v47 = vmax.f32 %v3285_v13, %v3286_v26  ;;  %v3293_v22 = vrot.slane %v3292_v24, 4  ;;  %v3300_v17 = vrot.slane %v3299_v1, 4  ;;  %v3307_v33 = vrot.slane %v3306_v27, 4  ;;  %v5659_v26 = vld [vmem:[%s7510_s5 + $0x54] ss:$8 sps:$4 sm:$0xff]  }
 0x39b   : > { %v3261_v58 = vmax.f32 %v3259_v6, %v3260_v14  ;;  %v3267_v31 = vrot.slane %v3266_v15, 2  ;;  %v3274_v39 = vrot.slane %v3273_v20, 2  ;;  %v3280_v8 = vmax.f32 %v3278_v3, %v3279_v21  ;;  %3853 = vmatpush1.bf16.msra.mxu0 %v5648_v59 }
 0x39c   : > { %v3288_v61 = vrot.slane %v3287_v47, 2  ;;  %v3294_v44 = vmax.f32 %v3292_v24, %v3293_v22  ;;  %v3301_v52 = vmax.f32 %v3299_v1, %v3300_v17  ;;  %v3308_v4 = vmax.f32 %v3306_v27, %v3307_v33  ;;  %3854 = vmatprep.subr.bf16.mxu0 %v5653_v0  ;;  %v5657_v17 = vld [vmem:[%s7510_s5 + $0x50] ss:$8 sps:$4 sm:$0xff]  }
 0x39d   : > { %v3262_v38 = vrot.slane %v3261_v58, 1  ;;  %v3268_v28 = vmax.f32 %v3266_v15, %v3267_v31  ;;  %v3275_v53 = vmax.f32 %v3273_v20, %v3274_v39  ;;  %v3281_v40 = vrot.slane %v3280_v8, 2 }
 0x39e   : > { %v3289_v42 = vmax.f32 %v3287_v47, %v3288_v61  ;;  %v3295_v30 = vrot.slane %v3294_v44, 2  ;;  %v3302_v29 = vrot.slane %v3301_v52, 2  ;;  %v3309_v35 = vrot.slane %v3308_v4, 2 }
 0x39f   : > { %v3263_v51 = vmax.f32 %v3261_v58, %v3262_v38  ;;  %v3269_v13 = vrot.slane %v3268_v28, 1  ;;  %v3276_v46 = vrot.slane %v3275_v53, 1  ;;  %v3282_v18 = vmax.f32 %v3280_v8, %v3281_v40  ;;  %3855 = vmatpush1.bf16.msra.mxu0 %v5651_v62  ;;  %v5662_v8 = vld [vmem:[%s7510_s5 + $0x64] ss:$8 sps:$4 sm:$0xff]  }
 0x3a0   : > { %v3290_v36 = vrot.slane %v3289_v42, 1  ;;  %v3296_v6 = vmax.f32 %v3294_v44, %v3295_v30  ;;  %v3303_v50 = vmax.f32 %v3301_v52, %v3302_v29  ;;  %v3310_v5 = vmax.f32 %v3308_v4, %v3309_v35  ;;  %3856 = vmatprep.subr.bf16.mxu0 %v5656_v34 }
 0x3a1   : > { %v3270_v59 = vmax.f32 %v3268_v28, %v3269_v13  ;;  %v3277_v3 = vmax.f32 %v3275_v53, %v3276_v46  ;;  %v3283_v24 = vrot.slane %v3282_v18, 1  ;;  %v3353_v1 = vpack.c.bf16 %v3263_v51, %v3263_v51 }
 0x3a2   : > { %v3291_v27 = vmax.f32 %v3289_v42, %v3290_v36  ;;  %v3297_v0 = vrot.slane %v3296_v6, 1  ;;  %v3304_v14 = vrot.slane %v3303_v50, 1  ;;  %v3311_v15 = vrot.slane %v3310_v5, 1 }
 0x3a3   : > { %v3284_v20 = vmax.f32 %v3282_v18, %v3283_v24  ;;  %v3354_v21 = vpack.c.bf16 %v3270_v59, %v3270_v59  ;;  %v3355_v47 = vpack.c.bf16 %v3277_v3, %v3277_v3  ;;  %v3449_v22 = vunpack.c.l.b16 %v3353_v1  ;;  %3857 = vmatpush1.bf16.msra.mxu0 %v5654_v11 }
 0x3a4   : > { %v3298_v33 = vmax.f32 %v3296_v6, %v3297_v0  ;;  %v3305_v58 = vmax.f32 %v3303_v50, %v3304_v14  ;;  %v3312_v31 = vmax.f32 %v3310_v5, %v3311_v15  ;;  %v3357_v39 = vpack.c.bf16 %v3291_v27, %v3291_v27  ;;  %3858 = vmatprep.subr.bf16.mxu0 %v5659_v26 }
 0x3a5   : > { %v3356_v62 = vpack.c.bf16 %v3284_v20, %v3284_v20  ;;  %v3450_v61 = vunpack.c.l.b16 %v3354_v21  ;;  %v3451_v44 = vunpack.c.l.b16 %v3355_v47  ;;  %v3489_v52 = vsel %vm2050_vm4, %v3449_v22, %v6991_v55  ;;  %v5660_v55 = vld [vmem:[%s7510_s5 + $0x60] ss:$8 sps:$4 sm:$0xff]  }
 0x3a6   : > { %v3358_v4 = vpack.c.bf16 %v3298_v33, %v3298_v33  ;;  %v3359_v34 = vpack.c.bf16 %v3305_v58, %v3305_v58  ;;  %v3453_v38 = vunpack.c.l.b16 %v3357_v39  ;;  %v3479_v28 = vsel %vm2042_vm8, %v6882_v45, %v6978_v19 }
 0x3a7   : > { %v3452_v53 = vunpack.c.l.b16 %v3356_v62  ;;  %v3490_v40 = vsel %vm2038_vm6, %v3450_v61, %v3489_v52  ;;  %v3480_v42 = vsel %vm2044_vm9, %v6898_v7, %v3479_v28  ;;  %v3565_v30 = vor.u32 %v3563_v43, %v6945_v56  ;;  %3859 = vmatpush1.bf16.msra.mxu0 %v5657_v17  ;;  %v5665_v7 = vld [vmem:[%s7510_s5 + $0x74] ss:$8 sps:$4 sm:$0xff]  }
 0x3a8   : > { %v3454_v29 = vunpack.c.l.b16 %v3358_v4  ;;  %v3455_v35 = vunpack.c.l.b16 %v3359_v34  ;;  %v3481_v45 = vsel %vm2046_vm10, %v6906_v10, %v3480_v42  ;;  %v3344_v19 = vpack.c.bf16 %v6896_v12, %v6896_v12  ;;  %3860 = vmatprep.subr.bf16.mxu0 %v5662_v8 }
 0x3a9   : > { %v7046_v56 = vpack.c.b16 %v3481_v45, %v6973_v60  ;;  %v3484_v43 = vsel %vm2040_vm7, %v6927_v37, %v6930_v16  ;;  %v3491_v51 = vsel %vm2040_vm7, %v3451_v44, %v3490_v40  ;;  %v3360_v13 = vpack.c.bf16 %v3312_v31, %v3312_v31  ;;  %v5663_v16 = vld [vmem:[%s7510_s5 + $0x70] ss:$8 sps:$4 sm:$0xff]  }
 0x3aa   : > { %v3440_v46 = vunpack.c.l.b16 %v3344_v19  ;;  %v3485_v10 = vsel %vm2042_vm8, %v6936_v2, %v3484_v43  ;;  %v3492_v12 = vsel %vm2042_vm8, %v3452_v53, %v3491_v51  ;;  %v3958_v18 = vrot.slane %v6925_v57, 1  ;;  %v5671_v19 = vld [vmem:[%s7510_s5 + $0x114] ss:$8 sps:$4 sm:$0xff]   ;;  %v5674_v43 = vld [vmem:[%s7510_s5 + $0x124] ss:$8 sps:$4 sm:$0xff]  }
 0x3ab   : > { %v3506_v11 = vsel %vm2135_vm12, 0, %v7046_v56  ;;  %v3486_v60 = vsel %vm2044_vm9, %v6947_v49, %v3485_v10  ;;  %v3493_v36 = vsel %vm2044_vm9, %v3453_v38, %v3492_v12  ;;  %v3456_v37 = vunpack.c.l.b16 %v3360_v13  ;;  %3861 = vmatpush1.bf16.msra.mxu0 %v5660_v55  ;;  %v5668_v49 = vld [vmem:[%s7510_s5 + $0x104] ss:$8 sps:$4 sm:$0xff]   ;;  %v5672_v51 = vld [vmem:[%s7510_s5 + $0x120] ss:$8 sps:$4 sm:$0xff]  }
 0x3ac   : > { %v3566_v6 = vshll.u32 %v3506_v11, 16  ;;  %v3482_v2 = vsel %vm2048_vm3, %v3440_v46, %v6908_v63  ;;  %v3570_v50 = vshrl.u32 %v3506_v11, 16  ;;  %v3487_v57 = vsel %vm2046_vm10, %v6957_v54, %v3486_v60  ;;  %3862 = vmatprep.subr.bf16.mxu0 %v5665_v7  ;;  %v5669_v7 = vld [vmem:[%s7510_s5 + $0x110] ss:$8 sps:$4 sm:$0xff]   ;;  %v5680_v46 = vld [vmem:[%s7510_s5 + $0x144] ss:$8 sps:$4 sm:$0xff]  }
 0x3ad   : > { %v7071_v5 = vpack.c.b16 %v3482_v2, %v3482_v2  ;;  %v3494_v26 = vsel %vm2046_vm10, %v3454_v29, %v3493_v36  ;;  %v3495_v59 = vsel %vm2048_vm3, %v3456_v37, %v3455_v35  ;;  %v3959_v3 = vrot.slane %v6934_v9, 1  ;;  %v5666_v35 = vld [vmem:[%s7510_s5 + $0x100] ss:$8 sps:$4 sm:$0xff]   ;;  %v5675_v13 = vld [vmem:[%s7510_s5 + $0x130] ss:$8 sps:$4 sm:$0xff]  }
 0x3ae   : > { %v3568_v24 = vrot.slane %v3566_v6, 1  ;;  %v7076_v1 = vpack.c.b16 %v3494_v26, %v3487_v57  ;;  %v7078_v63 = vpack.c.b16 %v3495_v59, %v3495_v59  ;;  %v3961_v27 = vrot.slane %v3506_v11, 1  ;;  %v5678_v10 = vld [vmem:[%s7510_s5 + $0x140] ss:$8 sps:$4 sm:$0xff]   ;;  %v5681_v12 = vld [vmem:[%s7510_s5 + $0x150] ss:$8 sps:$4 sm:$0xff]  }
 0x3af   : > { %v3515_v54 = vsel %vm2135_vm12, %v7071_v5, 0  ;;  %3863 = vmatpush1.bf16.msra.mxu0 %v5663_v16  ;;  %v7083_v0 = vsel %vm2511_vm0, %v3958_v18, %v3959_v3  ;;  %v5686_v18 = vld [vmem:[%s7510_s5 + $0x164] ss:$8 sps:$4 sm:$0xff]   ;;  %v5684_v11 = vld [vmem:[%s7510_s5 + $0x160] ss:$8 sps:$4 sm:$0xff]  }
 0x3b0   : > { %v3569_v14 = vsel %vm2158_vm14, %v3565_v30, %v3568_v24  ;;  %v3572_v15 = vor.u32 %v3570_v50, %v3568_v24  ;;  %v3573_v20 = vshll.u32 %v3515_v54, 16  ;;  %v3509_v9 = vsel %vm2135_vm12, 0, %v7076_v1  ;;  %4056 = vmatprep.subr.bf16.mxu0 %v5668_v49  ;;  %v5687_v60 = vld [vmem:[%s7510_s5 + $0x170] ss:$8 sps:$4 sm:$0xff]  }
 0x3b1   : > { %3724 = vmatmul.mubr.bf16.gmra.mrb[36].mxu0 %v3569_v14  ;;  %v3577_v21 = vshrl.u32 %v3515_v54, 16  ;;  %v3580_v47 = vshll.u32 %v3509_v9, 16  ;;  %v7090_v22 = vsel %vm2135_vm12, %v7078_v63, 0  ;;  %v3584_v33 = vshrl.u32 %v3509_v9, 16 }
 0x3b2   : > { %3731 = vmatprep.mubr.bf16.mxu0 %v5704_v32  ;;  %v3575_v17 = vrot.slane %v3573_v20, 1  ;;  %v3587_v58 = vshll.u32 %v7090_v22, 16  ;;  %v7095_v31 = vsel %vm2511_vm0, %v3959_v3, %v3961_v27  ;;  %v3963_v8 = vrot.slane %v3515_v54, 1 }
 0x3b3   : > { %v3582_v39 = vrot.slane %v3580_v47, 1  ;;  %v3965_v62 = vrot.slane %v3509_v9, 1  ;;  %v3967_v61 = vrot.slane %v7090_v22, 1  ;;  %v3591_v30 = vshrl.u32 %v7090_v22, 16 }
 0x3b4   : > { %v3576_v44 = vsel %vm2158_vm14, %v3572_v15, %v3575_v17  ;;  %v3579_v52 = vor.u32 %v3577_v21, %v3575_v17  ;;  %v3589_v4 = vrot.slane %v3587_v58, 1  ;;  %v3964_v38 = vsel %vm2511_vm0, %v3961_v27, %v3963_v8 }
 0x3b5   : > { %v3586_v34 = vor.u32 %v3584_v33, %v3582_v39  ;;  %v7101_v28 = vsel %vm2511_vm0, %v3963_v8, %v3965_v62  ;;  %v7106_v53 = vsel %vm2511_vm0, %v3965_v62, %v3967_v61  ;;  %v3969_v36 = vsel %vm2511_vm0, %v3967_v61, %v6622_v23  ;;  %v7627_v33 = vld [vmem:[#allocation2_spill] sm:$0xff] }
 0x3b6   : > { %v3583_v40 = vsel %vm2158_vm14, %v3579_v52, %v3582_v39  ;;  %v3593_v55 = vor.u32 %v3591_v30, %v3589_v4  ;;  %v4165_v58 = vsub.s32 0, %v7627_v33  ;;  %v4161_v8 = vld [vmem:[%s7511_s6] sm:$0x3]  ;;  %v4169_v62 = vsub.s32 1, %v7627_v33 }
 0x3b7   : > { %v3590_v42 = vsel %vm2158_vm14, %v3586_v34, %v3589_v4 }
 0x3b8   : > { %v3594_v29 = vsel %vm2158_vm14, %v3593_v55, %v6622_v23  ;;  %v7216_v52 = vrot.slane %v4161_v8, %v4169_v62 }
 0x3b9   : > { %3732 = vmatmul.mubr.bf16.gmra.mrb[40].mxu0 %v3576_v44  ;;  %v7214_v44 = vrot.slane %v4161_v8, %v4165_v58 }
 0x3ba   : > { %3741 = vmatprep.mubr.bf16.mxu0 %v5704_v32 }
 0x3c1   : > { %3742 = vmatmul.mubr.bf16.gmra.mrb[44].mxu0 %v3583_v40 }
 0x3c2   : > { %3749 = vmatprep.mubr.bf16.mxu0 %v5704_v32 }
 0x3c9   : > { %3750 = vmatmul.mubr.bf16.gmra.mrb[48].mxu0 %v3590_v42 }
 0x3ca   : > { %3759 = vmatprep.mubr.bf16.mxu0 %v5704_v32 }
 0x3d1   : > { %3760 = vmatmul.mubr.bf16.gmra.mrb[52].mxu0 %v3594_v29 }
 0x3d2   : > { %3880 = vmatprep.mubr.bf16.mxu0 %v5704_v32 }
 0x3d9   : > { %5315 = vmatmul.mubr.msk.bf16.vlgmr.msra.gmra.mrb[32].mxu0 %vm7121_vm2, %v6914_v41  ;;  %v5677_v41 = vld [vmem:[%s7510_s5 + $0x134] ss:$8 sps:$4 sm:$0xff]  }
 0x3da   : > { %4057 = vmatpush1.bf16.msra.mxu0 %v5666_v35  ;;  %3890 = vmatprep.mubr.bf16.mxu0 %v5704_v32 }
 0x3db   : > { %4058 = vmatprep.subr.bf16.mxu0 %v5671_v19 }
 0x3de   : > { %4059 = vmatpush1.bf16.msra.mxu0 %v5669_v7 }
 0x3df   : > { %4060 = vmatprep.subr.bf16.mxu0 %v5674_v43 }
 0x3e1   : > { %5316 = vmatmul.mubr.msk.bf16.gmra.mrb[56].mxu0 %vm2135_vm12, %v6918_v48  ;;  %v5683_v48 = vld [vmem:[%s7510_s5 + $0x154] ss:$8 sps:$4 sm:$0xff]  }
 0x3e2   : > { %4061 = vmatpush1.bf16.msra.mxu0 %v5672_v51  ;;  %3898 = vmatprep.mubr.bf16.mxu0 %v5704_v32 }
 0x3e3   : > { %4062 = vmatprep.subr.bf16.mxu0 %v5677_v41 }
 0x3e6   : > { %4063 = vmatpush1.bf16.msra.mxu0 %v5675_v13 }
 0x3e7   : > { %4064 = vmatprep.subr.bf16.mxu0 %v5680_v46 }
 0x3e9   : > { %5318 = vmatmul.mubr.msk.bf16.gmra.mrb[40].mxu0 %vm7121_vm2, %v7046_v56  ;;  %v5689_v56 = vld [vmem:[%s7510_s5 + $0x174] ss:$8 sps:$4 sm:$0xff]  }
 0x3ea   : > { %3908 = vmatprep.mubr.bf16.mxu0 %v5704_v32  ;;  %4065 = vmatpush1.bf16.msra.mxu0 %v5678_v10 }
 0x3eb   : > { %4066 = vmatprep.subr.bf16.mxu0 %v5683_v48 }
 0x3ee   : > { %4067 = vmatpush1.bf16.msra.mxu0 %v5681_v12 }
 0x3ef   : > { %4068 = vmatprep.subr.bf16.mxu0 %v5686_v18 }
 0x3f1   : > { %5319 = vmatmul.mubr.msk.bf16.gmra.mrb[60].mxu0 %vm2135_vm12, %v7071_v5 }
 0x3f2   : > { %3916 = vmatprep.mubr.bf16.mxu0 %v5704_v32  ;;  %4069 = vmatpush1.bf16.msra.mxu0 %v5684_v11 }
 0x3f3   : > { %4070 = vmatprep.subr.bf16.mxu0 %v5689_v56 }
 0x3f6   : > { %4071 = vmatpush1.bf16.msra.mxu0 %v5687_v60 }
 0x3f9   : > { %5321 = vmatmul.mubr.msk.bf16.gmra.mrb[48].mxu0 %vm7121_vm2, %v7076_v1 }
 0x3fa   : > { %3926 = vmatprep.mubr.bf16.mxu0 %v5704_v32 }
 0x401   : > { %5322 = vmatmul.mubr.msk.bf16.gmra.mrb[64].mxu0 %vm2135_vm12, %v7078_v63 }
 0x402   : > { %4088 = vmatprep.mubr.bf16.mxu0 %v5704_v32 }
 0x409   : > { %4089 = vmatmul.mubr.bf16.vlgmr.msra.gmra.mrb[32].mxu0 %v7083_v0 }
 0x40a   : > { %4098 = vmatprep.mubr.bf16.mxu0 %v5704_v32 }
 0x411   : > { %4099 = vmatmul.mubr.bf16.gmra.mrb[68].mxu0 %v7095_v31 }
 0x412   : > { %4106 = vmatprep.mubr.bf16.mxu0 %v5704_v32 }
 0x419   : > { %4107 = vmatmul.mubr.bf16.gmra.mrb[40].mxu0 %v3964_v38 }
 0x41a   : > { %4116 = vmatprep.mubr.bf16.mxu0 %v5704_v32 }
 0x421   : > { %4117 = vmatmul.mubr.bf16.gmra.mrb[72].mxu0 %v7101_v28 }
 0x422   : > { %4124 = vmatprep.mubr.bf16.mxu0 %v5704_v32 }
 0x429   : > { %4125 = vmatmul.mubr.bf16.gmra.mrb[48].mxu0 %v7106_v53 }
 0x42a   : > { %4134 = vmatprep.mubr.bf16.mxu0 %v5704_v32 }
 0x431   : > { %4135 = vmatmul.mubr.bf16.gmra.mrb[76].mxu0 %v3969_v36 }
 0x484   : > { %v3725_v37 = vpop.f32.mrb[36].mxu0 }
 0x485   : > { %v3727_v16 = vpop.f32.mrb[37].mxu0 }
 0x486   : > { %v3729_v6 = vpop.f32.mrb[38].mxu0 }
 0x487   : > { %v3730_v2 = vpop.f32.mrb[39].mxu0 }
 0x494   : > { %v3743_v50 = vpop.f32.mrb[44].mxu0 }
 0x495   : > { %v3745_v57 = vpop.f32.mrb[45].mxu0 }
 0x496   : > { %v3747_v49 = vpop.f32.mrb[46].mxu0 }
 0x497   : > { %v3748_v5 = vpop.f32.mrb[47].mxu0 }
 0x4a4   : > { %v3761_v26 = vpop.f32.mrb[52].mxu0 }
 0x4a5   : > { %v3763_v59 = vpop.f32.mrb[53].mxu0 }
 0x4a6   : > { %v3765_v3 = vpop.f32.mrb[54].mxu0 }
 0x4a7   : > { %v3766_v24 = vpop.f32.mrb[55].mxu0 }
 0x4b4   : > { %v3892_v1 = vpop.f32.mrb[56].mxu0 }
 0x4b5   : > { %v3893_v32 = vadd.f32 %v3892_v1, %v3725_v37  ;;  %v3894_v63 = vpop.f32.mrb[57].mxu0 }
 0x4b6   : > { %v3895_v27 = vadd.f32 %v3894_v63, %v3727_v16  ;;  %v3896_v54 = vpop.f32.mrb[58].mxu0 }
 0x4b7   : > { %v3897_v0 = vpop.f32.mrb[59].mxu0 }
 0x4c4   : > { %v3910_v23 = vpop.f32.mrb[60].mxu0 }
 0x4c5   : > { %v7201_v14 = vadd.f32 %v3910_v23, %v3743_v50  ;;  %v3912_v15 = vpop.f32.mrb[61].mxu0 }
 0x4c6   : > { %v7203_v20 = vadd.f32 %v3912_v15, %v3745_v57  ;;  %v3914_v9 = vpop.f32.mrb[62].mxu0 }
 0x4c7   : > { %v3915_v21 = vpop.f32.mrb[63].mxu0 }
 0x4d4   : > { %v3928_v47 = vpop.f32.mrb[64].mxu0 }
 0x4d5   : > { %v7205_v22 = vadd.f32 %v3928_v47, %v3761_v26  ;;  %v3930_v17 = vpop.f32.mrb[65].mxu0 }
 0x4d6   : > { %v7208_v31 = vadd.f32 %v3930_v17, %v3763_v59  ;;  %v3932_v39 = vpop.f32.mrb[66].mxu0 }
 0x4d7   : > { %v3933_v61 = vpop.f32.mrb[67].mxu0 }
 0x4dc   : > { %v4090_v4 = vpop.f32.mrb[32].mxu0 }
 0x4dd   : > { %v4173_v34 = vadd.f32 %v7214_v44, %v4090_v4  ;;  %v4092_v38 = vpop.f32.mrb[33].mxu0 }
 0x4de   : > { %v4174_v28 = vadd.f32 %v7216_v52, %v4092_v38  ;;  %v4094_v53 = vpop.f32.mrb[34].mxu0 }
 0x4df   : > { %v4191_v40 = vmax.f32 %v4173_v34, 0.0  ;;  %v4175_v42 = vadd.f32 %v7214_v44, %v4094_v53  ;;  %v4096_v30 = vpop.f32.mrb[35].mxu0 }
 0x4e0   : > { %v4192_v55 = vmax.f32 %v4174_v28, 0.0  ;;  %v4176_v29 = vadd.f32 %v7216_v52, %v4096_v30 }
 0x4e1   : > { %v4193_v35 = vmax.f32 %v4175_v42, 0.0 }
 0x4e2   : > { %v4227_v45 = vcombine.low %v4191_v40, %v4192_v55  ;;  %v4228_v19 = vcombine.high %v4191_v40, %v4192_v55  ;;  %v4194_v7 = vmax.f32 %v4176_v29, 0.0 }
 0x4e4   : > { %v4235_v43 = vrot.slane %v4227_v45, %v5794_v25  ;;  %v4242_v51 = vrot.slane %v4228_v19, %v5794_v25  ;;  %v4245_v41 = vcombine.low %v4193_v35, %v4194_v7  ;;  %v4246_v13 = vcombine.high %v4193_v35, %v4194_v7  ;;  %v4100_v46 = vpop.f32.mrb[68].mxu0 }
 0x4e5   : > { %v4147_v10 = vadd.f32 %v4100_v46, %v3893_v32  ;;  %v4102_v48 = vpop.f32.mrb[69].mxu0 }
 0x4e6   : > { %v4243_v12 = vcombine.high %v4235_v43, %v4235_v43  ;;  %v4244_v18 = vcombine.high %v4242_v51, %v4242_v51  ;;  %v4365_v11 = vrot.slane %v4235_v43, %v5794_v25  ;;  %v4381_v56 = vrot.slane %v4242_v51, %v5794_v25  ;;  %v4104_v60 = vpop.f32.mrb[70].mxu0 }
 0x4e7   : > { %v7227_v36 = vrot.slane %v4245_v41, %v5794_v25  ;;  %v7230_v37 = vrot.slane %v4246_v13, %v5794_v25  ;;  %v7233_v16 = vadd.f32 %v7214_v44, %v4147_v10  ;;  %v7235_v6 = vadd.f32 %v4102_v48, %v3895_v27  ;;  %v4105_v2 = vpop.f32.mrb[71].mxu0 }
 0x4e8   : > { %v4366_v50 = vcombine.high %v4365_v11, %v4365_v11  ;;  %v4373_v57 = vrot.slane %v4243_v12, %v5794_v25  ;;  %v4382_v49 = vcombine.high %v4381_v56, %v4381_v56  ;;  %v4389_v5 = vrot.slane %v4244_v18, %v5794_v25 }
 0x4e9   : > { %v4629_v26 = vsel %vm2976_vm1, %v4365_v11, -inf  ;;  %v4657_v59 = vsel %vm2976_vm1, %v4381_v56, -inf  ;;  %v4261_v3 = vcombine.high %v7227_v36, %v7227_v36  ;;  %v4262_v24 = vcombine.high %v7230_v37, %v7230_v37 }
 0x4ea   : > { %v4374_v1 = vcombine.high %v4373_v57, %v4373_v57  ;;  %v4390_v32 = vcombine.high %v4389_v5, %v4389_v5  ;;  %v4630_v63 = vrot.slane %v4629_v26, 4  ;;  %v4636_v27 = vsel %vm2976_vm1, %v4366_v50, -inf }
 0x4eb   : > { %v4637_v54 = vrot.slane %v4636_v27, 4  ;;  %v4643_v0 = vsel %vm2976_vm1, %v4373_v57, -inf  ;;  %v4658_v23 = vrot.slane %v4657_v59, 4  ;;  %v4664_v15 = vsel %vm2976_vm1, %v4382_v49, -inf }
 0x4ec   : > { %v4631_v9 = vmax.f32 %v4629_v26, %v4630_v63  ;;  %v4644_v21 = vrot.slane %v4643_v0, 4  ;;  %v4650_v47 = vsel %vm2976_vm1, %v4374_v1, -inf  ;;  %v4665_v17 = vrot.slane %v4664_v15, 4  ;;  %v7249_v33 = vpop.f32.mrb[40].mxu0 }
 0x4ed   : > { %v4638_v58 = vmax.f32 %v4636_v27, %v4637_v54  ;;  %v4651_v39 = vrot.slane %v4650_v47, 4  ;;  %v4659_v8 = vmax.f32 %v4657_v59, %v4658_v23  ;;  %v4671_v62 = vsel %vm2976_vm1, %v4389_v5, -inf  ;;  %v7252_v61 = vpop.f32.mrb[41].mxu0 }
 0x4ee   : > { %v4632_v4 = vrot.slane %v4631_v9, 2  ;;  %v4645_v34 = vmax.f32 %v4643_v0, %v4644_v21  ;;  %v4666_v38 = vmax.f32 %v4664_v15, %v4665_v17  ;;  %v4672_v28 = vrot.slane %v4671_v62, 4  ;;  %v7254_v53 = vpop.f32.mrb[42].mxu0 }
 0x4ef   : > { %v4639_v40 = vrot.slane %v4638_v58, 2  ;;  %v4652_v42 = vmax.f32 %v4650_v47, %v4651_v39  ;;  %v4660_v30 = vrot.slane %v4659_v8, 2  ;;  %v4678_v55 = vsel %vm2976_vm1, %v4390_v32, -inf  ;;  %v7257_v29 = vpop.f32.mrb[43].mxu0 }
 0x4f0   : > { %v4633_v35 = vmax.f32 %v4631_v9, %v4632_v4  ;;  %v4646_v45 = vrot.slane %v4645_v34, 2  ;;  %v4667_v19 = vrot.slane %v4666_v38, 2  ;;  %v4673_v7 = vmax.f32 %v4671_v62, %v4672_v28 }
 0x4f1   : > { %v4640_v43 = vmax.f32 %v4638_v58, %v4639_v40  ;;  %v4653_v51 = vrot.slane %v4652_v42, 2  ;;  %v4661_v41 = vmax.f32 %v4659_v8, %v4660_v30  ;;  %v4679_v13 = vrot.slane %v4678_v55, 4 }
 0x4f2   : > { %v4634_v46 = vrot.slane %v4633_v35, 1  ;;  %v4647_v10 = vmax.f32 %v4645_v34, %v4646_v45  ;;  %v4668_v48 = vmax.f32 %v4666_v38, %v4667_v19  ;;  %v4674_v12 = vrot.slane %v4673_v7, 2 }
 0x4f3   : > { %v4641_v18 = vrot.slane %v4640_v43, 1  ;;  %v4654_v11 = vmax.f32 %v4652_v42, %v4653_v51  ;;  %v4662_v56 = vrot.slane %v4661_v41, 1  ;;  %v4680_v60 = vmax.f32 %v4678_v55, %v4679_v13 }
 0x4f4   : > { %v4635_v2 = vmax.f32 %v4633_v35, %v4634_v46  ;;  %v4648_v50 = vrot.slane %v4647_v10, 1  ;;  %v4669_v57 = vrot.slane %v4668_v48, 1  ;;  %v4675_v49 = vmax.f32 %v4673_v7, %v4674_v12  ;;  %v7259_v5 = vpop.f32.mrb[72].mxu0 }
 0x4f5   : > { %v4642_v26 = vmax.f32 %v4640_v43, %v4641_v18  ;;  %v4655_v59 = vrot.slane %v4654_v11, 1  ;;  %v4663_v1 = vmax.f32 %v4661_v41, %v4662_v56  ;;  %v4681_v32 = vrot.slane %v4680_v60, 2  ;;  %v7261_v63 = vpop.f32.mrb[73].mxu0 }
 0x4f6   : > { %v4649_v27 = vmax.f32 %v4647_v10, %v4648_v50  ;;  %v4670_v54 = vmax.f32 %v4668_v48, %v4669_v57  ;;  %v4676_v0 = vrot.slane %v4675_v49, 1  ;;  %v4397_v23 = vrot.slane %v7227_v36, %v5794_v25  ;;  %v4122_v15 = vpop.f32.mrb[74].mxu0 }
 0x4f7   : > { %v4656_v9 = vmax.f32 %v4654_v11, %v4655_v59  ;;  %v4682_v21 = vmax.f32 %v4680_v60, %v4681_v32  ;;  %v4405_v47 = vrot.slane %v4261_v3, %v5794_v25  ;;  %v4413_v17 = vrot.slane %v7230_v37, %v5794_v25  ;;  %v4123_v58 = vpop.f32.mrb[75].mxu0 }
 0x4f8   : > { %v4677_v39 = vmax.f32 %v4675_v49, %v4676_v0  ;;  %v5061_v8 = vsel %vm2048_vm3, %v4649_v27, %v4635_v2  ;;  %v4398_v62 = vcombine.high %v4397_v23, %v4397_v23  ;;  %v4421_v4 = vrot.slane %v4262_v24, %v5794_v25 }
 0x4f9   : > { %v4683_v34 = vrot.slane %v4682_v21, 1  ;;  %v5062_v38 = vsel %vm2050_vm4, %v4663_v1, %v5061_v8  ;;  %v5068_v28 = vsel %vm2048_vm3, %v4656_v9, %v4642_v26  ;;  %v4406_v36 = vcombine.high %v4405_v47, %v4405_v47 }
 0x4fa   : > { %v7279_v3 = vsel %vm2038_vm6, %v4677_v39, %v5062_v38  ;;  %v5069_v40 = vsel %vm2050_vm4, %v4670_v54, %v5068_v28  ;;  %v4414_v42 = vcombine.high %v4413_v17, %v4413_v17  ;;  %v4422_v30 = vcombine.high %v4421_v4, %v4421_v4 }
 0x4fb   : > { %v4684_v55 = vmax.f32 %v4682_v21, %v4683_v34  ;;  %v4685_v35 = vsel %vm2976_vm1, %v4397_v23, -inf  ;;  %v4692_v45 = vsel %vm2976_vm1, %v4398_v62, -inf  ;;  %v4699_v37 = vsel %vm2976_vm1, %v4405_v47, -inf }
 0x4fc   : > { %v4686_v24 = vrot.slane %v4685_v35, 4  ;;  %v4693_v19 = vrot.slane %v4692_v45, 4  ;;  %v4700_v7 = vrot.slane %v4699_v37, 4  ;;  %v4706_v43 = vsel %vm2976_vm1, %v4406_v36, -inf  ;;  %v7286_v51 = vpop.f32.mrb[48].mxu0 }
 0x4fd   : > { %v5070_v41 = vsel %vm2038_vm6, %v4684_v55, %v5069_v40  ;;  %v4707_v13 = vrot.slane %v4706_v43, 4  ;;  %v4713_v46 = vsel %vm2976_vm1, %v4413_v17, -inf  ;;  %v4720_v10 = vsel %vm2976_vm1, %v4414_v42, -inf  ;;  %v7291_v48 = vpop.f32.mrb[49].mxu0 }
 0x4fe   : > { %v4687_v12 = vmax.f32 %v4685_v35, %v4686_v24  ;;  %v4694_v18 = vmax.f32 %v4692_v45, %v4693_v19  ;;  %v4701_v11 = vmax.f32 %v4699_v37, %v4700_v7  ;;  %v4714_v56 = vrot.slane %v4713_v46, 4  ;;  %v7293_v60 = vpop.f32.mrb[50].mxu0 }
 0x4ff   : > { %v4708_v2 = vmax.f32 %v4706_v43, %v4707_v13  ;;  %v4721_v50 = vrot.slane %v4720_v10, 4  ;;  %v4727_v57 = vsel %vm2976_vm1, %v4421_v4, -inf  ;;  %v4734_v49 = vsel %vm2976_vm1, %v4422_v30, -inf  ;;  %v7297_v26 = vpop.f32.mrb[51].mxu0 }
 0x500   : > { %v4688_v59 = vrot.slane %v4687_v12, 2  ;;  %v4695_v1 = vrot.slane %v4694_v18, 2  ;;  %v4702_v32 = vrot.slane %v4701_v11, 2  ;;  %v4715_v27 = vmax.f32 %v4713_v46, %v4714_v56 }
 0x501   : > { %v4709_v54 = vrot.slane %v4708_v2, 2  ;;  %v4722_v0 = vmax.f32 %v4720_v10, %v4721_v50  ;;  %v4728_v23 = vrot.slane %v4727_v57, 4  ;;  %v4735_v15 = vrot.slane %v4734_v49, 4 }
 0x502   : > { %v4689_v9 = vmax.f32 %v4687_v12, %v4688_v59  ;;  %v4696_v21 = vmax.f32 %v4694_v18, %v4695_v1  ;;  %v4703_v47 = vmax.f32 %v4701_v11, %v4702_v32  ;;  %v4716_v17 = vrot.slane %v4715_v27, 2 }
 0x503   : > { %v4710_v58 = vmax.f32 %v4708_v2, %v4709_v54  ;;  %v4723_v39 = vrot.slane %v4722_v0, 2  ;;  %v4729_v8 = vmax.f32 %v4727_v57, %v4728_v23  ;;  %v4736_v62 = vmax.f32 %v4734_v49, %v4735_v15 }
 0x504   : > { %v4690_v4 = vrot.slane %v4689_v9, 1  ;;  %v4697_v34 = vrot.slane %v4696_v21, 1  ;;  %v4704_v38 = vrot.slane %v4703_v47, 1  ;;  %v4717_v28 = vmax.f32 %v4715_v27, %v4716_v17  ;;  %v7299_v36 = vpop.f32.mrb[76].mxu0 }
 0x505   : > { %v4711_v40 = vrot.slane %v4710_v58, 1  ;;  %v4724_v42 = vmax.f32 %v4722_v0, %v4723_v39  ;;  %v4730_v30 = vrot.slane %v4729_v8, 2  ;;  %v4737_v55 = vrot.slane %v4736_v62, 2  ;;  %v7301_v35 = vpop.f32.mrb[77].mxu0 }
 0x506   : > { %v4691_v45 = vmax.f32 %v4689_v9, %v4690_v4  ;;  %v4698_v37 = vmax.f32 %v4696_v21, %v4697_v34  ;;  %v4705_v24 = vmax.f32 %v4703_v47, %v4704_v38  ;;  %v4718_v19 = vrot.slane %v4717_v28, 1  ;;  %v4140_v7 = vpop.f32.mrb[78].mxu0 }
 0x507   : > { %v4712_v43 = vmax.f32 %v4710_v58, %v4711_v40  ;;  %v4725_v13 = vrot.slane %v4724_v42, 1  ;;  %v4731_v46 = vmax.f32 %v4729_v8, %v4730_v30  ;;  %v4738_v10 = vmax.f32 %v4736_v62, %v4737_v55  ;;  %v4141_v12 = vpop.f32.mrb[79].mxu0 }
 0x508   : > { %v4719_v18 = vmax.f32 %v4717_v28, %v4718_v19  ;;  %v5064_v11 = vsel %vm2040_vm7, %v4691_v45, %v7279_v3  ;;  %v5071_v56 = vsel %vm2040_vm7, %v4698_v37, %v5070_v41  ;;  %v4195_v2 = vmax.f32 %v7233_v16, 0.0 }
 0x509   : > { %v4726_v50 = vmax.f32 %v4724_v42, %v4725_v13  ;;  %v4732_v57 = vrot.slane %v4731_v46, 1  ;;  %v4739_v49 = vrot.slane %v4738_v10, 1  ;;  %v5065_v59 = vsel %vm2042_vm8, %v4705_v24, %v5064_v11 }
 0x50a   : > { %v5066_v1 = vsel %vm2044_vm9, %v4719_v18, %v5065_v59  ;;  %v5072_v32 = vsel %vm2042_vm8, %v4712_v43, %v5071_v56  ;;  %v4178_v27 = vadd.f32 %v7216_v52, %v7235_v6  ;;  %v4179_v54 = vadd.f32 %v7214_v44, %v7249_v33 }
 0x50b   : > { %v4733_v16 = vmax.f32 %v4731_v46, %v4732_v57  ;;  %v4740_v3 = vmax.f32 %v4738_v10, %v4739_v49  ;;  %v5073_v41 = vsel %vm2044_vm9, %v4726_v50, %v5072_v32  ;;  %v4180_v0 = vadd.f32 %v7216_v52, %v7252_v61 }
 0x50c   : > { %v4196_v23 = vmax.f32 %v4178_v27, 0.0  ;;  %v4197_v6 = vmax.f32 %v4179_v54, 0.0  ;;  %v4181_v33 = vadd.f32 %v7214_v44, %v7254_v53  ;;  %v4182_v15 = vadd.f32 %v7216_v52, %v7257_v29 }
 0x50d   : > { %v5067_v9 = vsel %vm2046_vm10, %v4733_v16, %v5066_v1  ;;  %v5074_v21 = vsel %vm2046_vm10, %v4740_v3, %v5073_v41  ;;  %v4198_v47 = vmax.f32 %v4180_v0, 0.0  ;;  %v4153_v17 = vadd.f32 %v7259_v5, %v7201_v14 }
 0x50e   : > { %5115 = vst [vmem:[%s7319_s14] sm:$0xff] %v5067_v9  ;;  %5116 = vst [vmem:[%s7319_s14 + $0x8] sm:$0xff] %v5074_v21  ;;  %v4263_v58 = vcombine.low %v4195_v2, %v4196_v23  ;;  %v4199_v61 = vmax.f32 %v4181_v33, 0.0  ;;  %v4200_v39 = vmax.f32 %v4182_v15, 0.0  ;;  %v4154_v8 = vadd.f32 %v7261_v63, %v7203_v20 }
 0x50f   : > { %v4271_v53 = vcombine.low %v4197_v6, %v4198_v47  ;;  %v4272_v62 = vcombine.high %v4197_v6, %v4198_v47  ;;  %v7337_v29 = vadd.f32 %v7214_v44, %v4153_v17  ;;  %v7341_v4 = vadd.f32 %v7214_v44, %v7286_v51 }
 0x510   : > { %v4270_v34 = vrot.slane %v4263_v58, %v5794_v25  ;;  %v4289_v14 = vcombine.low %v4199_v61, %v4200_v39  ;;  %v4290_v5 = vcombine.high %v4199_v61, %v4200_v39  ;;  %v7345_v38 = vadd.f32 %v7216_v52, %v4154_v8 }
 0x511   : > { %v4279_v28 = vrot.slane %v4271_v53, %v5794_v25  ;;  %v4286_v20 = vrot.slane %v4272_v62, %v5794_v25  ;;  %v4201_v63 = vmax.f32 %v7337_v29, 0.0  ;;  %v4203_v40 = vmax.f32 %v7341_v4, 0.0 }
 0x512   : > { %v4429_v42 = vrot.slane %v4270_v34, %v5794_v25  ;;  %v7353_v51 = vrot.slane %v4289_v14, %v5794_v25  ;;  %v7356_v30 = vrot.slane %v4290_v5, %v5794_v25  ;;  %v4202_v55 = vmax.f32 %v7345_v38, 0.0 }
 0x513   : > { %v4287_v45 = vcombine.high %v4279_v28, %v4279_v28  ;;  %v4288_v37 = vcombine.high %v4286_v20, %v4286_v20  ;;  %v4437_v24 = vrot.slane %v4279_v28, %v5794_v25  ;;  %v4453_v19 = vrot.slane %v4286_v20, %v5794_v25 }
 0x514   : > { %v4430_v7 = vcombine.high %v4429_v42, %v4429_v42  ;;  %v4741_v43 = vsel %vm2976_vm1, %v4429_v42, -inf  ;;  %v4305_v13 = vcombine.high %v7353_v51, %v7353_v51  ;;  %v4306_v46 = vcombine.high %v7356_v30, %v7356_v30 }
 0x515   : > { %v4742_v10 = vrot.slane %v4741_v43, 4  ;;  %v4438_v12 = vcombine.high %v4437_v24, %v4437_v24  ;;  %v4445_v18 = vrot.slane %v4287_v45, %v5794_v25  ;;  %v4454_v11 = vcombine.high %v4453_v19, %v4453_v19 }
 0x516   : > { %v4748_v56 = vsel %vm2976_vm1, %v4430_v7, -inf  ;;  %v4461_v2 = vrot.slane %v4288_v37, %v5794_v25  ;;  %v4755_v50 = vsel %vm2976_vm1, %v4437_v24, -inf  ;;  %v4783_v57 = vsel %vm2976_vm1, %v4453_v19, -inf }
 0x517   : > { %v4743_v49 = vmax.f32 %v4741_v43, %v4742_v10  ;;  %v4749_v59 = vrot.slane %v4748_v56, 4  ;;  %v4446_v1 = vcombine.high %v4445_v18, %v4445_v18  ;;  %v4756_v32 = vrot.slane %v4755_v50, 4 }
 0x518   : > { %v4462_v27 = vcombine.high %v4461_v2, %v4461_v2  ;;  %v4762_v54 = vsel %vm2976_vm1, %v4438_v12, -inf  ;;  %v4769_v16 = vsel %vm2976_vm1, %v4445_v18, -inf  ;;  %v4784_v3 = vrot.slane %v4783_v57, 4 }
 0x519   : > { %v4744_v41 = vrot.slane %v4743_v49, 2  ;;  %v4750_v0 = vmax.f32 %v4748_v56, %v4749_v59  ;;  %v4757_v23 = vmax.f32 %v4755_v50, %v4756_v32  ;;  %v4763_v6 = vrot.slane %v4762_v54, 4 }
 0x51a   : > { %v4770_v33 = vrot.slane %v4769_v16, 4  ;;  %v4776_v15 = vsel %vm2976_vm1, %v4446_v1, -inf  ;;  %v4785_v9 = vmax.f32 %v4783_v57, %v4784_v3  ;;  %v4790_v21 = vsel %vm2976_vm1, %v4454_v11, -inf }
 0x51b   : > { %v4745_v47 = vmax.f32 %v4743_v49, %v4744_v41  ;;  %v4751_v17 = vrot.slane %v4750_v0, 2  ;;  %v4758_v58 = vrot.slane %v4757_v23, 2  ;;  %v4764_v61 = vmax.f32 %v4762_v54, %v4763_v6 }
 0x51c   : > { %v4771_v39 = vmax.f32 %v4769_v16, %v4770_v33  ;;  %v4777_v8 = vrot.slane %v4776_v15, 4  ;;  %v4786_v53 = vrot.slane %v4785_v9, 2  ;;  %v4791_v62 = vrot.slane %v4790_v21, 4 }
 0x51d   : > { %v4746_v34 = vrot.slane %v4745_v47, 1  ;;  %v4752_v14 = vmax.f32 %v4750_v0, %v4751_v17  ;;  %v4759_v5 = vmax.f32 %v4757_v23, %v4758_v58  ;;  %v4765_v28 = vrot.slane %v4764_v61, 2 }
 0x51e   : > { %v4772_v20 = vrot.slane %v4771_v39, 2  ;;  %v4778_v42 = vmax.f32 %v4776_v15, %v4777_v8  ;;  %v4787_v45 = vmax.f32 %v4785_v9, %v4786_v53  ;;  %v4792_v37 = vmax.f32 %v4790_v21, %v4791_v62 }
 0x51f   : > { %v4747_v24 = vmax.f32 %v4745_v47, %v4746_v34  ;;  %v4753_v19 = vrot.slane %v4752_v14, 1  ;;  %v4760_v7 = vrot.slane %v4759_v5, 1  ;;  %v4766_v43 = vmax.f32 %v4764_v61, %v4765_v28 }
 0x520   : > { %v4773_v10 = vmax.f32 %v4771_v39, %v4772_v20  ;;  %v4779_v12 = vrot.slane %v4778_v42, 2  ;;  %v4788_v18 = vrot.slane %v4787_v45, 1  ;;  %v4793_v11 = vrot.slane %v4792_v37, 2 }
 0x521   : > { %v4754_v56 = vmax.f32 %v4752_v14, %v4753_v19  ;;  %5117 = vst [vmem:[%s7319_s14 + $0x10] sm:$0x1] %v4747_v24  ;;  %v4761_v50 = vmax.f32 %v4759_v5, %v4760_v7  ;;  %v4767_v57 = vrot.slane %v4766_v43, 1  ;;  %v4797_v49 = vsel %vm2976_vm1, %v4461_v2, -inf }
 0x522   : > { %v4774_v59 = vrot.slane %v4773_v10, 1  ;;  %v4780_v1 = vmax.f32 %v4778_v42, %v4779_v12  ;;  %v4789_v32 = vmax.f32 %v4787_v45, %v4788_v18  ;;  %v4794_v54 = vmax.f32 %v4792_v37, %v4793_v11 }
 0x523   : > { %5118 = vst [vmem:[%s7319_s14 + $0x18] sm:$0x1] %v4754_v56  ;;  %v4768_v16 = vmax.f32 %v4766_v43, %v4767_v57  ;;  %v4798_v3 = vrot.slane %v4797_v49, 4  ;;  %v4804_v41 = vsel %vm2976_vm1, %v4462_v27, -inf  ;;  %v4469_v0 = vrot.slane %v7353_v51, %v5794_v25 }
 0x524   : > { %v4775_v23 = vmax.f32 %v4773_v10, %v4774_v59  ;;  %v4781_v6 = vrot.slane %v4780_v1, 1  ;;  %v4795_v33 = vrot.slane %v4794_v54, 1  ;;  %v4805_v15 = vrot.slane %v4804_v41, 4 }
 0x525   : > { %v4799_v9 = vmax.f32 %v4797_v49, %v4798_v3  ;;  %v4470_v21 = vcombine.high %v4469_v0, %v4469_v0  ;;  %v4477_v2 = vrot.slane %v4305_v13, %v5794_v25  ;;  %v4485_v47 = vrot.slane %v7356_v30, %v5794_v25 }
 0x526   : > { %v4782_v17 = vmax.f32 %v4780_v1, %v4781_v6  ;;  %v4796_v58 = vmax.f32 %v4794_v54, %v4795_v33  ;;  %v4806_v27 = vmax.f32 %v4804_v41, %v4805_v15  ;;  %v5075_v61 = vsel %vm2048_vm3, %v4775_v23, %v4761_v50 }
 0x527   : > { %v4800_v39 = vrot.slane %v4799_v9, 2  ;;  %v5076_v8 = vsel %vm2050_vm4, %v4789_v32, %v5075_v61  ;;  %v4478_v53 = vcombine.high %v4477_v2, %v4477_v2  ;;  %v4486_v62 = vcombine.high %v4485_v47, %v4485_v47 }
 0x528   : > { %v4807_v34 = vrot.slane %v4806_v27, 2  ;;  %v5082_v14 = vsel %vm2048_vm3, %v4782_v17, %v4768_v16  ;;  %v4493_v51 = vrot.slane %v4306_v46, %v5794_v25  ;;  %v4811_v13 = vsel %vm2976_vm1, %v4469_v0, -inf }
 0x529   : > { %v4801_v5 = vmax.f32 %v4799_v9, %v4800_v39  ;;  %v5083_v28 = vsel %vm2050_vm4, %v4796_v58, %v5082_v14  ;;  %v4812_v20 = vrot.slane %v4811_v13, 4  ;;  %v4818_v42 = vsel %vm2976_vm1, %v4470_v21, -inf }
 0x52a   : > { %v4808_v45 = vmax.f32 %v4806_v27, %v4807_v34  ;;  %v4494_v37 = vcombine.high %v4493_v51, %v4493_v51  ;;  %v4819_v24 = vrot.slane %v4818_v42, 4  ;;  %v4825_v19 = vsel %vm2976_vm1, %v4477_v2, -inf }
 0x52b   : > { %v4802_v7 = vrot.slane %v4801_v5, 1  ;;  %v4813_v43 = vmax.f32 %v4811_v13, %v4812_v20  ;;  %v4826_v10 = vrot.slane %v4825_v19, 4  ;;  %v4832_v12 = vsel %vm2976_vm1, %v4478_v53, -inf }
 0x52c   : > { %v4809_v30 = vrot.slane %v4808_v45, 1  ;;  %v4820_v46 = vmax.f32 %v4818_v42, %v4819_v24  ;;  %v4833_v18 = vrot.slane %v4832_v12, 4  ;;  %v4839_v11 = vsel %vm2976_vm1, %v4485_v47, -inf }
 0x52d   : > { %v4803_v56 = vmax.f32 %v4801_v5, %v4802_v7  ;;  %v4814_v50 = vrot.slane %v4813_v43, 2  ;;  %v4827_v57 = vmax.f32 %v4825_v19, %v4826_v10  ;;  %v4840_v49 = vrot.slane %v4839_v11, 4 }
 0x52e   : > { %v4810_v59 = vmax.f32 %v4808_v45, %v4809_v30  ;;  %v4821_v1 = vrot.slane %v4820_v46, 2  ;;  %v4834_v32 = vmax.f32 %v4832_v12, %v4833_v18  ;;  %v4846_v54 = vsel %vm2976_vm1, %v4486_v62, -inf }
 0x52f   : > { %v5077_v16 = vsel %vm2038_vm6, %v4803_v56, %v5076_v8  ;;  %v4815_v3 = vmax.f32 %v4813_v43, %v4814_v50  ;;  %v4828_v41 = vrot.slane %v4827_v57, 2  ;;  %v4841_v0 = vmax.f32 %v4839_v11, %v4840_v49 }
 0x530   : > { %v5084_v23 = vsel %vm2038_vm6, %v4810_v59, %v5083_v28  ;;  %v4822_v6 = vmax.f32 %v4820_v46, %v4821_v1  ;;  %v4835_v33 = vrot.slane %v4834_v32, 2  ;;  %v4847_v15 = vrot.slane %v4846_v54, 4 }
 0x531   : > { %v4816_v9 = vrot.slane %v4815_v3, 1  ;;  %v4829_v21 = vmax.f32 %v4827_v57, %v4828_v41  ;;  %v4842_v2 = vrot.slane %v4841_v0, 2  ;;  %v4853_v47 = vsel %vm2976_vm1, %v4493_v51, -inf }
 0x532   : > { %v4823_v17 = vrot.slane %v4822_v6, 1  ;;  %v4836_v58 = vmax.f32 %v4834_v32, %v4835_v33  ;;  %v4848_v27 = vmax.f32 %v4846_v54, %v4847_v15  ;;  %v4854_v61 = vrot.slane %v4853_v47, 4 }
 0x533   : > { %v4817_v39 = vmax.f32 %v4815_v3, %v4816_v9  ;;  %v4830_v53 = vrot.slane %v4829_v21, 1  ;;  %v4843_v8 = vmax.f32 %v4841_v0, %v4842_v2  ;;  %v4860_v62 = vsel %vm2976_vm1, %v4494_v37, -inf }
 0x534   : > { %v4824_v34 = vmax.f32 %v4822_v6, %v4823_v17  ;;  %v4837_v14 = vrot.slane %v4836_v58, 1  ;;  %v4849_v13 = vrot.slane %v4848_v27, 2  ;;  %v4855_v5 = vmax.f32 %v4853_v47, %v4854_v61 }
 0x535   : > { %v4831_v28 = vmax.f32 %v4829_v21, %v4830_v53  ;;  %v4844_v20 = vrot.slane %v4843_v8, 1  ;;  %v4861_v42 = vrot.slane %v4860_v62, 4  ;;  %v5078_v45 = vsel %vm2040_vm7, %v4817_v39, %v5077_v16 }
 0x536   : > { %v4838_v24 = vmax.f32 %v4836_v58, %v4837_v14  ;;  %v4850_v51 = vmax.f32 %v4848_v27, %v4849_v13  ;;  %v4856_v19 = vrot.slane %v4855_v5, 2  ;;  %v5085_v7 = vsel %vm2040_vm7, %v4824_v34, %v5084_v23 }
 0x537   : > { %v4845_v43 = vmax.f32 %v4843_v8, %v4844_v20  ;;  %v4862_v10 = vmax.f32 %v4860_v62, %v4861_v42  ;;  %v5079_v12 = vsel %vm2042_vm8, %v4831_v28, %v5078_v45  ;;  %v4307_v37 = vcombine.low %v4201_v63, %v4202_v55 }
 0x538   : > { %v4851_v30 = vrot.slane %v4850_v51, 1  ;;  %v4857_v46 = vmax.f32 %v4855_v5, %v4856_v19  ;;  %v5086_v18 = vsel %vm2042_vm8, %v4838_v24, %v5085_v7  ;;  %v4186_v11 = vadd.f32 %v7216_v52, %v7291_v48 }
 0x539   : > { %v4863_v56 = vrot.slane %v4862_v10, 2  ;;  %v5080_v50 = vsel %vm2044_vm9, %v4845_v43, %v5079_v12  ;;  %v4314_v57 = vrot.slane %v4307_v37, %v5794_v25  ;;  %v4187_v49 = vadd.f32 %v7214_v44, %v7293_v60 }
 0x53a   : > { %v4852_v59 = vmax.f32 %v4850_v51, %v4851_v30  ;;  %v4858_v38 = vrot.slane %v4857_v46, 1  ;;  %v4204_v1 = vmax.f32 %v4186_v11, 0.0  ;;  %v4188_v29 = vadd.f32 %v7216_v52, %v7297_v26 }
 0x53b   : > { %v4864_v63 = vmax.f32 %v4862_v10, %v4863_v56  ;;  %v4501_v55 = vrot.slane %v4314_v57, %v5794_v25  ;;  %v4205_v32 = vmax.f32 %v4187_v49, 0.0  ;;  %v7424_v48 = vadd.f32 %v7299_v36, %v7205_v22 }
 0x53c   : > { %v4859_v54 = vmax.f32 %v4857_v46, %v4858_v38  ;;  %v5087_v16 = vsel %vm2044_vm9, %v4852_v59, %v5086_v18  ;;  %v4315_v60 = vcombine.low %v4203_v40, %v4204_v1  ;;  %v4316_v3 = vcombine.high %v4203_v40, %v4204_v1 }
 0x53d   : > { %v4865_v41 = vrot.slane %v4864_v63, 1  ;;  %v4502_v26 = vcombine.high %v4501_v55, %v4501_v55  ;;  %v4867_v0 = vsel %vm2976_vm1, %v4501_v55, -inf  ;;  %v4206_v23 = vmax.f32 %v4188_v29, 0.0 }
 0x53e   : > { %v5081_v6 = vsel %vm2046_vm10, %v4859_v54, %v5080_v50  ;;  %v4868_v33 = vrot.slane %v4867_v0, 4  ;;  %v4323_v22 = vrot.slane %v4315_v60, %v5794_v25  ;;  %v4330_v36 = vrot.slane %v4316_v3, %v5794_v25 }
 0x53f   : > { %v4866_v15 = vmax.f32 %v4864_v63, %v4865_v41  ;;  %5119 = vst [vmem:[%s7319_s14 + $0x20] sm:$0xff] %v5081_v6  ;;  %v4874_v9 = vsel %vm2976_vm1, %v4502_v26, -inf  ;;  %v4333_v21 = vcombine.low %v4205_v32, %v4206_v23  ;;  %v7437_v4 = vcombine.high %v4205_v32, %v4206_v23 }
 0x540   : > { %v4869_v40 = vmax.f32 %v4867_v0, %v4868_v33  ;;  %v4875_v2 = vrot.slane %v4874_v9, 4  ;;  %v4331_v47 = vcombine.high %v4323_v22, %v4323_v22  ;;  %v4332_v17 = vcombine.high %v4330_v36, %v4330_v36 }
 0x541   : > { %v5088_v58 = vsel %vm2046_vm10, %v4866_v15, %v5087_v16  ;;  %v4509_v27 = vrot.slane %v4323_v22, %v5794_v25  ;;  %v4525_v61 = vrot.slane %v4330_v36, %v5794_v25  ;;  %v7443_v39 = vrot.slane %v4333_v21, %v5794_v25 }
 0x542   : > { %5120 = vst [vmem:[%s7319_s14 + $0x28] sm:$0xff] %v5088_v58  ;;  %v4870_v53 = vrot.slane %v4869_v40, 2  ;;  %v4876_v8 = vmax.f32 %v4874_v9, %v4875_v2  ;;  %v4517_v62 = vrot.slane %v4331_v47, %v5794_v25  ;;  %v4533_v34 = vrot.slane %v4332_v17, %v5794_v25 }
 0x543   : > { %v4510_v14 = vcombine.high %v4509_v27, %v4509_v27  ;;  %v4526_v13 = vcombine.high %v4525_v61, %v4525_v61  ;;  %v4881_v5 = vsel %vm2976_vm1, %v4509_v27, -inf  ;;  %v4909_v28 = vsel %vm2976_vm1, %v4525_v61, -inf }
 0x544   : > { %v4871_v20 = vmax.f32 %v4869_v40, %v4870_v53  ;;  %v4877_v42 = vrot.slane %v4876_v8, 2  ;;  %v4518_v45 = vcombine.high %v4517_v62, %v4517_v62  ;;  %v4534_v24 = vcombine.high %v4533_v34, %v4533_v34 }
 0x545   : > { %v4882_v51 = vrot.slane %v4881_v5, 4  ;;  %v4888_v19 = vsel %vm2976_vm1, %v4510_v14, -inf  ;;  %v4895_v7 = vsel %vm2976_vm1, %v4517_v62, -inf  ;;  %v4910_v43 = vrot.slane %v4909_v28, 4 }
 0x546   : > { %v4872_v10 = vrot.slane %v4871_v20, 1  ;;  %v4878_v12 = vmax.f32 %v4876_v8, %v4877_v42  ;;  %v4889_v37 = vrot.slane %v4888_v19, 4  ;;  %v4896_v30 = vrot.slane %v4895_v7, 4 }
 0x547   : > { %v4883_v46 = vmax.f32 %v4881_v5, %v4882_v51  ;;  %v4902_v18 = vsel %vm2976_vm1, %v4518_v45, -inf  ;;  %v4911_v11 = vmax.f32 %v4909_v28, %v4910_v43  ;;  %v4916_v56 = vsel %vm2976_vm1, %v4526_v13, -inf }
 0x548   : > { %v4873_v50 = vmax.f32 %v4871_v20, %v4872_v10  ;;  %v4879_v57 = vrot.slane %v4878_v12, 1  ;;  %v4890_v49 = vmax.f32 %v4888_v19, %v4889_v37  ;;  %v4897_v59 = vmax.f32 %v4895_v7, %v4896_v30 }
 0x549   : > { %v4884_v38 = vrot.slane %v4883_v46, 2  ;;  %v4903_v1 = vrot.slane %v4902_v18, 4  ;;  %v4912_v29 = vrot.slane %v4911_v11, 2  ;;  %v4917_v63 = vrot.slane %v4916_v56, 4 }
 0x54a   : > { %v4880_v55 = vmax.f32 %v4878_v12, %v4879_v57  ;;  %5121 = vst [vmem:[%s7319_s14 + $0x30] sm:$0x1] %v4873_v50  ;;  %v4891_v32 = vrot.slane %v4890_v49, 2  ;;  %v4898_v54 = vrot.slane %v4897_v59, 2  ;;  %v4923_v16 = vsel %vm2976_vm1, %v4533_v34, -inf }
 0x54b   : > { %v4885_v60 = vmax.f32 %v4883_v46, %v4884_v38  ;;  %v4904_v3 = vmax.f32 %v4902_v18, %v4903_v1  ;;  %v4913_v41 = vmax.f32 %v4911_v11, %v4912_v29  ;;  %v4918_v26 = vmax.f32 %v4916_v56, %v4917_v63 }
 0x54c   : > { %5122 = vst [vmem:[%s7319_s14 + $0x38] sm:$0x1] %v4880_v55  ;;  %v4892_v0 = vmax.f32 %v4890_v49, %v4891_v32  ;;  %v4899_v23 = vmax.f32 %v4897_v59, %v4898_v54  ;;  %v4924_v6 = vrot.slane %v4923_v16, 4  ;;  %v4930_v33 = vsel %vm2976_vm1, %v4534_v24, -inf }
 0x54d   : > { %v4886_v22 = vrot.slane %v4885_v60, 1  ;;  %v4905_v36 = vrot.slane %v4904_v3, 2  ;;  %v4914_v15 = vrot.slane %v4913_v41, 1  ;;  %v4919_v9 = vrot.slane %v4918_v26, 2 }
 0x54e   : > { %v4893_v21 = vrot.slane %v4892_v0, 1  ;;  %v4900_v40 = vrot.slane %v4899_v23, 1  ;;  %v4925_v2 = vmax.f32 %v4923_v16, %v4924_v6  ;;  %v4931_v47 = vrot.slane %v4930_v33, 4 }
 0x54f   : > { %v4887_v17 = vmax.f32 %v4885_v60, %v4886_v22  ;;  %v4906_v58 = vmax.f32 %v4904_v3, %v4905_v36  ;;  %v4915_v27 = vmax.f32 %v4913_v41, %v4914_v15  ;;  %v4920_v61 = vmax.f32 %v4918_v26, %v4919_v9 }
 0x550   : > { %v4894_v53 = vmax.f32 %v4892_v0, %v4893_v21  ;;  %v4901_v8 = vmax.f32 %v4899_v23, %v4900_v40  ;;  %v4926_v62 = vrot.slane %v4925_v2, 2  ;;  %v4932_v34 = vmax.f32 %v4930_v33, %v4931_v47 }
 0x551   : > { %v4907_v14 = vrot.slane %v4906_v58, 1  ;;  %v4921_v13 = vrot.slane %v4920_v61, 1  ;;  %v4348_v5 = vrot.slane %v7437_v4, %v5794_v25  ;;  %v4349_v28 = vcombine.high %v7443_v39, %v7443_v39 }
 0x552   : > { %v4927_v20 = vmax.f32 %v4925_v2, %v4926_v62  ;;  %v4933_v42 = vrot.slane %v4932_v34, 2  ;;  %v5089_v45 = vsel %vm2048_vm3, %v4901_v8, %v4887_v17  ;;  %v4541_v24 = vrot.slane %v7443_v39, %v5794_v25 }
 0x553   : > { %v4908_v51 = vmax.f32 %v4906_v58, %v4907_v14  ;;  %v4922_v19 = vmax.f32 %v4920_v61, %v4921_v13  ;;  %v5090_v7 = vsel %vm2050_vm4, %v4915_v27, %v5089_v45  ;;  %v4350_v43 = vcombine.high %v4348_v5, %v4348_v5 }
 0x554   : > { %v4928_v10 = vrot.slane %v4927_v20, 1  ;;  %v4934_v12 = vmax.f32 %v4932_v34, %v4933_v42  ;;  %v4542_v37 = vcombine.high %v4541_v24, %v4541_v24  ;;  %v4549_v4 = vrot.slane %v4349_v28, %v5794_v25 }
 0x555   : > { %v5096_v30 = vsel %vm2048_vm3, %v4908_v51, %v4894_v53  ;;  %v4557_v46 = vrot.slane %v4348_v5, %v5794_v25  ;;  %v4565_v18 = vrot.slane %v4350_v43, %v5794_v25  ;;  %v4937_v11 = vsel %vm2976_vm1, %v4541_v24, -inf }
 0x556   : > { %v4929_v56 = vmax.f32 %v4927_v20, %v4928_v10  ;;  %v4935_v39 = vrot.slane %v4934_v12, 1  ;;  %v5097_v50 = vsel %vm2050_vm4, %v4922_v19, %v5096_v30  ;;  %v4550_v57 = vcombine.high %v4549_v4, %v4549_v4 }
 0x557   : > { %v4558_v49 = vcombine.high %v4557_v46, %v4557_v46  ;;  %v4566_v59 = vcombine.high %v4565_v18, %v4565_v18  ;;  %v4938_v38 = vrot.slane %v4937_v11, 4  ;;  %v4944_v1 = vsel %vm2976_vm1, %v4542_v37, -inf }
 0x558   : > { %v4936_v29 = vmax.f32 %v4934_v12, %v4935_v39  ;;  %v5091_v63 = vsel %vm2038_vm6, %v4929_v56, %v5090_v7  ;;  %v4945_v55 = vrot.slane %v4944_v1, 4  ;;  %v4951_v32 = vsel %vm2976_vm1, %v4549_v4, -inf }
 0x559   : > { %v4939_v54 = vmax.f32 %v4937_v11, %v4938_v38  ;;  %v4952_v16 = vrot.slane %v4951_v32, 4  ;;  %v4958_v60 = vsel %vm2976_vm1, %v4550_v57, -inf  ;;  %v4965_v3 = vsel %vm2976_vm1, %v4557_v46, -inf }
 0x55a   : > { %v5098_v41 = vsel %vm2038_vm6, %v4936_v29, %v5097_v50  ;;  %v4946_v26 = vmax.f32 %v4944_v1, %v4945_v55  ;;  %v4959_v0 = vrot.slane %v4958_v60, 4  ;;  %v4966_v23 = vrot.slane %v4965_v3, 4 }
 0x55b   : > { %v4940_v6 = vrot.slane %v4939_v54, 2  ;;  %v4953_v33 = vmax.f32 %v4951_v32, %v4952_v16  ;;  %v4972_v22 = vsel %vm2976_vm1, %v4558_v49, -inf  ;;  %v4979_v36 = vsel %vm2976_vm1, %v4565_v18, -inf }
 0x55c   : > { %v4947_v15 = vrot.slane %v4946_v26, 2  ;;  %v4960_v9 = vmax.f32 %v4958_v60, %v4959_v0  ;;  %v4967_v21 = vmax.f32 %v4965_v3, %v4966_v23  ;;  %v4973_v40 = vrot.slane %v4972_v22, 4 }
 0x55d   : > { %v4941_v2 = vmax.f32 %v4939_v54, %v4940_v6  ;;  %v4954_v47 = vrot.slane %v4953_v33, 2  ;;  %v4980_v17 = vrot.slane %v4979_v36, 4  ;;  %v4986_v58 = vsel %vm2976_vm1, %v4566_v59, -inf }
 0x55e   : > { %v4948_v27 = vmax.f32 %v4946_v26, %v4947_v15  ;;  %v4961_v61 = vrot.slane %v4960_v9, 2  ;;  %v4968_v53 = vrot.slane %v4967_v21, 2  ;;  %v4974_v8 = vmax.f32 %v4972_v22, %v4973_v40 }
 0x55f   : > { %v4942_v62 = vrot.slane %v4941_v2, 1  ;;  %v4955_v34 = vmax.f32 %v4953_v33, %v4954_v47  ;;  %v4981_v14 = vmax.f32 %v4979_v36, %v4980_v17  ;;  %v4987_v13 = vrot.slane %v4986_v58, 4 }
 0x560   : > { %v4949_v5 = vrot.slane %v4948_v27, 1  ;;  %v4962_v28 = vmax.f32 %v4960_v9, %v4961_v61  ;;  %v4969_v20 = vmax.f32 %v4967_v21, %v4968_v53  ;;  %v4975_v42 = vrot.slane %v4974_v8, 2 }
 0x561   : > { %v4943_v45 = vmax.f32 %v4941_v2, %v4942_v62  ;;  %v4956_v24 = vrot.slane %v4955_v34, 1  ;;  %v4982_v51 = vrot.slane %v4981_v14, 2  ;;  %v4988_v19 = vmax.f32 %v4986_v58, %v4987_v13 }
 0x562   : > { %v4950_v7 = vmax.f32 %v4948_v27, %v4949_v5  ;;  %v4963_v43 = vrot.slane %v4962_v28, 1  ;;  %v4970_v10 = vrot.slane %v4969_v20, 1  ;;  %v4976_v12 = vmax.f32 %v4974_v8, %v4975_v42 }
 0x563   : > { %v4957_v37 = vmax.f32 %v4955_v34, %v4956_v24  ;;  %v4983_v4 = vmax.f32 %v4981_v14, %v4982_v51  ;;  %v4989_v30 = vrot.slane %v4988_v19, 2  ;;  %v5092_v46 = vsel %vm2040_vm7, %v4943_v45, %v5091_v63 }
 0x564   : > { %v4964_v18 = vmax.f32 %v4962_v28, %v4963_v43  ;;  %v4971_v11 = vmax.f32 %v4969_v20, %v4970_v10  ;;  %v4977_v56 = vrot.slane %v4976_v12, 1  ;;  %v5099_v39 = vsel %vm2040_vm7, %v4950_v7, %v5098_v41 }
 0x565   : > { %v4984_v50 = vrot.slane %v4983_v4, 1  ;;  %v4990_v57 = vmax.f32 %v4988_v19, %v4989_v30  ;;  %v5093_v49 = vsel %vm2042_vm8, %v4957_v37, %v5092_v46  ;;  %v4189_v59 = vadd.f32 %v7214_v44, %v7424_v48 }
 0x566   : > { %v4978_v38 = vmax.f32 %v4976_v12, %v4977_v56  ;;  %v5094_v1 = vsel %vm2044_vm9, %v4971_v11, %v5093_v49  ;;  %v5100_v29 = vsel %vm2042_vm8, %v4964_v18, %v5099_v39  ;;  %v4160_v63 = vadd.f32 %v7301_v35, %v7208_v31 }
 0x567   : > { %v4985_v55 = vmax.f32 %v4983_v4, %v4984_v50  ;;  %v4991_v32 = vrot.slane %v4990_v57, 1  ;;  %v4207_v16 = vmax.f32 %v4189_v59, 0.0 }
 0x568   : > { %v5101_v54 = vsel %vm2044_vm9, %v4978_v38, %v5100_v29  ;;  %v4190_v60 = vadd.f32 %v7216_v52, %v4160_v63 }
 0x569   : > { %v4992_v3 = vmax.f32 %v4990_v57, %v4991_v32  ;;  %v5095_v41 = vsel %vm2046_vm10, %v4985_v55, %v5094_v1 }
 0x56a   : > { %5123 = vst [vmem:[%s7319_s14 + $0x40] sm:$0xff] %v5095_v41  ;;  %v4208_v44 = vmax.f32 %v4190_v60, 0.0 }
 0x56b   : > { %v5102_v48 = vsel %vm2046_vm10, %v4992_v3, %v5101_v54 }
 0x56c   : > { %5124 = vst [vmem:[%s7319_s14 + $0x48] sm:$0xff] %v5102_v48  ;;  %v4351_v26 = vcombine.low %v4207_v16, %v4208_v44 }
 0x56e   : > { %v4358_v0 = vrot.slane %v4351_v26, %v5794_v25 }
 0x570   : > { %v4573_v31 = vrot.slane %v4358_v0, %v5794_v25 }
 0x572   : > { %v4574_v35 = vcombine.high %v4573_v31, %v4573_v31  ;;  %v4993_v23 = vsel %vm2976_vm1, %v4573_v31, -inf }
 0x573   : > { %v4994_v6 = vrot.slane %v4993_v23, 4 }
 0x574   : > { %v5000_v52 = vsel %vm2976_vm1, %v4574_v35, -inf }
 0x575   : > { %v4995_v33 = vmax.f32 %v4993_v23, %v4994_v6  ;;  %v5001_v22 = vrot.slane %v5000_v52, 4 }
 0x577   : > { %v4996_v36 = vrot.slane %v4995_v33, 2  ;;  %v5002_v15 = vmax.f32 %v5000_v52, %v5001_v22 }
 0x579   : > { %v4997_v9 = vmax.f32 %v4995_v33, %v4996_v36  ;;  %v5003_v21 = vrot.slane %v5002_v15, 2 }
 0x57b   : > { %v4998_v40 = vrot.slane %v4997_v9, 1  ;;  %v5004_v2 = vmax.f32 %v5002_v15, %v5003_v21 }
 0x57d   : > { %v4999_v47 = vmax.f32 %v4997_v9, %v4998_v40  ;;  %v5005_v17 = vrot.slane %v5004_v2, 1 }
 0x57f   : > { %v5006_v58 = vmax.f32 %v5004_v2, %v5005_v17  ;;  %5125 = vst [vmem:[%s7319_s14 + $0x50] sm:$0x1] %v4999_v47 }
 0x581   : > { %5126 = vst [vmem:[%s7319_s14 + $0x58] sm:$0x1] %v5006_v58 }
 0x582 PF: > { %s17_s24 = sadd.s32 1, %s5699_s24  }
 0x583   : > { %p14_p4 = scmp.ge.s32.totalorder %s17_s24, 4  }
 0x585   :  { %16 = sbr.rel (!%p14_p4) target bundleno = 1 (0x1), region = 82 }

</bundles_post_ra>
